<compile_context>
chip_gen: v5e
topology: v5e:2x2
jax: 0.10.0
libtpu: 0.0.40
codegen_flags: <defaults>
</compile_context>

<pallas_src>
import jax
import jax.numpy as jnp
from jax.experimental import pallas as pl
from jax.experimental.pallas import tpu as pltpu


def _round_up(x, m):
    return ((x + m - 1) // m) * m


def _pick_tile(m, t_max):
    """Balanced row tiling: multiples of 16, no bloated padded last tile, and
    >=2 grid steps when feasible (v7x has 2 TensorCores; 'parallel' only helps
    with >=2 steps).  Returns (tile_rows, padded_rows)."""
    n = max(2, pl.cdiv(m, t_max)) if m >= 32 else 1
    tile = min(_round_up(pl.cdiv(m, n), 16), _round_up(m, 16))
    return tile, _round_up(m, tile)


# ----------------------------- Pallas kernels ------------------------------


def _conv_relu_pool_kernel(p_ref, w_ref, b_ref, o_ref):
    """Fused 3x3 conv (merged 4x4-patch matmul) + 2x2 max-pool + bias + ReLU.

    p_ref : (tm, G*16*Cin) bf16 -- G pooled pixels per row, each a 4x4xCin patch.
    w_ref : (G*16*Cin, 4*G*Cout) bf16 block-diagonal merged weight, resident.
            Columns ordered (pool_pos, g, cout) so the pool-max is over four
            vreg-aligned 128-lane blocks (no lane shuffles).
    b_ref : (1, G*Cout) f32 bias (tiled G times).
    o_ref : (tm, G*Cout) bf16 lane-dense (128-wide) pooled activation.
    """
    z = jnp.dot(p_ref[...], w_ref[...], preferred_element_type=jnp.float32)
    n = o_ref.shape[1]                                   # G*Cout == 128
    m = jnp.maximum(jnp.maximum(z[:, 0:n], z[:, n:2 * n]),
                    jnp.maximum(z[:, 2 * n:3 * n], z[:, 3 * n:4 * n]))
    # Per-channel bias and ReLU commute with the pool max.
    o_ref[...] = jnp.maximum(m + b_ref[...], 0.0).astype(o_ref.dtype)


def _fc_head_kernel(x_ref, w1_ref, b1_ref, w2_ref, b2_ref, o_ref):
    """Fused fc1 + ReLU + (eval-mode dropout) + fc2 + log_softmax.

    fc2 is padded to 128 output columns (zero weights, -1e30 bias) so the store
    is lane-dense; padded logits underflow out of the log_softmax reduction.
    """
    h = jnp.dot(x_ref[...], w1_ref[...], preferred_element_type=jnp.float32)
    h = jnp.maximum(h + b1_ref[...], 0.0)
    # Dropout(p=0.25) is an identity in eval mode.
    z = jnp.dot(h.astype(w2_ref.dtype), w2_ref[...],
                preferred_element_type=jnp.float32)
    z = z + b2_ref[...]
    m = jnp.max(z, axis=-1, keepdims=True)
    s = z - m
    lse = jnp.log(jnp.sum(jnp.exp(s), axis=-1, keepdims=True))
    o_ref[...] = (s - lse).astype(o_ref.dtype)


# ------------------------------ Pallas wrappers -----------------------------


def conv3x3_relu_pool(x_nhwc, w_merged, b_tiled, *, G, Cout, tm_max=512):
    """3x3 conv (stride 1, pad 1) + bias + ReLU + MaxPool2d(2,2), fused.

    x_nhwc: (B, H, W, Cin) bf16.  Returns (B, H//2, W//2, Cout) bf16.
    """
    B, H, W, Cin = x_nhwc.shape
    Ho, Wo = H // 2, W // 2
    Kp = 16 * Cin                       # one 4x4xCin patch per pooled pixel
    M = B * Ho * Wo

    # Shared 4x4 patch of each 2x2 pool window (already bf16: cheap gather).
    xp = jnp.pad(x_nhwc, ((0, 0), (1, 1), (1, 1), (0, 0)))
    taps = [xp[:, r:r + 2 * Ho - 1:2, s:s + 2 * Wo - 1:2, :]
            for r in range(4) for s in range(4)]
    pat = jnp.stack(taps, axis=3).reshape(M, Kp)          # rows: pooled pixel

    # Pack G consecutive pooled pixels per kernel row (lane-dense output).
    Mg = pl.cdiv(M, G)
    pat = jnp.pad(pat, ((0, Mg * G - M), (0, 0))).reshape(Mg, G * Kp)

    tm, Mp = _pick_tile(Mg, tm_max)
    pat = jnp.pad(pat, ((0, Mp - Mg), (0, 0)))
    N = w_merged.shape[1]                                  # 4 * G * Cout

    out = pl.pallas_call(
        _conv_relu_pool_kernel,
        out_shape=jax.ShapeDtypeStruct((Mp, G * Cout), jnp.bfloat16),
        grid=(Mp // tm,),
        in_specs=[
            pl.BlockSpec((tm, G * Kp), lambda i: (i, 0)),      # patches (tiled)
            pl.BlockSpec((G * Kp, N), lambda i: (0, 0)),       # weight: resident
            pl.BlockSpec((1, G * Cout), lambda i: (0, 0)),     # bias:   resident
        ],
        out_specs=pl.BlockSpec((tm, G * Cout), lambda i: (i, 0)),
        compiler_params=pltpu.CompilerParams(dimension_semantics=("parallel",)),
    )(pat, w_merged, b_tiled)

    # Row-major unpack (free reshape), drop padding rows.
    return out[:Mg].reshape(Mg * G, Cout)[:M].reshape(B, Ho, Wo, Cout)


def fc_head(x_flat, w1, b1, w2p, b2p, *, tb_max=512):
    """fc1 + ReLU + (eval dropout) + fc2(padded to 128) + log_softmax, fused."""
    B, K1 = x_flat.shape
    H1 = w1.shape[1]
    NP = w2p.shape[1]

    tb, Bp = _pick_tile(B, tb_max)      # tb<=512 keeps v5e scoped-VMEM happy
    xb = jnp.pad(x_flat, ((0, Bp - B), (0, 0)))

    return pl.pallas_call(
        _fc_head_kernel,
        out_shape=jax.ShapeDtypeStruct((Bp, NP), jnp.float32),
        grid=(Bp // tb,),
        in_specs=[
            pl.BlockSpec((tb, K1), lambda i: (i, 0)),
            pl.BlockSpec((K1, H1), lambda i: (0, 0)),
            pl.BlockSpec((1, H1), lambda i: (0, 0)),
            pl.BlockSpec((H1, NP), lambda i: (0, 0)),
            pl.BlockSpec((1, NP), lambda i: (0, 0)),
        ],
        out_specs=pl.BlockSpec((tb, NP), lambda i: (i, 0)),
        compiler_params=pltpu.CompilerParams(dimension_semantics=("parallel",)),
    )(xb, w1, b1, w2p, b2p)


# --------------------------- Parameter preparation --------------------------


def _merged_conv_weight(w_hwio, G):
    """Block-diagonal merged weight for the fused conv+pool kernel.

    Rows: (g, r, s, ci) over the 4x4xCin patch of pooled pixel g.
    Cols: (pool_pos, g, co) -- pool position outermost so the in-kernel max is
    over four contiguous, vreg-aligned 128-lane blocks.
    """
    Cin, Cout = w_hwio.shape[2], w_hwio.shape[3]
    W6 = jnp.zeros((4, 4, Cin, 2, 2, Cout), w_hwio.dtype)
    for py in range(2):
        for px in range(2):
            W6 = W6.at[py:py + 3, px:px + 3, :, py, px, :].set(w_hwio)
    Kp = 16 * Cin
    Wp4 = W6.reshape(Kp, 4, Cout)                          # (patch, pool, co)
    Wf = jnp.zeros((G, Kp, 4, G, Cout), w_hwio.dtype)
    for g in range(G):
        Wf = Wf.at[g, :, :, g, :].set(Wp4)
    return Wf.reshape(G * Kp, 4 * G * Cout).astype(jnp.bfloat16)


def prepare_params(p, *, n_pad=128):
    """One-time weight preprocessing (hoisted out of the per-forward path)."""
    H1 = p["fc1_w"].shape[1]
    NO = p["fc2_w"].shape[1]
    # fc1 rows permuted from PyTorch flatten order (C,H,W) to NHWC flatten
    # order (H,W,C), so the conv2 output can be flattened with no transpose.
    w1_hwc = p["fc1_w"].reshape(64, 7, 7, H1).transpose(1, 2, 0, 3).reshape(-1, H1)
    # fc2 padded to a lane-dense 128 columns; padded logits get -1e30 bias.
    w2p = jnp.zeros((H1, n_pad), jnp.bfloat16).at[:, :NO].set(
        p["fc2_w"].astype(jnp.bfloat16))
    b2p = jnp.full((1, n_pad), -1e30, jnp.float32).at[0, :NO].set(
        p["fc2_b"].astype(jnp.float32))
    return {
        "c1w": _merged_conv_weight(p["conv1_w"], G=4),                 # (64, 512)
        "c1b": jnp.tile(p["conv1_b"].astype(jnp.float32), 4)[None, :], # (1, 128)
        "c2w": _merged_conv_weight(p["conv2_w"], G=2),                 # (1024, 512)
        "c2b": jnp.tile(p["conv2_b"].astype(jnp.float32), 2)[None, :], # (1, 128)
        "w1": w1_hwc.astype(jnp.bfloat16),
        "b1": p["fc1_b"].astype(jnp.float32)[None, :],
        "w2": w2p,
        "b2": b2p,
    }


# ------------------------------- Model glue ---------------------------------


def init_params(key):
    """Deterministic synthetic init (PyTorch-style uniform(-1/sqrt(fan_in)))."""
    k = jax.random.split(key, 8)

    def u(kk, shape, fan_in):
        bound = 1.0 / float(fan_in) ** 0.5
        return jax.random.uniform(kk, shape, jnp.float32, -bound, bound)

    return {
        "conv1_w": u(k[0], (3, 3, 1, 32), 9 * 1),        # HWIO
        "conv1_b": u(k[1], (32,), 9 * 1),
        "conv2_w": u(k[2], (3, 3, 32, 64), 9 * 32),      # HWIO
        "conv2_b": u(k[3], (64,), 9 * 32),
        "fc1_w": u(k[4], (64 * 7 * 7, 128), 64 * 7 * 7), # rows in (C,H,W) order
        "fc1_b": u(k[5], (128,), 64 * 7 * 7),
        "fc2_w": u(k[6], (128, 10), 128),
        "fc2_b": u(k[7], (10,), 128),
    }


def simple_cnn_forward(prep, x_nchw):
    B, C, H, W = x_nchw.shape
    assert C == 1
    x = x_nchw.reshape(B, H, W, 1).astype(jnp.bfloat16)        # C==1: free NHWC
    x = conv3x3_relu_pool(x, prep["c1w"], prep["c1b"], G=4, Cout=32)   # (B,14,14,32)
    x = conv3x3_relu_pool(x, prep["c2w"], prep["c2b"], G=2, Cout=64)   # (B, 7, 7,64)
    x = x.reshape(B, -1)                    # (H,W,C) flatten; fc1_w is pre-permuted
    out = fc_head(x, prep["w1"], prep["b1"], prep["w2"], prep["b2"])
    return out[:B, :10]


def _reference_forward(params, x_nchw):
    """Pure-JAX f32 reference (correctness checking only)."""
    x = jnp.transpose(x_nchw, (0, 2, 3, 1))

    def conv_block(x, w, b):
        y = jax.lax.conv_general_dilated(
            x, w, (1, 1), "SAME", dimension_numbers=("NHWC", "HWIO", "NHWC"))
        y = jax.nn.relu(y + b)
        return jax.lax.reduce_window(
            y, -jnp.inf, jax.lax.max, (1, 2, 2, 1), (1, 2, 2, 1), "VALID")

    x = conv_block(x, params["conv1_w"], params["conv1_b"])
    x = conv_block(x, params["conv2_w"], params["conv2_b"])
    x = jnp.transpose(x, (0, 3, 1, 2)).reshape(x.shape[0], -1)   # PyTorch flatten
    x = jax.nn.relu(x @ params["fc1_w"] + params["fc1_b"])
    x = x @ params["fc2_w"] + params["fc2_b"]
    return jax.nn.log_softmax(x, axis=-1)


if __name__ == "__main__":
    x = jax.random.normal(jax.random.PRNGKey(0), (2, 1, 28, 28), jnp.float32)
    params = init_params(jax.random.PRNGKey(1))
    prep = prepare_params(params)                 # one-time weight prep

    out = jax.jit(simple_cnn_forward)(prep, x)
    jax.block_until_ready(out)

    assert out.shape == (2, 10)
    assert bool(jnp.all(jnp.isfinite(out)))
    # log_softmax rows must (approximately) exp-sum to 1
    assert bool(jnp.allclose(jnp.sum(jnp.exp(out), axis=1), 1.0, atol=1e-4))
    # bf16-matmul kernels vs f32 pure-JAX reference (loose tolerance)
    ref = _reference_forward(params, x)
    max_err = float(jnp.max(jnp.abs(out - ref)))
    assert max_err < 0.1, f"mismatch vs reference: {max_err}"
    print("KERNEL_OK")
</pallas_src>

<mosaic_0001>
module attributes {stable_mosaic.version = 11 : i64} {
  func.func @_conv_relu_pool_kernel(%arg0: i32, %arg1: memref<64x64xbf16, #tpu.memory_space<vmem>>, %arg2: memref<64x512xbf16, #tpu.memory_space<vmem>>, %arg3: memref<1x128xf32, #tpu.memory_space<vmem>>, %arg4: memref<64x128xbf16, #tpu.memory_space<vmem>>) attributes {dimension_semantics = [#tpu.dimension_semantics<parallel>], iteration_bounds = array<i64: 2>, scalar_prefetch = 0 : i64, scratch_operands = 0 : i64, tpu.core_type = #tpu.core_type<tc>, window_params = [{transform_indices = @transform_0, window_bounds = array<i64: 64, 64>}, {pipeline_mode = #tpu.pipeline_mode<synchronous>, transform_indices = @transform_1, window_bounds = array<i64: 64, 512>}, {pipeline_mode = #tpu.pipeline_mode<synchronous>, transform_indices = @transform_2, window_bounds = array<i64: 1, 128>}, {transform_indices = @transform_3, window_bounds = array<i64: 64, 128>}]} {
    %c0 = arith.constant 0 : index
    %c0_0 = arith.constant 0 : index
    %0 = vector.load %arg1[%c0, %c0_0] : memref<64x64xbf16, #tpu.memory_space<vmem>>, vector<64x64xbf16>
    %c0_1 = arith.constant 0 : index
    %c0_2 = arith.constant 0 : index
    %1 = vector.load %arg2[%c0_1, %c0_2] : memref<64x512xbf16, #tpu.memory_space<vmem>>, vector<64x512xbf16>
    %cst = arith.constant dense<0.000000e+00> : vector<64x512xf32>
    %2 = tpu.matmul %0, %1, %cst {dimension_numbers = #tpu.dot_dimension_numbers<[1], [0], [0], [1], [0, 0, 1, 1], [], []>} : vector<64x64xbf16>, vector<64x512xbf16>, vector<64x512xf32> -> vector<64x512xf32>
    %3 = vector.extract_strided_slice %2 {offsets = [0, 0], sizes = [64, 128], strides = [1, 1]} : vector<64x512xf32> to vector<64x128xf32>
    %4 = vector.extract_strided_slice %2 {offsets = [0, 128], sizes = [64, 128], strides = [1, 1]} : vector<64x512xf32> to vector<64x128xf32>
    %5 = arith.maximumf %3, %4 : vector<64x128xf32>
    %6 = vector.extract_strided_slice %2 {offsets = [0, 256], sizes = [64, 128], strides = [1, 1]} : vector<64x512xf32> to vector<64x128xf32>
    %7 = vector.extract_strided_slice %2 {offsets = [0, 384], sizes = [64, 128], strides = [1, 1]} : vector<64x512xf32> to vector<64x128xf32>
    %8 = arith.maximumf %6, %7 : vector<64x128xf32>
    %9 = arith.maximumf %5, %8 : vector<64x128xf32>
    %c0_3 = arith.constant 0 : index
    %c0_4 = arith.constant 0 : index
    %10 = vector.load %arg3[%c0_3, %c0_4] : memref<1x128xf32, #tpu.memory_space<vmem>>, vector<1x128xf32>
    %11 = vector.broadcast %10 : vector<1x128xf32> to vector<64x128xf32>
    %12 = arith.addf %9, %11 : vector<64x128xf32>
    %cst_5 = arith.constant 0.000000e+00 : f32
    %13 = vector.broadcast %cst_5 : f32 to vector<64x128xf32>
    %14 = arith.maximumf %12, %13 : vector<64x128xf32>
    %15 = arith.truncf %14 : vector<64x128xf32> to vector<64x128xbf16>
    %c0_6 = arith.constant 0 : index
    %c0_7 = arith.constant 0 : index
    %16 = vector.load %arg4[%c0_6, %c0_7] : memref<64x128xbf16, #tpu.memory_space<vmem>>, vector<64x128xbf16>
    tpu.vector_store %arg4[%c0_6, %c0_7], %15 {strides = array<i32>} : memref<64x128xbf16, #tpu.memory_space<vmem>>, vector<64x128xbf16>,
    return
  }
  func.func @transform_0(%arg0: i32) -> (i32, i32) {
    %c0_i32 = arith.constant 0 : i32
    %c0_i32_0 = arith.constant 0 : i32
    return %arg0, %c0_i32 : i32, i32
  }
  func.func @transform_1(%arg0: i32) -> (i32, i32) {
    %c0_i32 = arith.constant 0 : i32
    %c0_i32_0 = arith.constant 0 : i32
    %c0_i32_1 = arith.constant 0 : i32
    return %c0_i32, %c0_i32_0 : i32, i32
  }
  func.func @transform_2(%arg0: i32) -> (i32, i32) {
    %c0_i32 = arith.constant 0 : i32
    %c0_i32_0 = arith.constant 0 : i32
    %c0_i32_1 = arith.constant 0 : i32
    return %c0_i32, %c0_i32_0 : i32, i32
  }
  func.func @transform_3(%arg0: i32) -> (i32, i32) {
    %c0_i32 = arith.constant 0 : i32
    %c0_i32_0 = arith.constant 0 : i32
    return %arg0, %c0_i32 : i32, i32
  }
}

module attributes {stable_mosaic.version = 11 : i64} {
  func.func @_conv_relu_pool_kernel(%arg0: i32, %arg1: memref<32x1024xbf16, #tpu.memory_space<vmem>>, %arg2: memref<1024x512xbf16, #tpu.memory_space<vmem>>, %arg3: memref<1x128xf32, #tpu.memory_space<vmem>>, %arg4: memref<32x128xbf16, #tpu.memory_space<vmem>>) attributes {dimension_semantics = [#tpu.dimension_semantics<parallel>], iteration_bounds = array<i64: 2>, scalar_prefetch = 0 : i64, scratch_operands = 0 : i64, tpu.core_type = #tpu.core_type<tc>, window_params = [{transform_indices = @transform_0, window_bounds = array<i64: 32, 1024>}, {pipeline_mode = #tpu.pipeline_mode<synchronous>, transform_indices = @transform_1, window_bounds = array<i64: 1024, 512>}, {pipeline_mode = #tpu.pipeline_mode<synchronous>, transform_indices = @transform_2, window_bounds = array<i64: 1, 128>}, {transform_indices = @transform_3, window_bounds = array<i64: 32, 128>}]} {
    %c0 = arith.constant 0 : index
    %c0_0 = arith.constant 0 : index
    %0 = vector.load %arg1[%c0, %c0_0] : memref<32x1024xbf16, #tpu.memory_space<vmem>>, vector<32x1024xbf16>
    %c0_1 = arith.constant 0 : index
    %c0_2 = arith.constant 0 : index
    %1 = vector.load %arg2[%c0_1, %c0_2] : memref<1024x512xbf16, #tpu.memory_space<vmem>>, vector<1024x512xbf16>
    %cst = arith.constant dense<0.000000e+00> : vector<32x512xf32>
    %2 = tpu.matmul %0, %1, %cst {dimension_numbers = #tpu.dot_dimension_numbers<[1], [0], [0], [1], [0, 0, 1, 1], [], []>} : vector<32x1024xbf16>, vector<1024x512xbf16>, vector<32x512xf32> -> vector<32x512xf32>
    %3 = vector.extract_strided_slice %2 {offsets = [0, 0], sizes = [32, 128], strides = [1, 1]} : vector<32x512xf32> to vector<32x128xf32>
    %4 = vector.extract_strided_slice %2 {offsets = [0, 128], sizes = [32, 128], strides = [1, 1]} : vector<32x512xf32> to vector<32x128xf32>
    %5 = arith.maximumf %3, %4 : vector<32x128xf32>
    %6 = vector.extract_strided_slice %2 {offsets = [0, 256], sizes = [32, 128], strides = [1, 1]} : vector<32x512xf32> to vector<32x128xf32>
    %7 = vector.extract_strided_slice %2 {offsets = [0, 384], sizes = [32, 128], strides = [1, 1]} : vector<32x512xf32> to vector<32x128xf32>
    %8 = arith.maximumf %6, %7 : vector<32x128xf32>
    %9 = arith.maximumf %5, %8 : vector<32x128xf32>
    %c0_3 = arith.constant 0 : index
    %c0_4 = arith.constant 0 : index
    %10 = vector.load %arg3[%c0_3, %c0_4] : memref<1x128xf32, #tpu.memory_space<vmem>>, vector<1x128xf32>
    %11 = vector.broadcast %10 : vector<1x128xf32> to vector<32x128xf32>
    %12 = arith.addf %9, %11 : vector<32x128xf32>
    %cst_5 = arith.constant 0.000000e+00 : f32
    %13 = vector.broadcast %cst_5 : f32 to vector<32x128xf32>
    %14 = arith.maximumf %12, %13 : vector<32x128xf32>
    %15 = arith.truncf %14 : vector<32x128xf32> to vector<32x128xbf16>
    %c0_6 = arith.constant 0 : index
    %c0_7 = arith.constant 0 : index
    %16 = vector.load %arg4[%c0_6, %c0_7] : memref<32x128xbf16, #tpu.memory_space<vmem>>, vector<32x128xbf16>
    tpu.vector_store %arg4[%c0_6, %c0_7], %15 {strides = array<i32>} : memref<32x128xbf16, #tpu.memory_space<vmem>>, vector<32x128xbf16>,
    return
  }
  func.func @transform_0(%arg0: i32) -> (i32, i32) {
    %c0_i32 = arith.constant 0 : i32
    %c0_i32_0 = arith.constant 0 : i32
    return %arg0, %c0_i32 : i32, i32
  }
  func.func @transform_1(%arg0: i32) -> (i32, i32) {
    %c0_i32 = arith.constant 0 : i32
    %c0_i32_0 = arith.constant 0 : i32
    %c0_i32_1 = arith.constant 0 : i32
    return %c0_i32, %c0_i32_0 : i32, i32
  }
  func.func @transform_2(%arg0: i32) -> (i32, i32) {
    %c0_i32 = arith.constant 0 : i32
    %c0_i32_0 = arith.constant 0 : i32
    %c0_i32_1 = arith.constant 0 : i32
    return %c0_i32, %c0_i32_0 : i32, i32
  }
  func.func @transform_3(%arg0: i32) -> (i32, i32) {
    %c0_i32 = arith.constant 0 : i32
    %c0_i32_0 = arith.constant 0 : i32
    return %arg0, %c0_i32 : i32, i32
  }
}

module attributes {stable_mosaic.version = 11 : i64} {
  func.func @_fc_head_kernel(%arg0: i32, %arg1: memref<16x3136xbf16, #tpu.memory_space<vmem>>, %arg2: memref<3136x128xbf16, #tpu.memory_space<vmem>>, %arg3: memref<1x128xf32, #tpu.memory_space<vmem>>, %arg4: memref<128x128xbf16, #tpu.memory_space<vmem>>, %arg5: memref<1x128xf32, #tpu.memory_space<vmem>>, %arg6: memref<16x128xf32, #tpu.memory_space<vmem>>) attributes {dimension_semantics = [#tpu.dimension_semantics<parallel>], iteration_bounds = array<i64: 1>, scalar_prefetch = 0 : i64, scratch_operands = 0 : i64, tpu.core_type = #tpu.core_type<tc>, window_params = [{transform_indices = @transform_0, window_bounds = array<i64: 16, 3136>}, {pipeline_mode = #tpu.pipeline_mode<synchronous>, transform_indices = @transform_1, window_bounds = array<i64: 3136, 128>}, {pipeline_mode = #tpu.pipeline_mode<synchronous>, transform_indices = @transform_2, window_bounds = array<i64: 1, 128>}, {pipeline_mode = #tpu.pipeline_mode<synchronous>, transform_indices = @transform_3, window_bounds = array<i64: 128, 128>}, {pipeline_mode = #tpu.pipeline_mode<synchronous>, transform_indices = @transform_4, window_bounds = array<i64: 1, 128>}, {transform_indices = @transform_5, window_bounds = array<i64: 16, 128>}]} {
    %c0 = arith.constant 0 : index
    %c0_0 = arith.constant 0 : index
    %0 = vector.load %arg1[%c0, %c0_0] : memref<16x3136xbf16, #tpu.memory_space<vmem>>, vector<16x3136xbf16>
    %c0_1 = arith.constant 0 : index
    %c0_2 = arith.constant 0 : index
    %1 = vector.load %arg2[%c0_1, %c0_2] : memref<3136x128xbf16, #tpu.memory_space<vmem>>, vector<3136x128xbf16>
    %cst = arith.constant dense<0.000000e+00> : vector<16x128xf32>
    %2 = tpu.matmul %0, %1, %cst {dimension_numbers = #tpu.dot_dimension_numbers<[1], [0], [0], [1], [0, 0, 1, 1], [], []>} : vector<16x3136xbf16>, vector<3136x128xbf16>, vector<16x128xf32> -> vector<16x128xf32>
    %c0_3 = arith.constant 0 : index
    %c0_4 = arith.constant 0 : index
    %3 = vector.load %arg3[%c0_3, %c0_4] : memref<1x128xf32, #tpu.memory_space<vmem>>, vector<1x128xf32>
    %4 = vector.broadcast %3 : vector<1x128xf32> to vector<16x128xf32>
    %5 = arith.addf %2, %4 : vector<16x128xf32>
    %cst_5 = arith.constant 0.000000e+00 : f32
    %6 = vector.broadcast %cst_5 : f32 to vector<16x128xf32>
    %7 = arith.maximumf %5, %6 : vector<16x128xf32>
    %8 = arith.truncf %7 : vector<16x128xf32> to vector<16x128xbf16>
    %c0_6 = arith.constant 0 : index
    %c0_7 = arith.constant 0 : index
    %9 = vector.load %arg4[%c0_6, %c0_7] : memref<128x128xbf16, #tpu.memory_space<vmem>>, vector<128x128xbf16>
    %cst_8 = arith.constant dense<0.000000e+00> : vector<16x128xf32>
    %10 = tpu.matmul %8, %9, %cst_8 {dimension_numbers = #tpu.dot_dimension_numbers<[1], [0], [0], [1], [0, 0, 1, 1], [], []>} : vector<16x128xbf16>, vector<128x128xbf16>, vector<16x128xf32> -> vector<16x128xf32>
    %c0_9 = arith.constant 0 : index
    %c0_10 = arith.constant 0 : index
    %11 = vector.load %arg5[%c0_9, %c0_10] : memref<1x128xf32, #tpu.memory_space<vmem>>, vector<1x128xf32>
    %12 = vector.broadcast %11 : vector<1x128xf32> to vector<16x128xf32>
    %13 = arith.addf %10, %12 : vector<16x128xf32>
    %cst_11 = arith.constant dense<0xFF800000> : vector<16xf32>
    %14 = vector.multi_reduction <maximumf>, %13, %cst_11 [1] : vector<16x128xf32> to vector<16xf32>
    %15 = vector.shape_cast %14 : vector<16xf32> to vector<16x1xf32>
    %16 = vector.broadcast %15 : vector<16x1xf32> to vector<16x128xf32>
    %17 = arith.subf %13, %16 : vector<16x128xf32>
    %18 = math.exp %17 : vector<16x128xf32>
    %cst_12 = arith.constant dense<0.000000e+00> : vector<16xf32>
    %19 = vector.multi_reduction <add>, %18, %cst_12 [1] : vector<16x128xf32> to vector<16xf32>
    %20 = vector.shape_cast %19 : vector<16xf32> to vector<16x1xf32>
    %21 = math.log %20 : vector<16x1xf32>
    %22 = vector.broadcast %21 : vector<16x1xf32> to vector<16x128xf32>
    %23 = arith.subf %17, %22 : vector<16x128xf32>
    %c0_13 = arith.constant 0 : index
    %c0_14 = arith.constant 0 : index
    %24 = vector.load %arg6[%c0_13, %c0_14] : memref<16x128xf32, #tpu.memory_space<vmem>>, vector<16x128xf32>
    tpu.vector_store %arg6[%c0_13, %c0_14], %23 {strides = array<i32>} : memref<16x128xf32, #tpu.memory_space<vmem>>, vector<16x128xf32>,
    return
  }
  func.func @transform_0(%arg0: i32) -> (i32, i32) {
    %c0_i32 = arith.constant 0 : i32
    %c0_i32_0 = arith.constant 0 : i32
    return %arg0, %c0_i32 : i32, i32
  }
  func.func @transform_1(%arg0: i32) -> (i32, i32) {
    %c0_i32 = arith.constant 0 : i32
    %c0_i32_0 = arith.constant 0 : i32
    %c0_i32_1 = arith.constant 0 : i32
    return %c0_i32, %c0_i32_0 : i32, i32
  }
  func.func @transform_2(%arg0: i32) -> (i32, i32) {
    %c0_i32 = arith.constant 0 : i32
    %c0_i32_0 = arith.constant 0 : i32
    %c0_i32_1 = arith.constant 0 : i32
    return %c0_i32, %c0_i32_0 : i32, i32
  }
  func.func @transform_3(%arg0: i32) -> (i32, i32) {
    %c0_i32 = arith.constant 0 : i32
    %c0_i32_0 = arith.constant 0 : i32
    %c0_i32_1 = arith.constant 0 : i32
    return %c0_i32, %c0_i32_0 : i32, i32
  }
  func.func @transform_4(%arg0: i32) -> (i32, i32) {
    %c0_i32 = arith.constant 0 : i32
    %c0_i32_0 = arith.constant 0 : i32
    %c0_i32_1 = arith.constant 0 : i32
    return %c0_i32, %c0_i32_0 : i32, i32
  }
  func.func @transform_5(%arg0: i32) -> (i32, i32) {
    %c0_i32 = arith.constant 0 : i32
    %c0_i32_0 = arith.constant 0 : i32
    return %arg0, %c0_i32 : i32, i32
  }
}

</mosaic_0001>

<bundles_post_ra>
// kernel: simple_cnn_forward.3
= control target key start
LH: loop header
LB: loop body
LE: loop exit
PB: predicated region body
PF: predicated region fallthrough
CT: control target
= control target key end

     0   :  { %s731_s12 = smov 0   ;;  %s888_s0 = inlined_call_operand.vmem [shape: bf16[128,64], index: 0, kind: input, shape index: {}]   ;;  %s889_s1 = inlined_call_operand.vmem [shape: bf16[64,512], index: 1, kind: input, shape index: {}]   ;;  %s890_s2 = inlined_call_operand.vmem [shape: f32[1,128], index: 2, kind: input, shape index: {}]   ;;  %s891_s3 = inlined_call_operand.vmem [shape: bf16[128,128], index: 3, kind: output, shape index: {}]  }
   0x1 LB: > { %s544_s13 = sadd.s32 4294967295, %s709_s12   ;;  %p548_p0 = scmp.ge.s32.totalorder %s709_s12, 1  ;;  %s709_s12 = sphi %s731_s12, %s13_s12  }
   0x2   : > { %p138_p1 = scmp.lt.s32.totalorder %s709_s12, 3 }
   0x4   : > { %p139_p2 = pnand %p548_p0, %p138_p1 }
   0x5   : > { %s549_s28 = sshll.u32 (!%p139_p2), %s544_s13, 3 }
   0x6   : > { %142 = sbr.rel (%p139_p2) target bundleno = 230 (0xe6), region = 32  ;;  %p163_p3 = scmp.lt.s32.totalorder (!%p139_p2), %s549_s28, 15 }
   0xb   : > { %v619_v0 = vld [vmem:[%s889_s1 + $0x60] sm:$0xf]  ;;  %v669_v1 = vld [vmem:[%s889_s1 + $0x6c] sm:$0xf0]  ;;  %v667_v2 = vld [vmem:[%s889_s1 + $0x64] sm:$0xf] }
   0xc   : > { %v620_v3 = vor.u32 %v669_v1, %v619_v0  ;;  %v621_v4 = vld [vmem:[%s889_s1 + $0x70] sm:$0xf0]  ;;  %v627_v5 = vld [vmem:[%s889_s1 + $0x68] sm:$0xf]  ;;  %v670_v6 = vld [vmem:[%s889_s1 + $0x74] sm:$0xf0] }
   0xd   : > { %v624_v7 = vor.u32 %v667_v2, %v621_v4  ;;  %v628_v8 = vor.u32 %v670_v6, %v627_v5  ;;  %v668_v9 = vld [vmem:[%s889_s1 + $0x6c] sm:$0xf]  ;;  %v629_v10 = vld [vmem:[%s889_s1 + $0x78] sm:$0xf0]  ;;  %v603_v11 = vld [vmem:[%s889_s1 + $0x40] sm:$0xf] }
   0xe   : > { %316 = vmatpush.bf16.msra.mxu0 %v620_v3  ;;  %v632_v12 = vor.u32 %v668_v9, %v629_v10  ;;  %v665_v13 = vld [vmem:[%s889_s1 + $0x4c] sm:$0xf0]  ;;  %v663_v14 = vld [vmem:[%s889_s1 + $0x44] sm:$0xf]  ;;  %v605_v15 = vld [vmem:[%s889_s1 + $0x50] sm:$0xf0] }
   0xf   : > { %345 = vmatpush.bf16.msra.mxu1 %v624_v7  ;;  %374 = vmatpush.bf16.msra.mxu2 %v628_v8  ;;  %v604_v16 = vor.u32 %v665_v13, %v603_v11  ;;  %v608_v17 = vor.u32 %v663_v14, %v605_v15  ;;  %v611_v18 = vld [vmem:[%s889_s1 + $0x48] sm:$0xf]  ;;  %v666_v19 = vld [vmem:[%s889_s1 + $0x54] sm:$0xf0]  ;;  %v664_v20 = vld [vmem:[%s889_s1 + $0x4c] sm:$0xf] }
  0x10   : > { %403 = vmatpush.bf16.msra.mxu3 %v632_v12  ;;  %v612_v21 = vor.u32 %v666_v19, %v611_v18  ;;  %v613_v22 = vld [vmem:[%s889_s1 + $0x58] sm:$0xf0]  ;;  %v587_v23 = vld [vmem:[%s889_s1 + $0x20] sm:$0xf]  ;;  %v661_v24 = vld [vmem:[%s889_s1 + $0x2c] sm:$0xf0] }
  0x11   : > { %v616_v25 = vor.u32 %v664_v20, %v613_v22  ;;  %v659_v26 = vld [vmem:[%s889_s1 + $0x24] sm:$0xf]  ;;  %v589_v27 = vld [vmem:[%s889_s1 + $0x30] sm:$0xf0]  ;;  %v595_v28 = vld [vmem:[%s889_s1 + $0x28] sm:$0xf]  ;;  %v588_v29 = vor.u32 %v661_v24, %v587_v23 }
  0x12   : > { %317 = vmatpush.bf16.msra.mxu0 %v604_v16  ;;  %v662_v30 = vld [vmem:[%s889_s1 + $0x34] sm:$0xf0]  ;;  %v660_v31 = vld [vmem:[%s889_s1 + $0x2c] sm:$0xf]  ;;  %v597_v32 = vld [vmem:[%s889_s1 + $0x38] sm:$0xf0]  ;;  %v592_v33 = vor.u32 %v659_v26, %v589_v27 }
  0x13   : > { %346 = vmatpush.bf16.msra.mxu1 %v608_v17  ;;  %375 = vmatpush.bf16.msra.mxu2 %v612_v21  ;;  %v596_v34 = vor.u32 %v662_v30, %v595_v28  ;;  %v571_v35 = vld [vmem:[%s889_s1] sm:$0xf]  ;;  %v657_v36 = vld [vmem:[%s889_s1 + $0xc] sm:$0xf0]  ;;  %v655_v37 = vld [vmem:[%s889_s1 + $0x4] sm:$0xf]  ;;  %v600_v38 = vor.u32 %v660_v31, %v597_v32 }
  0x14   : > { %404 = vmatpush.bf16.msra.mxu3 %v616_v25  ;;  %v573_v39 = vld [vmem:[%s889_s1 + $0x10] sm:$0xf0]  ;;  %v579_v40 = vld [vmem:[%s889_s1 + $0x8] sm:$0xf]  ;;  %v658_v41 = vld [vmem:[%s889_s1 + $0x14] sm:$0xf0]  ;;  %v572_v44 = vor.u32 %v657_v36, %v571_v35 }
  0x15   : > { %v656_v42 = vld [vmem:[%s889_s1 + $0xc] sm:$0xf]  ;;  %v581_v43 = vld [vmem:[%s889_s1 + $0x18] sm:$0xf0]  ;;  %v576_v45 = vor.u32 %v655_v37, %v573_v39  ;;  %v580_v46 = vor.u32 %v658_v41, %v579_v40  ;;  %s893_s28 = smov (!%p163_p3, %s549_s28), 15  ;;  %vm299_vm0 = vcmask 523264  }
  0x16   : > { %318 = vmatpush.bf16.msra.mxu0 %v588_v29  ;;  %v584_v47 = vor.u32 %v656_v42, %v581_v43  ;;  %s550_s29 = sshll.u32 %s893_s28, 2  ;;  %v864_v61 = vld [vmem:[%s890_s2] ss:$0 sm:$0xff] }
  0x17   : > { %347 = vmatpush.bf16.msra.mxu1 %v592_v33  ;;  %376 = vmatpush.bf16.msra.mxu2 %v596_v34  ;;  %s166_s4 = scalar_lea.vmem %s888_s0, %s550_s29  ;;  %s873_s9 = scalar_lea.vmem %s891_s3, %s550_s29 }
  0x18   : > { %405 = vmatpush.bf16.msra.mxu3 %v600_v38  ;;  %v651_v48 = vld [vmem:[%s166_s4] sm:$0xff]  ;;  %v652_v49 = vld [vmem:[%s166_s4 + $0x8] sm:$0xff]  ;;  %v653_v50 = vld [vmem:[%s166_s4 + $0x10] sm:$0xff] }
  0x19   : > { %v654_v51 = vld [vmem:[%s166_s4 + $0x18] sm:$0xff] }
  0x1a   : > { %319 = vmatpush.bf16.msra.mxu0 %v572_v44 }
  0x1b   : > { %348 = vmatpush.bf16.msra.mxu1 %v576_v45  ;;  %377 = vmatpush.bf16.msra.mxu2 %v580_v46 }
  0x1c   : > { %406 = vmatpush.bf16.msra.mxu3 %v584_v47 }
  0x1d   : > { %633 = vmatmul.msk.bf16.vlgmr.msra.gmra.mxu0 %vm299_vm0, %v651_v48 }
  0x1e   : > { %637 = vmatmul.msk.bf16.vlgmr.msra.gmra.mxu1 %vm299_vm0, %v651_v48  ;;  %641 = vmatmul.msk.bf16.vlgmr.msra.gmra.mxu2 %vm299_vm0, %v651_v48 }
  0x1f   : > { %645 = vmatmul.msk.bf16.vlgmr.msra.gmra.mxu3 %vm299_vm0, %v651_v48 }
  0x2d   : > { %634 = vmatmul.msk.bf16.gmra.mxu0 %vm299_vm0, %v652_v49 }
  0x2e   : > { %638 = vmatmul.msk.bf16.gmra.mxu1 %vm299_vm0, %v652_v49  ;;  %642 = vmatmul.msk.bf16.gmra.mxu2 %vm299_vm0, %v652_v49 }
  0x2f   : > { %646 = vmatmul.msk.bf16.gmra.mxu3 %vm299_vm0, %v652_v49 }
  0x3d   : > { %635 = vmatmul.msk.bf16.gmra.mxu0 %vm299_vm0, %v653_v50 }
  0x3e   : > { %639 = vmatmul.msk.bf16.gmra.mxu1 %vm299_vm0, %v653_v50  ;;  %643 = vmatmul.msk.bf16.gmra.mxu2 %vm299_vm0, %v653_v50 }
  0x3f   : > { %647 = vmatmul.msk.bf16.gmra.mxu3 %vm299_vm0, %v653_v50 }
  0x4d   : > { %636 = vmatmul.msk.bf16.gmra.mxu0 %vm299_vm0, %v654_v51 }
  0x4e   : > { %640 = vmatmul.msk.bf16.gmra.mxu1 %vm299_vm0, %v654_v51  ;;  %644 = vmatmul.msk.bf16.gmra.mxu2 %vm299_vm0, %v654_v51 }
  0x4f   : > { %648 = vmatmul.msk.bf16.gmra.mxu3 %vm299_vm0, %v654_v51 }
  0x9a   : > { %v321_v52 = vpop.f32.mrf.mxu0 }
  0x9b   : > { %v350_v53 = vpop.f32.mrf.mxu1 }
  0x9c   : > { %v428_v58 = vmax.f32 %v321_v52, %v350_v53 }
  0xa1   : > { %v379_v54 = vpop.f32.mrf.mxu2 }
  0xa2   : > { %v408_v55 = vpop.f32.mrf.mxu3  ;;  %v323_v56 = vpop.f32.mrf.mxu0 }
  0xa3   : > { %v352_v57 = vpop.f32.mrf.mxu1  ;;  %v436_v59 = vmax.f32 %v379_v54, %v408_v55 }
  0xa4   : > { %v429_v0 = vmax.f32 %v323_v56, %v352_v57 }
  0xa5   : > { %v444_v60 = vmax.f32 %v428_v58, %v436_v59 }
  0xa7   : > { %v456_v4 = vadd.f32 %v864_v61, %v444_v60 }
  0xa9   : > { %v381_v62 = vpop.f32.mrf.mxu2  ;;  %v464_v7 = vmax.f32 %v456_v4, 0.0 }
  0xaa   : > { %v410_v63 = vpop.f32.mrf.mxu3  ;;  %v326_v2 = vpop.f32.mrf.mxu0 }
  0xab   : > { %v437_v1 = vmax.f32 %v381_v62, %v410_v63  ;;  %v355_v3 = vpop.f32.mrf.mxu1 }
  0xac   : > { %v430_v14 = vmax.f32 %v326_v2, %v355_v3 }
  0xad   : > { %v445_v5 = vmax.f32 %v429_v0, %v437_v1 }
  0xaf   : > { %v457_v6 = vadd.f32 %v864_v61, %v445_v5 }
  0xb1   : > { %v465_v8 = vmax.f32 %v457_v6, 0.0  ;;  %v384_v9 = vpop.f32.mrf.mxu2 }
  0xb2   : > { %v413_v10 = vpop.f32.mrf.mxu3  ;;  %v328_v12 = vpop.f32.mrf.mxu0 }
  0xb3   : > { %v674_v11 = vpack.c.bf16 %v465_v8, %v464_v7  ;;  %v357_v13 = vpop.f32.mrf.mxu1  ;;  %v438_v15 = vmax.f32 %v384_v9, %v413_v10 }
  0xb4   : > { %v431_v19 = vmax.f32 %v328_v12, %v357_v13 }
  0xb5   : > { %675 = vst [vmem:[%s873_s9] sm:$0xff] %v674_v11   ;;  %v446_v16 = vmax.f32 %v430_v14, %v438_v15 }
  0xb7   : > { %v458_v23 = vadd.f32 %v864_v61, %v446_v16 }
  0xb9   : > { %v386_v17 = vpop.f32.mrf.mxu2  ;;  %v466_v26 = vmax.f32 %v458_v23, 0.0 }
  0xba   : > { %v415_v18 = vpop.f32.mrf.mxu3  ;;  %v331_v21 = vpop.f32.mrf.mxu0 }
  0xbb   : > { %v439_v20 = vmax.f32 %v386_v17, %v415_v18  ;;  %v360_v22 = vpop.f32.mrf.mxu1 }
  0xbc   : > { %v432_v33 = vmax.f32 %v331_v21, %v360_v22 }
  0xbd   : > { %v447_v24 = vmax.f32 %v431_v19, %v439_v20 }
  0xbf   : > { %v459_v25 = vadd.f32 %v864_v61, %v447_v24 }
  0xc1   : > { %v467_v27 = vmax.f32 %v459_v25, 0.0  ;;  %v389_v28 = vpop.f32.mrf.mxu2 }
  0xc2   : > { %v418_v29 = vpop.f32.mrf.mxu3  ;;  %v333_v31 = vpop.f32.mrf.mxu0 }
  0xc3   : > { %v679_v30 = vpack.c.bf16 %v467_v27, %v466_v26  ;;  %v362_v32 = vpop.f32.mrf.mxu1  ;;  %v440_v34 = vmax.f32 %v389_v28, %v418_v29 }
  0xc4   : > { %v433_v38 = vmax.f32 %v333_v31, %v362_v32 }
  0xc5   : > { %691 = vst [vmem:[%s873_s9 + $0x8] sm:$0xff] %v679_v30   ;;  %v448_v35 = vmax.f32 %v432_v33, %v440_v34 }
  0xc7   : > { %v460_v40 = vadd.f32 %v864_v61, %v448_v35 }
  0xc9   : > { %v391_v36 = vpop.f32.mrf.mxu2  ;;  %v468_v45 = vmax.f32 %v460_v40, 0.0 }
  0xca   : > { %v420_v37 = vpop.f32.mrf.mxu3  ;;  %v336_v42 = vpop.f32.mrf.mxu0 }
  0xcb   : > { %v441_v39 = vmax.f32 %v391_v36, %v420_v37  ;;  %v365_v43 = vpop.f32.mrf.mxu1 }
  0xcc   : > { %v434_v50 = vmax.f32 %v336_v42, %v365_v43 }
  0xcd   : > { %v449_v41 = vmax.f32 %v433_v38, %v441_v39 }
  0xcf   : > { %v461_v44 = vadd.f32 %v864_v61, %v449_v41 }
  0xd1   : > { %v469_v46 = vmax.f32 %v461_v44, 0.0  ;;  %v394_v47 = vpop.f32.mrf.mxu2 }
  0xd2   : > { %v423_v48 = vpop.f32.mrf.mxu3  ;;  %v338_v52 = vpop.f32.mrf.mxu0 }
  0xd3   : > { %v684_v49 = vpack.c.bf16 %v469_v46, %v468_v45  ;;  %v442_v51 = vmax.f32 %v394_v47, %v423_v48  ;;  %v367_v53 = vpop.f32.mrf.mxu1 }
  0xd4   : > { %v435_v57 = vmax.f32 %v338_v52, %v367_v53 }
  0xd5   : > { %692 = vst [vmem:[%s873_s9 + $0x10] sm:$0xff] %v684_v49   ;;  %v450_v54 = vmax.f32 %v434_v50, %v442_v51 }
  0xd7   : > { %v462_v59 = vadd.f32 %v864_v61, %v450_v54 }
  0xd9   : > { %v396_v55 = vpop.f32.mrf.mxu2  ;;  %v470_v63 = vmax.f32 %v462_v59, 0.0 }
  0xda   : > { %v425_v56 = vpop.f32.mrf.mxu3 }
  0xdb   : > { %v443_v58 = vmax.f32 %v396_v55, %v425_v56 }
  0xdd   : > { %v451_v60 = vmax.f32 %v435_v57, %v443_v58 }
  0xdf   : > { %v463_v62 = vadd.f32 %v864_v61, %v451_v60 }
  0xe1   : > { %v471_v0 = vmax.f32 %v463_v62, 0.0 }
  0xe3   : > { %v689_v1 = vpack.c.bf16 %v471_v0, %v470_v63 }
  0xe5   : > { %693 = vst [vmem:[%s873_s9 + $0x18] sm:$0xff] %v689_v1  }
  0xe6 PF: > { %s13_s12 = sadd.s32 1, %s709_s12  }
  0xe7   : > { %p10_p4 = scmp.ge.s32.totalorder %s13_s12, 4  }
  0xe9   :  { %12 = sbr.rel (!%p10_p4) target bundleno = 1 (0x1), region = 62 }

// kernel: simple_cnn_forward.4
= control target key start
LH: loop header
LB: loop body
LE: loop exit
PB: predicated region body
PF: predicated region fallthrough
CT: control target
= control target key end

     0   :  { %s3926_s12 = smov 0   ;;  %s5678_s0 = inlined_call_operand.vmem [shape: bf16[64,1024], index: 0, kind: input, shape index: {}]   ;;  %s5679_s1 = inlined_call_operand.vmem [shape: bf16[1024,512], index: 1, kind: input, shape index: {}]   ;;  %s5680_s2 = inlined_call_operand.vmem [shape: f32[1,128], index: 2, kind: input, shape index: {}]   ;;  %s5681_s3 = inlined_call_operand.vmem [shape: bf16[64,128], index: 3, kind: output, shape index: {}]  }
   0x1 LB: > { %s2505_s13 = sadd.s32 4294967295, %s3904_s12   ;;  %p2509_p0 = scmp.ge.s32.totalorder %s3904_s12, 1  ;;  %s3904_s12 = sphi %s3926_s12, %s13_s12  }
   0x2   : > { %p139_p1 = scmp.lt.s32.totalorder %s3904_s12, 3 }
   0x4   : > { %p140_p2 = pnand %p2509_p0, %p139_p1 }
   0x5   : > { %s2510_s22 = sshll.u32 (!%p140_p2), %s2505_s13, 2 }
   0x6   : > { %143 = sbr.rel (%p140_p2) target bundleno = 445 (0x1bd), region = 32  ;;  %p165_p3 = scmp.lt.s32.totalorder (!%p140_p2), %s2510_s22, 7 }
   0xb   : > { %v2693_v0 = vld [vmem:[%s5679_s1 + $0xe0] sm:$0xf]  ;;  %v3652_v1 = vld [vmem:[%s5679_s1 + $0xec] sm:$0xf0]  ;;  %s5683_s22 = smov (!%p165_p3, %s2510_s22), 7 }
   0xc   : > { %v2821_v2 = vld [vmem:[%s5679_s1 + $0x1e0] sm:$0xf]  ;;  %v2694_v3 = vor.u32 %v3652_v1, %v2693_v0  ;;  %v3684_v4 = vld [vmem:[%s5679_s1 + $0x1ec] sm:$0xf0]  ;;  %s3605_s17 = sshll.u32 %s5683_s22, 5  ;;  %s2514_s28 = sshll.u32 %s5683_s22, 2 }
   0xd   : > { %v2949_v5 = vld [vmem:[%s5679_s1 + $0x2e0] sm:$0xf]  ;;  %v3716_v6 = vld [vmem:[%s5679_s1 + $0x2ec] sm:$0xf0]  ;;  %v2822_v7 = vor.u32 %v3684_v4, %v2821_v2  ;;  %s4140_s25 = scalar_lea.vmem %s5678_s0, %s3605_s17  ;;  %s175_s13 = scalar_lea.vmem %s5681_s3, %s2514_s28 }
   0xe   : > { %v2950_v8 = vor.u32 %v3716_v6, %v2949_v5  ;;  %v3077_v9 = vld [vmem:[%s5679_s1 + $0x3e0] sm:$0xf]  ;;  %v3748_v10 = vld [vmem:[%s5679_s1 + $0x3ec] sm:$0xf0]  ;;  %1809 = vmatpush.bf16.msra.mxu0 %v2694_v3 }
   0xf   : > { %v2677_v11 = vld [vmem:[%s5679_s1 + $0xc0] sm:$0xf]  ;;  %v3078_v12 = vor.u32 %v3748_v10, %v3077_v9  ;;  %v3648_v13 = vld [vmem:[%s5679_s1 + $0xcc] sm:$0xf0]  ;;  %1828 = vmatpush.bf16.msra.mxu1 %v2822_v7 }
  0x10   : > { %v2805_v14 = vld [vmem:[%s5679_s1 + $0x1c0] sm:$0xf]  ;;  %v3680_v15 = vld [vmem:[%s5679_s1 + $0x1cc] sm:$0xf0]  ;;  %1847 = vmatpush.bf16.msra.mxu2 %v2950_v8  ;;  %v2678_v16 = vor.u32 %v3648_v13, %v2677_v11 }
  0x11   : > { %v2806_v17 = vor.u32 %v3680_v15, %v2805_v14  ;;  %v2933_v18 = vld [vmem:[%s5679_s1 + $0x2c0] sm:$0xf]  ;;  %v3712_v19 = vld [vmem:[%s5679_s1 + $0x2cc] sm:$0xf0]  ;;  %1866 = vmatpush.bf16.msra.mxu3 %v3078_v12 }
  0x12   : > { %v3061_v20 = vld [vmem:[%s5679_s1 + $0x3c0] sm:$0xf]  ;;  %v2934_v21 = vor.u32 %v3712_v19, %v2933_v18  ;;  %v3744_v22 = vld [vmem:[%s5679_s1 + $0x3cc] sm:$0xf0]  ;;  %1810 = vmatpush.bf16.msra.mxu0 %v2678_v16 }
  0x13   : > { %v2661_v23 = vld [vmem:[%s5679_s1 + $0xa0] sm:$0xf]  ;;  %v3644_v24 = vld [vmem:[%s5679_s1 + $0xac] sm:$0xf0]  ;;  %v3062_v25 = vor.u32 %v3744_v22, %v3061_v20  ;;  %1829 = vmatpush.bf16.msra.mxu1 %v2806_v17 }
  0x14   : > { %v2789_v26 = vld [vmem:[%s5679_s1 + $0x1a0] sm:$0xf]  ;;  %v3676_v27 = vld [vmem:[%s5679_s1 + $0x1ac] sm:$0xf0]  ;;  %v2662_v29 = vor.u32 %v3644_v24, %v2661_v23  ;;  %1848 = vmatpush.bf16.msra.mxu2 %v2934_v21 }
  0x15   : > { %v2917_v28 = vld [vmem:[%s5679_s1 + $0x2a0] sm:$0xf]  ;;  %v3708_v30 = vld [vmem:[%s5679_s1 + $0x2ac] sm:$0xf0]  ;;  %v2790_v33 = vor.u32 %v3676_v27, %v2789_v26  ;;  %1867 = vmatpush.bf16.msra.mxu3 %v3062_v25 }
  0x16   : > { %v3045_v31 = vld [vmem:[%s5679_s1 + $0x3a0] sm:$0xf]  ;;  %v3740_v32 = vld [vmem:[%s5679_s1 + $0x3ac] sm:$0xf0]  ;;  %v2918_v34 = vor.u32 %v3708_v30, %v2917_v28  ;;  %1811 = vmatpush.bf16.msra.mxu0 %v2662_v29 }
  0x17   : > { %v2645_v35 = vld [vmem:[%s5679_s1 + $0x80] sm:$0xf]  ;;  %v3640_v36 = vld [vmem:[%s5679_s1 + $0x8c] sm:$0xf0]  ;;  %v3046_v38 = vor.u32 %v3740_v32, %v3045_v31  ;;  %1830 = vmatpush.bf16.msra.mxu1 %v2790_v33 }
  0x18   : > { %v2773_v37 = vld [vmem:[%s5679_s1 + $0x180] sm:$0xf]  ;;  %v3672_v39 = vld [vmem:[%s5679_s1 + $0x18c] sm:$0xf0]  ;;  %v2646_v44 = vor.u32 %v3640_v36, %v2645_v35  ;;  %1849 = vmatpush.bf16.msra.mxu2 %v2918_v34 }
  0x19   : > { %v2901_v40 = vld [vmem:[%s5679_s1 + $0x280] sm:$0xf]  ;;  %v3704_v41 = vld [vmem:[%s5679_s1 + $0x28c] sm:$0xf0]  ;;  %v2774_v45 = vor.u32 %v3672_v39, %v2773_v37  ;;  %1868 = vmatpush.bf16.msra.mxu3 %v3046_v38  ;;  %v3606_v39 = vld [vmem:[%s4140_s25 + $0x4] sm:$0xf] }
  0x1a   : > { %v3029_v42 = vld [vmem:[%s5679_s1 + $0x380] sm:$0xf]  ;;  %v3736_v43 = vld [vmem:[%s5679_s1 + $0x38c] sm:$0xf0]  ;;  %v2902_v46 = vor.u32 %v3704_v41, %v2901_v40  ;;  %1812 = vmatpush.bf16.msra.mxu0 %v2646_v44  ;;  %v2519_v44 = vld [vmem:[%s4140_s25 + $0x20] sm:$0xf0] }
  0x1b   : > { %v2629_v47 = vld [vmem:[%s5679_s1 + $0x60] sm:$0xf]  ;;  %v3636_v48 = vld [vmem:[%s5679_s1 + $0x6c] sm:$0xf0]  ;;  %v3030_v50 = vor.u32 %v3736_v43, %v3029_v42  ;;  %1831 = vmatpush.bf16.msra.mxu1 %v2774_v45  ;;  %v2525_v45 = vld [vmem:[%s4140_s25 + $0x8] sm:$0xf] }
  0x1c   : > { %v2757_v49 = vld [vmem:[%s5679_s1 + $0x160] sm:$0xf]  ;;  %v3668_v51 = vld [vmem:[%s5679_s1 + $0x16c] sm:$0xf0]  ;;  %v2630_v56 = vor.u32 %v3636_v48, %v2629_v47  ;;  %1850 = vmatpush.bf16.msra.mxu2 %v2902_v46  ;;  %v3611_v46 = vld [vmem:[%s4140_s25 + $0x24] sm:$0xf0] }
  0x1d   : > { %v2885_v52 = vld [vmem:[%s5679_s1 + $0x260] sm:$0xf]  ;;  %v3700_v53 = vld [vmem:[%s5679_s1 + $0x26c] sm:$0xf0]  ;;  %v2758_v57 = vor.u32 %v3668_v51, %v2757_v49  ;;  %1869 = vmatpush.bf16.msra.mxu3 %v3030_v50  ;;  %v3607_v49 = vld [vmem:[%s4140_s25 + $0xc] sm:$0xf] }
  0x1e   : > { %v3013_v54 = vld [vmem:[%s5679_s1 + $0x360] sm:$0xf]  ;;  %v3732_v55 = vld [vmem:[%s5679_s1 + $0x36c] sm:$0xf0]  ;;  %v2886_v58 = vor.u32 %v3700_v53, %v2885_v52  ;;  %1813 = vmatpush.bf16.msra.mxu0 %v2630_v56  ;;  %v2527_v50 = vld [vmem:[%s4140_s25 + $0x28] sm:$0xf0]  ;;  %v4176_v53 = vor.u32 %v3606_v39, %v2519_v44 }
  0x1f   : > { %v2613_v59 = vld [vmem:[%s5679_s1 + $0x40] sm:$0xf]  ;;  %v3632_v60 = vld [vmem:[%s5679_s1 + $0x4c] sm:$0xf0]  ;;  %v3014_v62 = vor.u32 %v3732_v55, %v3013_v54  ;;  %1832 = vmatpush.bf16.msra.mxu1 %v2758_v57  ;;  %v4178_v54 = vor.u32 %v3611_v46, %v2525_v45  ;;  %v4186_v57 = vor.u32 %v3607_v49, %v2527_v50 }
  0x20   : > { %v2741_v61 = vld [vmem:[%s5679_s1 + $0x140] sm:$0xf]  ;;  %v3664_v63 = vld [vmem:[%s5679_s1 + $0x14c] sm:$0xf0]  ;;  %v2614_v4 = vor.u32 %v3632_v60, %v2613_v59  ;;  %1851 = vmatpush.bf16.msra.mxu2 %v2886_v58 }
  0x21   : > { %v2869_v0 = vld [vmem:[%s5679_s1 + $0x240] sm:$0xf]  ;;  %v3696_v1 = vld [vmem:[%s5679_s1 + $0x24c] sm:$0xf0]  ;;  %v2742_v6 = vor.u32 %v3664_v63, %v2741_v61  ;;  %1870 = vmatpush.bf16.msra.mxu3 %v3014_v62 }
  0x22   : > { %v2997_v2 = vld [vmem:[%s5679_s1 + $0x340] sm:$0xf]  ;;  %v3728_v3 = vld [vmem:[%s5679_s1 + $0x34c] sm:$0xf0]  ;;  %v2870_v7 = vor.u32 %v3696_v1, %v2869_v0  ;;  %1814 = vmatpush.bf16.msra.mxu0 %v2614_v4 }
  0x23   : > { %v2597_v5 = vld [vmem:[%s5679_s1 + $0x20] sm:$0xf]  ;;  %v3628_v8 = vld [vmem:[%s5679_s1 + $0x2c] sm:$0xf0]  ;;  %v2998_v11 = vor.u32 %v3728_v3, %v2997_v2  ;;  %1833 = vmatpush.bf16.msra.mxu1 %v2742_v6 }
  0x24   : > { %v2725_v9 = vld [vmem:[%s5679_s1 + $0x120] sm:$0xf]  ;;  %v3660_v10 = vld [vmem:[%s5679_s1 + $0x12c] sm:$0xf0]  ;;  %v2598_v16 = vor.u32 %v3628_v8, %v2597_v5  ;;  %1852 = vmatpush.bf16.msra.mxu2 %v2870_v7 }
  0x25   : > { %v2853_v12 = vld [vmem:[%s5679_s1 + $0x220] sm:$0xf]  ;;  %v3692_v13 = vld [vmem:[%s5679_s1 + $0x22c] sm:$0xf0]  ;;  %v2726_v20 = vor.u32 %v3660_v10, %v2725_v9  ;;  %1871 = vmatpush.bf16.msra.mxu3 %v2998_v11 }
  0x26   : > { %v2981_v14 = vld [vmem:[%s5679_s1 + $0x320] sm:$0xf]  ;;  %v3724_v15 = vld [vmem:[%s5679_s1 + $0x32c] sm:$0xf0]  ;;  %v2854_v21 = vor.u32 %v3692_v13, %v2853_v12  ;;  %1815 = vmatpush.bf16.msra.mxu0 %v2598_v16 }
  0x27   : > { %v2581_v17 = vld [vmem:[%s5679_s1] sm:$0xf]  ;;  %v3624_v18 = vld [vmem:[%s5679_s1 + $0xc] sm:$0xf0]  ;;  %v2982_v24 = vor.u32 %v3724_v15, %v2981_v14  ;;  %1834 = vmatpush.bf16.msra.mxu1 %v2726_v20 }
  0x28   : > { %v2709_v19 = vld [vmem:[%s5679_s1 + $0x100] sm:$0xf]  ;;  %v3656_v22 = vld [vmem:[%s5679_s1 + $0x10c] sm:$0xf0]  ;;  %v2582_v30 = vor.u32 %v3624_v18, %v2581_v17  ;;  %1853 = vmatpush.bf16.msra.mxu2 %v2854_v21 }
  0x29   : > { %v2837_v23 = vld [vmem:[%s5679_s1 + $0x200] sm:$0xf]  ;;  %v3688_v25 = vld [vmem:[%s5679_s1 + $0x20c] sm:$0xf0]  ;;  %v2710_v35 = vor.u32 %v3656_v22, %v2709_v19  ;;  %1872 = vmatpush.bf16.msra.mxu3 %v2982_v24 }
  0x2a   : > { %v2965_v26 = vld [vmem:[%s5679_s1 + $0x300] sm:$0xf]  ;;  %v3720_v27 = vld [vmem:[%s5679_s1 + $0x30c] sm:$0xf0]  ;;  %v2838_v36 = vor.u32 %v3688_v25, %v2837_v23  ;;  %1816 = vmatpush.bf16.msra.mxu0 %v2582_v30 }
  0x2b   : > { %v3461_v28 = vld [vmem:[%s5679_s1 + $0x6e0] sm:$0xf]  ;;  %v3844_v29 = vld [vmem:[%s5679_s1 + $0x6ec] sm:$0xf0]  ;;  %v2966_v43 = vor.u32 %v3720_v27, %v2965_v26  ;;  %1835 = vmatpush.bf16.msra.mxu1 %v2710_v35 }
  0x2c   : > { %v3205_v31 = vld [vmem:[%s5679_s1 + $0x4e0] sm:$0xf]  ;;  %v3780_v32 = vld [vmem:[%s5679_s1 + $0x4ec] sm:$0xf0]  ;;  %v3462_v47 = vor.u32 %v3844_v29, %v3461_v28  ;;  %1854 = vmatpush.bf16.msra.mxu2 %v2838_v36  ;;  %v3614_v28 = vld [vmem:[%s4140_s25 + $0x44] sm:$0xf] }
  0x2d   : > { %v3333_v33 = vld [vmem:[%s5679_s1 + $0x5e0] sm:$0xf]  ;;  %v3812_v34 = vld [vmem:[%s5679_s1 + $0x5ec] sm:$0xf0]  ;;  %v3206_v58 = vor.u32 %v3780_v32, %v3205_v31  ;;  %1873 = vmatpush.bf16.msra.mxu3 %v2966_v43  ;;  %v2551_v29 = vld [vmem:[%s4140_s25 + $0x60] sm:$0xf0] }
  0x2e   : > { %v2517_v37 = vld [vmem:[%s4140_s25] sm:$0xf]  ;;  %v3876_v41 = vld [vmem:[%s5679_s1 + $0x7ec] sm:$0xf0]  ;;  %v3334_v51 = vor.u32 %v3812_v34, %v3333_v33  ;;  %1836 = vmatmul.bf16.vlgmr.msra.gmra.mxu1 %v4176_v53  ;;  %v2557_v32 = vld [vmem:[%s4140_s25 + $0x48] sm:$0xf]  ;;  %v4292_v50 = vor.u32 %v3614_v28, %v2551_v29 }
  0x2f   : > { %v3610_v38 = vld [vmem:[%s4140_s25 + $0x1c] sm:$0xf0]  ;;  %v3840_v52 = vld [vmem:[%s5679_s1 + $0x6cc] sm:$0xf0]  ;;  %1855 = vmatmul.bf16.vlgmr.msra.gmra.mxu2 %v4178_v54  ;;  %1885 = vmatpush.bf16.msrb.mxu0 %v3206_v58  ;;  %v3619_v36 = vld [vmem:[%s4140_s25 + $0x64] sm:$0xf0] }
  0x30   : > { %v3589_v40 = vld [vmem:[%s5679_s1 + $0x7e0] sm:$0xf]  ;;  %v4169_v48 = vor.u32 %v3610_v38, %v2517_v37  ;;  %v3808_v56 = vld [vmem:[%s5679_s1 + $0x5cc] sm:$0xf0]  ;;  %1923 = vmatpush.bf16.msrb.mxu2 %v3462_v47  ;;  %1904 = vmatpush.bf16.msrb.mxu1 %v3334_v51  ;;  %v3615_v37 = vld [vmem:[%s4140_s25 + $0x4c] sm:$0xf]  ;;  %v4294_v51 = vor.u32 %v3619_v36, %v2557_v32 }
  0x31   : > { %v3445_v42 = vld [vmem:[%s5679_s1 + $0x6c0] sm:$0xf]  ;;  %v3590_v59 = vor.u32 %v3876_v41, %v3589_v40  ;;  %v3776_v62 = vld [vmem:[%s5679_s1 + $0x4cc] sm:$0xf0]  ;;  %1874 = vmatmul.bf16.vlgmr.msra.gmra.mxu3 %v4186_v57  ;;  %v2559_v38 = vld [vmem:[%s4140_s25 + $0x68] sm:$0xf0] }
  0x32   : > { %v3317_v55 = vld [vmem:[%s5679_s1 + $0x5c0] sm:$0xf]  ;;  %v3446_v60 = vor.u32 %v3840_v52, %v3445_v42  ;;  %1817 = vmatmul.bf16.vlgmr.msra.gmra.mxu0 %v4169_v48  ;;  %v3872_v1 = vld [vmem:[%s5679_s1 + $0x7cc] sm:$0xf0]  ;;  %v3608_v32 = vld [vmem:[%s4140_s25 + $0x14] sm:$0xf] }
  0x33   : > { %v3189_v61 = vld [vmem:[%s5679_s1 + $0x4c0] sm:$0xf]  ;;  %v3318_v0 = vor.u32 %v3808_v56, %v3317_v55  ;;  %v3836_v3 = vld [vmem:[%s5679_s1 + $0x6ac] sm:$0xf0]  ;;  %1942 = vmatpush.bf16.msrb.mxu3 %v3590_v59  ;;  %v4302_v56 = vor.u32 %v3615_v37, %v2559_v38  ;;  %v2695_v36 = vld [vmem:[%s5679_s1 + $0xf0] sm:$0xf0] }
  0x34   : > { %v3573_v63 = vld [vmem:[%s5679_s1 + $0x7c0] sm:$0xf]  ;;  %v3804_v5 = vld [vmem:[%s5679_s1 + $0x5ac] sm:$0xf0]  ;;  %v3190_v6 = vor.u32 %v3776_v62, %v3189_v61  ;;  %1924 = vmatpush.bf16.msrb.mxu2 %v3446_v60  ;;  %v3746_v37 = vld [vmem:[%s5679_s1 + $0x3e4] sm:$0xf] }
  0x35   : > { %v3429_v2 = vld [vmem:[%s5679_s1 + $0x6a0] sm:$0xf]  ;;  %v3574_v7 = vor.u32 %v3872_v1, %v3573_v63  ;;  %v3772_v10 = vld [vmem:[%s5679_s1 + $0x4ac] sm:$0xf0]  ;;  %1905 = vmatpush.bf16.msrb.mxu1 %v3318_v0 }
  0x36   : > { %v3301_v4 = vld [vmem:[%s5679_s1 + $0x5a0] sm:$0xf]  ;;  %v3430_v8 = vor.u32 %v3836_v3, %v3429_v2  ;;  %v3868_v13 = vld [vmem:[%s5679_s1 + $0x7ac] sm:$0xf0]  ;;  %1886 = vmatpush.bf16.msrb.mxu0 %v3190_v6 }
  0x37   : > { %v3173_v9 = vld [vmem:[%s5679_s1 + $0x4a0] sm:$0xf]  ;;  %v3302_v12 = vor.u32 %v3804_v5, %v3301_v4  ;;  %v3832_v15 = vld [vmem:[%s5679_s1 + $0x68c] sm:$0xf0]  ;;  %1943 = vmatpush.bf16.msrb.mxu3 %v3574_v7 }
  0x38   : > { %v3557_v11 = vld [vmem:[%s5679_s1 + $0x7a0] sm:$0xf]  ;;  %v3800_v17 = vld [vmem:[%s5679_s1 + $0x58c] sm:$0xf0]  ;;  %v3174_v18 = vor.u32 %v3772_v10, %v3173_v9  ;;  %1925 = vmatpush.bf16.msrb.mxu2 %v3430_v8 }
  0x39   : > { %v3413_v14 = vld [vmem:[%s5679_s1 + $0x680] sm:$0xf]  ;;  %v3768_v20 = vld [vmem:[%s5679_s1 + $0x48c] sm:$0xf0]  ;;  %v3558_v22 = vor.u32 %v3868_v13, %v3557_v11  ;;  %1906 = vmatpush.bf16.msrb.mxu1 %v3302_v12 }
  0x3a   : > { %v3285_v16 = vld [vmem:[%s5679_s1 + $0x580] sm:$0xf]  ;;  %v3414_v23 = vor.u32 %v3832_v15, %v3413_v14  ;;  %v3864_v24 = vld [vmem:[%s5679_s1 + $0x78c] sm:$0xf0]  ;;  %1887 = vmatpush.bf16.msrb.mxu0 %v3174_v18  ;;  %v3714_v18 = vld [vmem:[%s5679_s1 + $0x2e4] sm:$0xf] }
  0x3b   : > { %v3157_v19 = vld [vmem:[%s5679_s1 + $0x480] sm:$0xf]  ;;  %v3286_v27 = vor.u32 %v3800_v17, %v3285_v16  ;;  %v3828_v31 = vld [vmem:[%s5679_s1 + $0x66c] sm:$0xf0]  ;;  %1944 = vmatpush.bf16.msrb.mxu3 %v3558_v22  ;;  %v3682_v22 = vld [vmem:[%s5679_s1 + $0x1e4] sm:$0xf] }
  0x3c   : > { %v3541_v21 = vld [vmem:[%s5679_s1 + $0x780] sm:$0xf]  ;;  %v3796_v34 = vld [vmem:[%s5679_s1 + $0x56c] sm:$0xf0]  ;;  %v3158_v35 = vor.u32 %v3768_v20, %v3157_v19  ;;  %1926 = vmatpush.bf16.msrb.mxu2 %v3414_v23  ;;  %v2951_v19 = vld [vmem:[%s5679_s1 + $0x2f0] sm:$0xf0] }
  0x3d   : > { %v2549_v25 = vld [vmem:[%s4140_s25 + $0x40] sm:$0xf]  ;;  %v3542_v39 = vor.u32 %v3864_v24, %v3541_v21  ;;  %v3764_v42 = vld [vmem:[%s5679_s1 + $0x46c] sm:$0xf0]  ;;  %1907 = vmatpush.bf16.msrb.mxu1 %v3286_v27  ;;  %v2823_v23 = vld [vmem:[%s5679_s1 + $0x1f0] sm:$0xf0] }
  0x3e   : > { %v3618_v26 = vld [vmem:[%s4140_s25 + $0x5c] sm:$0xf0]  ;;  %v3860_v46 = vld [vmem:[%s5679_s1 + $0x76c] sm:$0xf0]  ;;  %1888 = vmatpush.bf16.msrb.mxu0 %v3158_v35  ;;  %1841 = vmatmul.bf16.gmra.mxu1 %v4292_v50  ;;  %v3650_v35 = vld [vmem:[%s5679_s1 + $0xe4] sm:$0xf]  ;;  %v2826_v38 = vor.u32 %v3682_v22, %v2823_v23 }
  0x3f   : > { %v3397_v30 = vld [vmem:[%s5679_s1 + $0x660] sm:$0xf]  ;;  %v4281_v44 = vor.u32 %v3618_v26, %v2549_v25  ;;  %v3824_v49 = vld [vmem:[%s5679_s1 + $0x64c] sm:$0xf0]  ;;  %1945 = vmatpush.bf16.msrb.mxu3 %v3542_v39  ;;  %1860 = vmatmul.bf16.gmra.mxu2 %v4294_v51  ;;  %v3079_v39 = vld [vmem:[%s5679_s1 + $0x3f0] sm:$0xf0] }
  0x40   : > { %v3269_v33 = vld [vmem:[%s5679_s1 + $0x560] sm:$0xf]  ;;  %v3398_v40 = vor.u32 %v3828_v31, %v3397_v30  ;;  %v3792_v55 = vld [vmem:[%s5679_s1 + $0x54c] sm:$0xf0]  ;;  %v2647_v22 = vld [vmem:[%s5679_s1 + $0x90] sm:$0xf0] }
  0x41   : > { %v3141_v41 = vld [vmem:[%s5679_s1 + $0x460] sm:$0xf]  ;;  %v3270_v45 = vor.u32 %v3796_v34, %v3269_v33  ;;  %v3760_v62 = vld [vmem:[%s5679_s1 + $0x44c] sm:$0xf0]  ;;  %1879 = vmatmul.bf16.gmra.mxu3 %v4302_v56  ;;  %v2535_v33 = vld [vmem:[%s4140_s25 + $0x30] sm:$0xf0]  ;;  %v2954_v34 = vor.u32 %v3714_v18, %v2951_v19 }
  0x42   : > { %v3525_v43 = vld [vmem:[%s5679_s1 + $0x760] sm:$0xf]  ;;  %v3142_v58 = vor.u32 %v3764_v42, %v3141_v41  ;;  %1927 = vmatpush.bf16.msrb.mxu2 %v3398_v40  ;;  %1822 = vmatmul.bf16.gmra.mxu0 %v4281_v44  ;;  %v3856_v1 = vld [vmem:[%s5679_s1 + $0x74c] sm:$0xf0]  ;;  %v3710_v40 = vld [vmem:[%s5679_s1 + $0x2c4] sm:$0xf] }
  0x43   : > { %v3381_v47 = vld [vmem:[%s5679_s1 + $0x640] sm:$0xf]  ;;  %v3526_v59 = vor.u32 %v3860_v46, %v3525_v43  ;;  %1908 = vmatpush.bf16.msrb.mxu1 %v3270_v45  ;;  %v3820_v3 = vld [vmem:[%s5679_s1 + $0x62c] sm:$0xf0]  ;;  %v2935_v41 = vld [vmem:[%s5679_s1 + $0x2d0] sm:$0xf0] }
  0x44   : > { %v3253_v52 = vld [vmem:[%s5679_s1 + $0x540] sm:$0xf]  ;;  %v3382_v60 = vor.u32 %v3824_v49, %v3381_v47  ;;  %v3788_v5 = vld [vmem:[%s5679_s1 + $0x52c] sm:$0xf0]  ;;  %1889 = vmatpush.bf16.msrb.mxu0 %v3142_v58  ;;  %v2541_v43 = vld [vmem:[%s4140_s25 + $0x18] sm:$0xf] }
  0x45   : > { %v3125_v61 = vld [vmem:[%s5679_s1 + $0x440] sm:$0xf]  ;;  %v3254_v0 = vor.u32 %v3792_v55, %v3253_v52  ;;  %1946 = vmatpush.bf16.msrb.mxu3 %v3526_v59  ;;  %v3756_v10 = vld [vmem:[%s5679_s1 + $0x42c] sm:$0xf0]  ;;  %v3613_v45 = vld [vmem:[%s4140_s25 + $0x34] sm:$0xf0]  ;;  %v2698_v52 = vor.u32 %v3650_v35, %v2695_v36  ;;  %v3082_v59 = vor.u32 %v3746_v37, %v3079_v39 }
  0x46   : > { %v3509_v63 = vld [vmem:[%s5679_s1 + $0x740] sm:$0xf]  ;;  %v3126_v6 = vor.u32 %v3760_v62, %v3125_v61  ;;  %1928 = vmatpush.bf16.msrb.mxu2 %v3382_v60  ;;  %v3852_v12 = vld [vmem:[%s5679_s1 + $0x72c] sm:$0xf0]  ;;  %v3609_v46 = vld [vmem:[%s4140_s25 + $0x1c] sm:$0xf]  ;;  %v2938_v60 = vor.u32 %v3710_v40, %v2935_v41 }
  0x47   : > { %v3365_v2 = vld [vmem:[%s5679_s1 + $0x620] sm:$0xf]  ;;  %v3510_v8 = vor.u32 %v3856_v1, %v3509_v63  ;;  %1909 = vmatpush.bf16.msrb.mxu1 %v3254_v0  ;;  %v3816_v15 = vld [vmem:[%s5679_s1 + $0x60c] sm:$0xf0]  ;;  %v2543_v49 = vld [vmem:[%s4140_s25 + $0x38] sm:$0xf0]  ;;  %v4423_v1 = vor.u32 %v3608_v32, %v2535_v33 }
  0x48   : > { %v3237_v4 = vld [vmem:[%s5679_s1 + $0x520] sm:$0xf]  ;;  %v3366_v9 = vor.u32 %v3820_v3, %v3365_v2  ;;  %v3784_v17 = vld [vmem:[%s5679_s1 + $0x50c] sm:$0xf0]  ;;  %1890 = vmatpush.bf16.msrb.mxu0 %v3126_v6  ;;  %v3646_v55 = vld [vmem:[%s5679_s1 + $0xc4] sm:$0xf]  ;;  %v4436_v6 = vor.u32 %v3609_v46, %v2543_v49 }
  0x49   : > { %v3109_v7 = vld [vmem:[%s5679_s1 + $0x420] sm:$0xf]  ;;  %v3238_v13 = vor.u32 %v3788_v5, %v3237_v4  ;;  %1947 = vmatpush.bf16.msrb.mxu3 %v3510_v8  ;;  %v3752_v26 = vld [vmem:[%s5679_s1 + $0x40c] sm:$0xf0]  ;;  %v2679_v58 = vld [vmem:[%s5679_s1 + $0xd0] sm:$0xf0]  ;;  %v4434_v5 = vor.u32 %v3613_v45, %v2541_v43 }
  0x4a   : > { %v3493_v11 = vld [vmem:[%s5679_s1 + $0x720] sm:$0xf]  ;;  %v3110_v20 = vor.u32 %v3756_v10, %v3109_v7  ;;  %1929 = vmatpush.bf16.msrb.mxu2 %v3366_v9  ;;  %v3848_v28 = vld [vmem:[%s5679_s1 + $0x70c] sm:$0xf0]  ;;  %v3678_v61 = vld [vmem:[%s5679_s1 + $0x1c4] sm:$0xf]  ;;  %v2682_v7 = vor.u32 %v3646_v55, %v2679_v58 }
  0x4b   : > { %v3349_v14 = vld [vmem:[%s5679_s1 + $0x600] sm:$0xf]  ;;  %v3494_v24 = vor.u32 %v3852_v12, %v3493_v11  ;;  %1910 = vmatpush.bf16.msrb.mxu1 %v3238_v13  ;;  %v2533_v30 = vld [vmem:[%s4140_s25 + $0x10] sm:$0xf]  ;;  %v2807_v62 = vld [vmem:[%s5679_s1 + $0x1d0] sm:$0xf0] }
  0x4c   : > { %v3221_v16 = vld [vmem:[%s5679_s1 + $0x500] sm:$0xf]  ;;  %v3350_v25 = vor.u32 %v3816_v15, %v3349_v14  ;;  %v3612_v31 = vld [vmem:[%s4140_s25 + $0x2c] sm:$0xf0]  ;;  %1891 = vmatpush.bf16.msrb.mxu0 %v3110_v20  ;;  %v3742_v63 = vld [vmem:[%s5679_s1 + $0x3c4] sm:$0xf]  ;;  %v2810_v8 = vor.u32 %v3678_v61, %v2807_v62 }
  0x4d   : > { %v3093_v21 = vld [vmem:[%s5679_s1 + $0x400] sm:$0xf]  ;;  %v3222_v29 = vor.u32 %v3784_v17, %v3221_v16  ;;  %1948 = vmatpush.bf16.msrb.mxu3 %v3494_v24  ;;  %v4421_v0 = vor.u32 %v3612_v31, %v2533_v30  ;;  %v3063_v2 = vld [vmem:[%s5679_s1 + $0x3d0] sm:$0xf0]  ;;  %v3706_v3 = vld [vmem:[%s5679_s1 + $0x2a4] sm:$0xf] }
  0x4e   : > { %v3477_v27 = vld [vmem:[%s5679_s1 + $0x700] sm:$0xf]  ;;  %v3094_v42 = vor.u32 %v3752_v26, %v3093_v21  ;;  %1930 = vmatpush.bf16.msrb.mxu2 %v3350_v25  ;;  %v2919_v4 = vld [vmem:[%s5679_s1 + $0x2b0] sm:$0xf0]  ;;  %v3642_v9 = vld [vmem:[%s5679_s1 + $0xa4] sm:$0xf]  ;;  %v3066_v11 = vor.u32 %v3742_v63, %v3063_v2 }
  0x4f   : > { %v3478_v47 = vor.u32 %v3848_v28, %v3477_v27  ;;  %1911 = vmatpush.bf16.msrb.mxu1 %v3222_v29  ;;  %v2663_v10 = vld [vmem:[%s5679_s1 + $0xb0] sm:$0xf0]  ;;  %v2922_v12 = vor.u32 %v3706_v3, %v2919_v4  ;;  %v3674_v13 = vld [vmem:[%s5679_s1 + $0x1a4] sm:$0xf]  ;;  %v2565_v36 = vld [vmem:[%s4140_s25 + $0x50] sm:$0xf] }
  0x50   : > { %1892 = vmatpush.bf16.msrb.mxu0 %v3094_v42  ;;  %v2791_v14 = vld [vmem:[%s5679_s1 + $0x1b0] sm:$0xf0]  ;;  %v3738_v15 = vld [vmem:[%s5679_s1 + $0x3a4] sm:$0xf]  ;;  %v2666_v19 = vor.u32 %v3642_v9, %v2663_v10  ;;  %v3620_v37 = vld [vmem:[%s4140_s25 + $0x6c] sm:$0xf0] }
  0x51   : > { %1949 = vmatpush.bf16.msrb.mxu3 %v3478_v47  ;;  %v3047_v16 = vld [vmem:[%s5679_s1 + $0x3b0] sm:$0xf0]  ;;  %v3702_v17 = vld [vmem:[%s5679_s1 + $0x284] sm:$0xf]  ;;  %1931 = vmatmul.bf16.vlgmr.msrb.gmra.mxu2 %v4434_v5  ;;  %v2794_v20 = vor.u32 %v3674_v13, %v2791_v14  ;;  %v2573_v49 = vld [vmem:[%s4140_s25 + $0x58] sm:$0xf] }
  0x52   : > { %1999 = vmatpush.bf16.msra.mxu2 %v2954_v34  ;;  %1912 = vmatmul.bf16.vlgmr.msrb.gmra.mxu1 %v4423_v1  ;;  %v2903_v18 = vld [vmem:[%s5679_s1 + $0x290] sm:$0xf0]  ;;  %v3638_v21 = vld [vmem:[%s5679_s1 + $0x84] sm:$0xf]  ;;  %v3050_v23 = vor.u32 %v3738_v15, %v3047_v16  ;;  %v3617_v55 = vld [vmem:[%s4140_s25 + $0x5c] sm:$0xf] }
  0x53   : > { %1980 = vmatpush.bf16.msra.mxu1 %v2826_v38  ;;  %1893 = vmatmul.bf16.vlgmr.msrb.gmra.mxu0 %v4421_v0  ;;  %v2906_v24 = vor.u32 %v3702_v17, %v2903_v18  ;;  %v3670_v25 = vld [vmem:[%s5679_s1 + $0x184] sm:$0xf]  ;;  %v2775_v26 = vld [vmem:[%s5679_s1 + $0x190] sm:$0xf0]  ;;  %v2650_v31 = vor.u32 %v3638_v21, %v2647_v22  ;;  %v2575_v58 = vld [vmem:[%s4140_s25 + $0x78] sm:$0xf0] }
  0x54   : > { %1961 = vmatpush.bf16.msra.mxu0 %v2698_v52  ;;  %1950 = vmatmul.bf16.vlgmr.msrb.gmra.mxu3 %v4436_v6  ;;  %v3734_v27 = vld [vmem:[%s5679_s1 + $0x384] sm:$0xf]  ;;  %v3031_v28 = vld [vmem:[%s5679_s1 + $0x390] sm:$0xf0]  ;;  %v2778_v32 = vor.u32 %v3670_v25, %v2775_v26  ;;  %v3621_v52 = vld [vmem:[%s4140_s25 + $0x74] sm:$0xf0]  ;;  %v4552_v14 = vor.u32 %v3617_v55, %v2575_v58 }
  0x55   : > { %2018 = vmatpush.bf16.msra.mxu3 %v3082_v59  ;;  %v3698_v29 = vld [vmem:[%s5679_s1 + $0x264] sm:$0xf]  ;;  %v2887_v30 = vld [vmem:[%s5679_s1 + $0x270] sm:$0xf0]  ;;  %v3034_v35 = vor.u32 %v3734_v27, %v3031_v28  ;;  %v4550_v13 = vor.u32 %v3621_v52, %v2573_v49 }
  0x56   : > { %2000 = vmatpush.bf16.msra.mxu2 %v2938_v60  ;;  %v3634_v33 = vld [vmem:[%s5679_s1 + $0x64] sm:$0xf]  ;;  %v2631_v34 = vld [vmem:[%s5679_s1 + $0x70] sm:$0xf0]  ;;  %v2890_v40 = vor.u32 %v3698_v29, %v2887_v30 }
  0x57   : > { %1981 = vmatpush.bf16.msra.mxu1 %v2810_v8  ;;  %v3616_v38 = vld [vmem:[%s4140_s25 + $0x54] sm:$0xf]  ;;  %v3666_v41 = vld [vmem:[%s5679_s1 + $0x164] sm:$0xf]  ;;  %v2634_v59 = vor.u32 %v3634_v33, %v2631_v34  ;;  %v4537_v8 = vor.u32 %v3620_v37, %v2565_v36 }
  0x58   : > { %1962 = vmatpush.bf16.msra.mxu0 %v2682_v7  ;;  %v2567_v39 = vld [vmem:[%s4140_s25 + $0x70] sm:$0xf0]  ;;  %v3730_v43 = vld [vmem:[%s5679_s1 + $0x364] sm:$0xf] }
  0x59   : > { %2019 = vmatpush.bf16.msra.mxu3 %v3066_v11  ;;  %v2759_v42 = vld [vmem:[%s5679_s1 + $0x170] sm:$0xf0]  ;;  %v3694_v46 = vld [vmem:[%s5679_s1 + $0x244] sm:$0xf]  ;;  %v4539_v9 = vor.u32 %v3616_v38, %v2567_v39 }
  0x5a   : > { %2001 = vmatpush.bf16.msra.mxu2 %v2922_v12  ;;  %v3015_v45 = vld [vmem:[%s5679_s1 + $0x370] sm:$0xf0]  ;;  %v2762_v60 = vor.u32 %v3666_v41, %v2759_v42  ;;  %v3630_v61 = vld [vmem:[%s5679_s1 + $0x44] sm:$0xf] }
  0x5b   : > { %1982 = vmatpush.bf16.msra.mxu1 %v2794_v20  ;;  %v2871_v47 = vld [vmem:[%s5679_s1 + $0x250] sm:$0xf0]  ;;  %v3018_v63 = vor.u32 %v3730_v43, %v3015_v45  ;;  %v3662_v3 = vld [vmem:[%s5679_s1 + $0x144] sm:$0xf] }
  0x5c   : > { %1963 = vmatpush.bf16.msra.mxu0 %v2666_v19  ;;  %v2615_v62 = vld [vmem:[%s5679_s1 + $0x50] sm:$0xf0]  ;;  %v2874_v2 = vor.u32 %v3694_v46, %v2871_v47  ;;  %v3726_v7 = vld [vmem:[%s5679_s1 + $0x344] sm:$0xf] }
  0x5d   : > { %2020 = vmatpush.bf16.msra.mxu3 %v3050_v23  ;;  %v2743_v4 = vld [vmem:[%s5679_s1 + $0x150] sm:$0xf0]  ;;  %v3690_v11 = vld [vmem:[%s5679_s1 + $0x224] sm:$0xf]  ;;  %v2618_v15 = vor.u32 %v3630_v61, %v2615_v62 }
  0x5e   : > { %2002 = vmatpush.bf16.msra.mxu2 %v2906_v24  ;;  %v2999_v10 = vld [vmem:[%s5679_s1 + $0x350] sm:$0xf0]  ;;  %v2746_v16 = vor.u32 %v3662_v3, %v2743_v4  ;;  %v3626_v17 = vld [vmem:[%s5679_s1 + $0x24] sm:$0xf] }
  0x5f   : > { %1983 = vmatpush.bf16.msra.mxu1 %v2778_v32  ;;  %v2855_v12 = vld [vmem:[%s5679_s1 + $0x230] sm:$0xf0]  ;;  %v3002_v19 = vor.u32 %v3726_v7, %v2999_v10  ;;  %v3658_v21 = vld [vmem:[%s5679_s1 + $0x124] sm:$0xf] }
  0x60   : > { %1964 = vmatpush.bf16.msra.mxu0 %v2650_v31  ;;  %v2599_v18 = vld [vmem:[%s5679_s1 + $0x30] sm:$0xf0]  ;;  %v2858_v20 = vor.u32 %v3690_v11, %v2855_v12  ;;  %v3722_v23 = vld [vmem:[%s5679_s1 + $0x324] sm:$0xf] }
  0x61   : > { %2021 = vmatpush.bf16.msra.mxu3 %v3034_v35  ;;  %v2727_v22 = vld [vmem:[%s5679_s1 + $0x130] sm:$0xf0]  ;;  %v3686_v25 = vld [vmem:[%s5679_s1 + $0x204] sm:$0xf]  ;;  %1936 = vmatmul.bf16.gmra.mxu2 %v4550_v13  ;;  %v2602_v29 = vor.u32 %v3626_v17, %v2599_v18 }
  0x62   : > { %2003 = vmatpush.bf16.msra.mxu2 %v2890_v40  ;;  %1917 = vmatmul.bf16.gmra.mxu1 %v4539_v9  ;;  %v2983_v24 = vld [vmem:[%s5679_s1 + $0x330] sm:$0xf0]  ;;  %v3842_v27 = vld [vmem:[%s5679_s1 + $0x6e4] sm:$0xf]  ;;  %v2730_v30 = vor.u32 %v3658_v21, %v2727_v22 }
  0x63   : > { %1984 = vmatpush.bf16.msra.mxu1 %v2762_v60  ;;  %1898 = vmatmul.bf16.gmra.mxu0 %v4537_v8  ;;  %v2839_v26 = vld [vmem:[%s5679_s1 + $0x210] sm:$0xf0]  ;;  %v3622_v31 = vld [vmem:[%s5679_s1 + $0x4] sm:$0xf]  ;;  %v2986_v34 = vor.u32 %v3722_v23, %v2983_v24 }
  0x64   : > { %1965 = vmatpush.bf16.msra.mxu0 %v2634_v59  ;;  %1955 = vmatmul.bf16.gmra.mxu3 %v4552_v14  ;;  %v3463_v28 = vld [vmem:[%s5679_s1 + $0x6f0] sm:$0xf0]  ;;  %v3654_v33 = vld [vmem:[%s5679_s1 + $0x104] sm:$0xf]  ;;  %v2842_v35 = vor.u32 %v3686_v25, %v2839_v26 }
  0x65   : > { %2022 = vmatpush.bf16.msra.mxu3 %v3018_v63  ;;  %v2583_v32 = vld [vmem:[%s5679_s1 + $0x10] sm:$0xf0]  ;;  %v3718_v37 = vld [vmem:[%s5679_s1 + $0x304] sm:$0xf]  ;;  %v3466_v39 = vor.u32 %v3842_v27, %v3463_v28 }
  0x66   : > { %2004 = vmatpush.bf16.msra.mxu2 %v2874_v2  ;;  %v2711_v36 = vld [vmem:[%s5679_s1 + $0x110] sm:$0xf0]  ;;  %v3778_v40 = vld [vmem:[%s5679_s1 + $0x4e4] sm:$0xf]  ;;  %v2586_v47 = vor.u32 %v3622_v31, %v2583_v32 }
  0x67   : > { %1985 = vmatpush.bf16.msra.mxu1 %v2746_v16  ;;  %v2967_v38 = vld [vmem:[%s5679_s1 + $0x310] sm:$0xf0]  ;;  %v3810_v42 = vld [vmem:[%s5679_s1 + $0x5e4] sm:$0xf]  ;;  %v2714_v49 = vor.u32 %v3654_v33, %v2711_v36 }
  0x68   : > { %1966 = vmatpush.bf16.msra.mxu0 %v2618_v15  ;;  %v3207_v41 = vld [vmem:[%s5679_s1 + $0x4f0] sm:$0xf0]  ;;  %v3874_v45 = vld [vmem:[%s5679_s1 + $0x7e4] sm:$0xf]  ;;  %v2970_v58 = vor.u32 %v3718_v37, %v2967_v38 }
  0x69   : > { %2023 = vmatpush.bf16.msra.mxu3 %v3002_v19  ;;  %v3335_v43 = vld [vmem:[%s5679_s1 + $0x5f0] sm:$0xf0]  ;;  %v3838_v52 = vld [vmem:[%s5679_s1 + $0x6c4] sm:$0xf]  ;;  %v3210_v59 = vor.u32 %v3778_v40, %v3207_v41 }
  0x6a   : > { %2005 = vmatpush.bf16.msra.mxu2 %v2858_v20  ;;  %v3591_v46 = vld [vmem:[%s5679_s1 + $0x7f0] sm:$0xf0]  ;;  %v3338_v60 = vor.u32 %v3810_v42, %v3335_v43  ;;  %v3774_v62 = vld [vmem:[%s5679_s1 + $0x4c4] sm:$0xf] }
  0x6b   : > { %1986 = vmatpush.bf16.msra.mxu1 %v2730_v30  ;;  %v3447_v55 = vld [vmem:[%s5679_s1 + $0x6d0] sm:$0xf0]  ;;  %v3594_v61 = vor.u32 %v3874_v45, %v3591_v46  ;;  %v3806_v3 = vld [vmem:[%s5679_s1 + $0x5c4] sm:$0xf] }
  0x6c   : > { %1967 = vmatpush.bf16.msra.mxu0 %v2602_v29  ;;  %v3191_v63 = vld [vmem:[%s5679_s1 + $0x4d0] sm:$0xf0]  ;;  %v3450_v2 = vor.u32 %v3838_v52, %v3447_v55  ;;  %v3870_v10 = vld [vmem:[%s5679_s1 + $0x7c4] sm:$0xf] }
  0x6d   : > { %2024 = vmatpush.bf16.msra.mxu3 %v2986_v34  ;;  %v3319_v4 = vld [vmem:[%s5679_s1 + $0x5d0] sm:$0xf0]  ;;  %v3194_v7 = vor.u32 %v3774_v62, %v3191_v63  ;;  %v3834_v12 = vld [vmem:[%s5679_s1 + $0x6a4] sm:$0xf] }
  0x6e   : > { %2006 = vmatpush.bf16.msra.mxu2 %v2842_v35  ;;  %v3575_v11 = vld [vmem:[%s5679_s1 + $0x7d0] sm:$0xf0]  ;;  %v3770_v16 = vld [vmem:[%s5679_s1 + $0x4a4] sm:$0xf]  ;;  %v3322_v18 = vor.u32 %v3806_v3, %v3319_v4 }
  0x6f   : > { %1987 = vmatpush.bf16.msra.mxu1 %v2714_v49  ;;  %v3431_v15 = vld [vmem:[%s5679_s1 + $0x6b0] sm:$0xf0]  ;;  %v3578_v19 = vor.u32 %v3870_v10, %v3575_v11  ;;  %v3802_v20 = vld [vmem:[%s5679_s1 + $0x5a4] sm:$0xf] }
  0x70   : > { %1968 = vmatpush.bf16.msra.mxu0 %v2586_v47  ;;  %v3175_v17 = vld [vmem:[%s5679_s1 + $0x4b0] sm:$0xf0]  ;;  %v3434_v22 = vor.u32 %v3834_v12, %v3431_v15  ;;  %v3866_v24 = vld [vmem:[%s5679_s1 + $0x7a4] sm:$0xf] }
  0x71   : > { %2025 = vmatpush.bf16.msra.mxu3 %v2970_v58  ;;  %v3303_v21 = vld [vmem:[%s5679_s1 + $0x5b0] sm:$0xf0]  ;;  %v3178_v23 = vor.u32 %v3770_v16, %v3175_v17  ;;  %v3830_v26 = vld [vmem:[%s5679_s1 + $0x684] sm:$0xf]  ;;  %2007 = vmatmul.bf16.vlgmr.msra.gmra.mxu2 %v4178_v54 }
  0x72   : > { %2075 = vmatpush.bf16.msrb.mxu2 %v3466_v39  ;;  %v3559_v25 = vld [vmem:[%s5679_s1 + $0x7b0] sm:$0xf0]  ;;  %1988 = vmatmul.bf16.vlgmr.msra.gmra.mxu1 %v4176_v53  ;;  %v3766_v28 = vld [vmem:[%s5679_s1 + $0x484] sm:$0xf]  ;;  %v3306_v30 = vor.u32 %v3802_v20, %v3303_v21 }
  0x73   : > { %2056 = vmatpush.bf16.msrb.mxu1 %v3338_v60  ;;  %1969 = vmatmul.bf16.vlgmr.msra.gmra.mxu0 %v4169_v48  ;;  %v3415_v27 = vld [vmem:[%s5679_s1 + $0x690] sm:$0xf0]  ;;  %v3562_v31 = vor.u32 %v3866_v24, %v3559_v25  ;;  %v3798_v32 = vld [vmem:[%s5679_s1 + $0x584] sm:$0xf] }
  0x74   : > { %2037 = vmatpush.bf16.msrb.mxu0 %v3210_v59  ;;  %v3159_v29 = vld [vmem:[%s5679_s1 + $0x490] sm:$0xf0]  ;;  %2026 = vmatmul.bf16.vlgmr.msra.gmra.mxu3 %v4186_v57  ;;  %v3418_v34 = vor.u32 %v3830_v26, %v3415_v27  ;;  %v3862_v36 = vld [vmem:[%s5679_s1 + $0x784] sm:$0xf] }
  0x75   : > { %2094 = vmatpush.bf16.msrb.mxu3 %v3594_v61  ;;  %v3287_v33 = vld [vmem:[%s5679_s1 + $0x590] sm:$0xf0]  ;;  %v3162_v35 = vor.u32 %v3766_v28, %v3159_v29  ;;  %v3826_v38 = vld [vmem:[%s5679_s1 + $0x664] sm:$0xf] }
  0x76   : > { %2076 = vmatpush.bf16.msrb.mxu2 %v3450_v2  ;;  %v3543_v37 = vld [vmem:[%s5679_s1 + $0x790] sm:$0xf0]  ;;  %v3762_v40 = vld [vmem:[%s5679_s1 + $0x464] sm:$0xf]  ;;  %v3290_v42 = vor.u32 %v3798_v32, %v3287_v33  ;;  %v2701_v32 = vld [vmem:[%s5679_s1 + $0xe8] sm:$0xf] }
  0x77   : > { %2057 = vmatpush.bf16.msrb.mxu1 %v3322_v18  ;;  %v3399_v39 = vld [vmem:[%s5679_s1 + $0x670] sm:$0xf0]  ;;  %v3546_v43 = vor.u32 %v3862_v36, %v3543_v37  ;;  %v3794_v45 = vld [vmem:[%s5679_s1 + $0x564] sm:$0xf]  ;;  %v3653_v33 = vld [vmem:[%s5679_s1 + $0xf4] sm:$0xf0] }
  0x78   : > { %2038 = vmatpush.bf16.msrb.mxu0 %v3194_v7  ;;  %v3143_v41 = vld [vmem:[%s5679_s1 + $0x470] sm:$0xf0]  ;;  %v3402_v47 = vor.u32 %v3826_v38, %v3399_v39  ;;  %v3858_v52 = vld [vmem:[%s5679_s1 + $0x764] sm:$0xf] }
  0x79   : > { %2095 = vmatpush.bf16.msrb.mxu3 %v3578_v19  ;;  %v3271_v46 = vld [vmem:[%s5679_s1 + $0x570] sm:$0xf0]  ;;  %v3146_v49 = vor.u32 %v3762_v40, %v3143_v41  ;;  %v3822_v58 = vld [vmem:[%s5679_s1 + $0x644] sm:$0xf] }
  0x7a   : > { %2077 = vmatpush.bf16.msrb.mxu2 %v3434_v22  ;;  %v3527_v55 = vld [vmem:[%s5679_s1 + $0x770] sm:$0xf0]  ;;  %v3758_v60 = vld [vmem:[%s5679_s1 + $0x444] sm:$0xf]  ;;  %v3274_v62 = vor.u32 %v3794_v45, %v3271_v46  ;;  %v2702_v46 = vor.u32 %v3653_v33, %v2701_v32  ;;  %v2781_v32 = vld [vmem:[%s5679_s1 + $0x188] sm:$0xf] }
  0x7b   : > { %2058 = vmatpush.bf16.msrb.mxu1 %v3306_v30  ;;  %v3383_v59 = vld [vmem:[%s5679_s1 + $0x650] sm:$0xf0]  ;;  %v3530_v63 = vor.u32 %v3858_v52, %v3527_v55  ;;  %v3790_v2 = vld [vmem:[%s5679_s1 + $0x544] sm:$0xf]  ;;  %v2957_v30 = vld [vmem:[%s5679_s1 + $0x2e8] sm:$0xf] }
  0x7c   : > { %2039 = vmatpush.bf16.msrb.mxu0 %v3178_v23  ;;  %v3127_v61 = vld [vmem:[%s5679_s1 + $0x450] sm:$0xf0]  ;;  %v3386_v4 = vor.u32 %v3822_v58, %v3383_v59  ;;  %v3854_v10 = vld [vmem:[%s5679_s1 + $0x744] sm:$0xf]  ;;  %v2941_v52 = vld [vmem:[%s5679_s1 + $0x2c8] sm:$0xf] }
  0x7d   : > { %2096 = vmatpush.bf16.msrb.mxu3 %v3562_v31  ;;  %v3255_v3 = vld [vmem:[%s5679_s1 + $0x550] sm:$0xf0]  ;;  %v3130_v7 = vor.u32 %v3758_v60, %v3127_v61  ;;  %v3818_v12 = vld [vmem:[%s5679_s1 + $0x624] sm:$0xf]  ;;  %v3717_v31 = vld [vmem:[%s5679_s1 + $0x2f4] sm:$0xf0] }
  0x7e   : > { %2078 = vmatpush.bf16.msrb.mxu2 %v3418_v34  ;;  %v3511_v11 = vld [vmem:[%s5679_s1 + $0x750] sm:$0xf0]  ;;  %v3754_v16 = vld [vmem:[%s5679_s1 + $0x424] sm:$0xf]  ;;  %v3258_v18 = vor.u32 %v3790_v2, %v3255_v3  ;;  %v2958_v45 = vor.u32 %v3717_v31, %v2957_v30  ;;  %v3713_v55 = vld [vmem:[%s5679_s1 + $0x2d4] sm:$0xf0] }
  0x7f   : > { %2059 = vmatpush.bf16.msrb.mxu1 %v3290_v42  ;;  %v3367_v15 = vld [vmem:[%s5679_s1 + $0x630] sm:$0xf0]  ;;  %v3514_v19 = vor.u32 %v3854_v10, %v3511_v11  ;;  %v3786_v20 = vld [vmem:[%s5679_s1 + $0x524] sm:$0xf]  ;;  %v2829_v42 = vld [vmem:[%s5679_s1 + $0x1e8] sm:$0xf]  ;;  %v2942_v3 = vor.u32 %v3713_v55, %v2941_v52 }
  0x80   : > { %2040 = vmatpush.bf16.msrb.mxu0 %v3162_v35  ;;  %v3111_v17 = vld [vmem:[%s5679_s1 + $0x430] sm:$0xf0]  ;;  %v3850_v22 = vld [vmem:[%s5679_s1 + $0x724] sm:$0xf]  ;;  %v3370_v23 = vor.u32 %v3818_v12, %v3367_v15  ;;  %v2685_v58 = vld [vmem:[%s5679_s1 + $0xc8] sm:$0xf] }
  0x81   : > { %2097 = vmatpush.bf16.msrb.mxu3 %v3546_v43  ;;  %v3239_v21 = vld [vmem:[%s5679_s1 + $0x530] sm:$0xf0]  ;;  %v3114_v24 = vor.u32 %v3754_v16, %v3111_v17  ;;  %v3814_v26 = vld [vmem:[%s5679_s1 + $0x604] sm:$0xf]  ;;  %2012 = vmatmul.bf16.gmra.mxu2 %v4294_v51  ;;  %v3685_v43 = vld [vmem:[%s5679_s1 + $0x1f4] sm:$0xf0] }
  0x82   : > { %2079 = vmatpush.bf16.msrb.mxu2 %v3402_v47  ;;  %v3495_v25 = vld [vmem:[%s5679_s1 + $0x730] sm:$0xf0]  ;;  %1993 = vmatmul.bf16.gmra.mxu1 %v4292_v50  ;;  %v3750_v28 = vld [vmem:[%s5679_s1 + $0x404] sm:$0xf]  ;;  %v3242_v34 = vor.u32 %v3786_v20, %v3239_v21  ;;  %v3085_v47 = vld [vmem:[%s5679_s1 + $0x3e8] sm:$0xf] }
  0x83   : > { %2060 = vmatpush.bf16.msrb.mxu1 %v3274_v62  ;;  %v3351_v27 = vld [vmem:[%s5679_s1 + $0x610] sm:$0xf0]  ;;  %1974 = vmatmul.bf16.gmra.mxu0 %v4281_v44  ;;  %v3498_v35 = vor.u32 %v3850_v22, %v3495_v25  ;;  %v3782_v36 = vld [vmem:[%s5679_s1 + $0x504] sm:$0xf]  ;;  %v3649_v59 = vld [vmem:[%s5679_s1 + $0xd4] sm:$0xf0]  ;;  %v2830_v62 = vor.u32 %v3685_v43, %v2829_v42 }
  0x84   : > { %2041 = vmatpush.bf16.msrb.mxu0 %v3146_v49  ;;  %v3095_v29 = vld [vmem:[%s5679_s1 + $0x410] sm:$0xf0]  ;;  %2031 = vmatmul.bf16.gmra.mxu3 %v4302_v56  ;;  %v3846_v38 = vld [vmem:[%s5679_s1 + $0x704] sm:$0xf]  ;;  %v3354_v39 = vor.u32 %v3814_v26, %v3351_v27  ;;  %v3749_v49 = vld [vmem:[%s5679_s1 + $0x3f4] sm:$0xf0] }
  0x85   : > { %2098 = vmatpush.bf16.msrb.mxu3 %v3530_v63  ;;  %v3223_v37 = vld [vmem:[%s5679_s1 + $0x510] sm:$0xf0]  ;;  %v3098_v40 = vor.u32 %v3750_v28, %v3095_v29  ;;  %v3086_v63 = vor.u32 %v3749_v49, %v3085_v47  ;;  %v2813_v2 = vld [vmem:[%s5679_s1 + $0x1c8] sm:$0xf]  ;;  %v3745_v11 = vld [vmem:[%s5679_s1 + $0x3d4] sm:$0xf0] }
  0x86   : > { %2080 = vmatpush.bf16.msrb.mxu2 %v3386_v4  ;;  %v3479_v41 = vld [vmem:[%s5679_s1 + $0x710] sm:$0xf0]  ;;  %v3226_v60 = vor.u32 %v3782_v36, %v3223_v37  ;;  %v2686_v4 = vor.u32 %v3649_v59, %v2685_v58  ;;  %v3069_v10 = vld [vmem:[%s5679_s1 + $0x3c8] sm:$0xf]  ;;  %v3709_v15 = vld [vmem:[%s5679_s1 + $0x2b4] sm:$0xf0] }
  0x87   : > { %2061 = vmatpush.bf16.msrb.mxu1 %v3258_v18  ;;  %v3482_v61 = vor.u32 %v3846_v38, %v3479_v41  ;;  %v2925_v12 = vld [vmem:[%s5679_s1 + $0x2a8] sm:$0xf]  ;;  %v3070_v17 = vor.u32 %v3745_v11, %v3069_v10  ;;  %v3677_v21 = vld [vmem:[%s5679_s1 + $0x1b4] sm:$0xf0] }
  0x88   : > { %2042 = vmatpush.bf16.msrb.mxu0 %v3130_v7  ;;  %v3681_v7 = vld [vmem:[%s5679_s1 + $0x1d4] sm:$0xf0]  ;;  %v2669_v18 = vld [vmem:[%s5679_s1 + $0xa8] sm:$0xf] }
  0x89   : > { %2099 = vmatpush.bf16.msrb.mxu3 %v3514_v19  ;;  %v2814_v16 = vor.u32 %v3681_v7, %v2813_v2  ;;  %v3645_v19 = vld [vmem:[%s5679_s1 + $0xb4] sm:$0xf0]  ;;  %v2797_v20 = vld [vmem:[%s5679_s1 + $0x1a8] sm:$0xf] }
  0x8a   : > { %2081 = vmatpush.bf16.msrb.mxu2 %v3370_v23  ;;  %v3053_v22 = vld [vmem:[%s5679_s1 + $0x3a8] sm:$0xf]  ;;  %v3741_v23 = vld [vmem:[%s5679_s1 + $0x3b4] sm:$0xf0]  ;;  %v2670_v25 = vor.u32 %v3645_v19, %v2669_v18  ;;  %v2798_v28 = vor.u32 %v3677_v21, %v2797_v20 }
  0x8b   : > { %2062 = vmatpush.bf16.msrb.mxu1 %v3242_v34  ;;  %v2909_v26 = vld [vmem:[%s5679_s1 + $0x288] sm:$0xf]  ;;  %v3705_v27 = vld [vmem:[%s5679_s1 + $0x294] sm:$0xf0]  ;;  %v3054_v29 = vor.u32 %v3741_v23, %v3053_v22 }
  0x8c   : > { %2043 = vmatpush.bf16.msrb.mxu0 %v3114_v24  ;;  %v2926_v24 = vor.u32 %v3709_v15, %v2925_v12  ;;  %v2653_v30 = vld [vmem:[%s5679_s1 + $0x88] sm:$0xf]  ;;  %v3641_v31 = vld [vmem:[%s5679_s1 + $0x94] sm:$0xf0]  ;;  %v2910_v36 = vor.u32 %v3705_v27, %v2909_v26 }
  0x8d   : > { %2100 = vmatpush.bf16.msrb.mxu3 %v3498_v35  ;;  %v3673_v33 = vld [vmem:[%s5679_s1 + $0x194] sm:$0xf0]  ;;  %v3037_v34 = vld [vmem:[%s5679_s1 + $0x388] sm:$0xf]  ;;  %v2654_v37 = vor.u32 %v3641_v31, %v2653_v30 }
  0x8e   : > { %2082 = vmatpush.bf16.msrb.mxu2 %v3354_v39  ;;  %v3737_v35 = vld [vmem:[%s5679_s1 + $0x394] sm:$0xf0]  ;;  %v2893_v38 = vld [vmem:[%s5679_s1 + $0x268] sm:$0xf] }
  0x8f   : > { %2063 = vmatpush.bf16.msrb.mxu1 %v3226_v60  ;;  %v3701_v39 = vld [vmem:[%s5679_s1 + $0x274] sm:$0xf0]  ;;  %v3038_v41 = vor.u32 %v3737_v35, %v3037_v34  ;;  %v2637_v42 = vld [vmem:[%s5679_s1 + $0x68] sm:$0xf] }
  0x90   : > { %2044 = vmatpush.bf16.msrb.mxu0 %v3098_v40  ;;  %v2782_v40 = vor.u32 %v3673_v33, %v2781_v32  ;;  %v3637_v43 = vld [vmem:[%s5679_s1 + $0x74] sm:$0xf0]  ;;  %v3021_v47 = vld [vmem:[%s5679_s1 + $0x368] sm:$0xf]  ;;  %v2894_v52 = vor.u32 %v3701_v39, %v2893_v38 }
  0x91   : > { %2101 = vmatpush.bf16.msrb.mxu3 %v3482_v61  ;;  %2083 = vmatmul.bf16.vlgmr.msrb.gmra.mxu2 %v4434_v5  ;;  %v3733_v49 = vld [vmem:[%s5679_s1 + $0x374] sm:$0xf0]  ;;  %v2638_v55 = vor.u32 %v3637_v43, %v2637_v42  ;;  %v2877_v58 = vld [vmem:[%s5679_s1 + $0x248] sm:$0xf] }
  0x92   : > { %2151 = vmatpush.bf16.msra.mxu2 %v2958_v45  ;;  %2064 = vmatmul.bf16.vlgmr.msrb.gmra.mxu1 %v4423_v1  ;;  %v2765_v45 = vld [vmem:[%s5679_s1 + $0x168] sm:$0xf]  ;;  %v3697_v59 = vld [vmem:[%s5679_s1 + $0x254] sm:$0xf0]  ;;  %v3022_v61 = vor.u32 %v3733_v49, %v3021_v47 }
  0x93   : > { %2132 = vmatpush.bf16.msra.mxu1 %v2830_v62  ;;  %2045 = vmatmul.bf16.vlgmr.msrb.gmra.mxu0 %v4421_v0  ;;  %v2621_v62 = vld [vmem:[%s5679_s1 + $0x48] sm:$0xf]  ;;  %v3729_v7 = vld [vmem:[%s5679_s1 + $0x354] sm:$0xf0]  ;;  %v2878_v10 = vor.u32 %v3697_v59, %v2877_v58 }
  0x94   : > { %2113 = vmatpush.bf16.msra.mxu0 %v2702_v46  ;;  %2102 = vmatmul.bf16.vlgmr.msrb.gmra.mxu3 %v4436_v6  ;;  %v3669_v46 = vld [vmem:[%s5679_s1 + $0x174] sm:$0xf0]  ;;  %v2749_v2 = vld [vmem:[%s5679_s1 + $0x148] sm:$0xf] }
  0x95   : > { %2170 = vmatpush.bf16.msra.mxu3 %v3086_v63  ;;  %v2766_v60 = vor.u32 %v3669_v46, %v2765_v45  ;;  %v3633_v63 = vld [vmem:[%s5679_s1 + $0x54] sm:$0xf0]  ;;  %v2861_v12 = vld [vmem:[%s5679_s1 + $0x228] sm:$0xf] }
  0x96   : > { %2152 = vmatpush.bf16.msra.mxu2 %v2942_v3  ;;  %v3665_v3 = vld [vmem:[%s5679_s1 + $0x154] sm:$0xf0]  ;;  %v2622_v11 = vor.u32 %v3633_v63, %v2621_v62  ;;  %v2605_v18 = vld [vmem:[%s5679_s1 + $0x28] sm:$0xf] }
  0x97   : > { %2133 = vmatpush.bf16.msra.mxu1 %v2814_v16  ;;  %v3693_v15 = vld [vmem:[%s5679_s1 + $0x234] sm:$0xf0]  ;;  %v2750_v16 = vor.u32 %v3665_v3, %v2749_v2  ;;  %v2733_v20 = vld [vmem:[%s5679_s1 + $0x128] sm:$0xf] }
  0x98   : > { %2114 = vmatpush.bf16.msra.mxu0 %v2686_v4  ;;  %v3005_v4 = vld [vmem:[%s5679_s1 + $0x348] sm:$0xf]  ;;  %v3629_v19 = vld [vmem:[%s5679_s1 + $0x34] sm:$0xf0] }
  0x99   : > { %2171 = vmatpush.bf16.msra.mxu3 %v3070_v17  ;;  %v3006_v17 = vor.u32 %v3729_v7, %v3005_v4  ;;  %v3661_v21 = vld [vmem:[%s5679_s1 + $0x134] sm:$0xf0]  ;;  %v2989_v22 = vld [vmem:[%s5679_s1 + $0x328] sm:$0xf]  ;;  %v2606_v26 = vor.u32 %v3629_v19, %v2605_v18 }
  0x9a   : > { %2153 = vmatpush.bf16.msra.mxu2 %v2926_v24  ;;  %v3725_v23 = vld [vmem:[%s5679_s1 + $0x334] sm:$0xf0]  ;;  %v2845_v24 = vld [vmem:[%s5679_s1 + $0x208] sm:$0xf]  ;;  %v2734_v30 = vor.u32 %v3661_v21, %v2733_v20 }
  0x9b   : > { %2134 = vmatpush.bf16.msra.mxu1 %v2798_v28  ;;  %v3689_v27 = vld [vmem:[%s5679_s1 + $0x214] sm:$0xf0]  ;;  %v2589_v28 = vld [vmem:[%s5679_s1 + $0x8] sm:$0xf]  ;;  %v2990_v31 = vor.u32 %v3725_v23, %v2989_v22 }
  0x9c   : > { %2115 = vmatpush.bf16.msra.mxu0 %v2670_v25  ;;  %v2862_v25 = vor.u32 %v3693_v15, %v2861_v12  ;;  %v2717_v32 = vld [vmem:[%s5679_s1 + $0x108] sm:$0xf]  ;;  %v3657_v33 = vld [vmem:[%s5679_s1 + $0x114] sm:$0xf0] }
  0x9d   : > { %2172 = vmatpush.bf16.msra.mxu3 %v3054_v29  ;;  %v3625_v29 = vld [vmem:[%s5679_s1 + $0x14] sm:$0xf0]  ;;  %v2973_v34 = vld [vmem:[%s5679_s1 + $0x308] sm:$0xf]  ;;  %v2718_v47 = vor.u32 %v3657_v33, %v2717_v32 }
  0x9e   : > { %2154 = vmatpush.bf16.msra.mxu2 %v2910_v36  ;;  %v3721_v35 = vld [vmem:[%s5679_s1 + $0x314] sm:$0xf0]  ;;  %v3469_v36 = vld [vmem:[%s5679_s1 + $0x6e8] sm:$0xf]  ;;  %v2590_v42 = vor.u32 %v3625_v29, %v2589_v28 }
  0x9f   : > { %2135 = vmatpush.bf16.msra.mxu1 %v2782_v40  ;;  %v3213_v38 = vld [vmem:[%s5679_s1 + $0x4e8] sm:$0xf]  ;;  %v3781_v39 = vld [vmem:[%s5679_s1 + $0x4f4] sm:$0xf0]  ;;  %v2974_v49 = vor.u32 %v3721_v35, %v2973_v34 }
  0xa0   : > { %2116 = vmatpush.bf16.msra.mxu0 %v2654_v37  ;;  %v3845_v37 = vld [vmem:[%s5679_s1 + $0x6f4] sm:$0xf0]  ;;  %v3341_v40 = vld [vmem:[%s5679_s1 + $0x5e8] sm:$0xf] }
  0xa1   : > { %2173 = vmatpush.bf16.msra.mxu3 %v3038_v41  ;;  %2088 = vmatmul.bf16.gmra.mxu2 %v4550_v13  ;;  %v2846_v41 = vor.u32 %v3689_v27, %v2845_v24  ;;  %v3813_v43 = vld [vmem:[%s5679_s1 + $0x5f4] sm:$0xf0]  ;;  %v3597_v45 = vld [vmem:[%s5679_s1 + $0x7e8] sm:$0xf] }
  0xa2   : > { %2155 = vmatpush.bf16.msra.mxu2 %v2894_v52  ;;  %2069 = vmatmul.bf16.gmra.mxu1 %v4539_v9  ;;  %v3877_v46 = vld [vmem:[%s5679_s1 + $0x7f4] sm:$0xf0]  ;;  %v3470_v52 = vor.u32 %v3845_v37, %v3469_v36  ;;  %v3453_v58 = vld [vmem:[%s5679_s1 + $0x6c8] sm:$0xf] }
  0xa3   : > { %2136 = vmatpush.bf16.msra.mxu1 %v2766_v60  ;;  %2050 = vmatmul.bf16.gmra.mxu0 %v4537_v8  ;;  %v3841_v59 = vld [vmem:[%s5679_s1 + $0x6d4] sm:$0xf0]  ;;  %v3342_v60 = vor.u32 %v3813_v43, %v3341_v40  ;;  %v3197_v62 = vld [vmem:[%s5679_s1 + $0x4c8] sm:$0xf] }
  0xa4   : > { %2117 = vmatpush.bf16.msra.mxu0 %v2638_v55  ;;  %2107 = vmatmul.bf16.gmra.mxu3 %v4552_v14  ;;  %v3214_v55 = vor.u32 %v3781_v39, %v3213_v38  ;;  %v3777_v63 = vld [vmem:[%s5679_s1 + $0x4d4] sm:$0xf0]  ;;  %v3325_v2 = vld [vmem:[%s5679_s1 + $0x5c8] sm:$0xf] }
  0xa5   : > { %2174 = vmatpush.bf16.msra.mxu3 %v3022_v61  ;;  %v3598_v61 = vor.u32 %v3877_v46, %v3597_v45  ;;  %v3809_v3 = vld [vmem:[%s5679_s1 + $0x5d4] sm:$0xf0]  ;;  %v3581_v4 = vld [vmem:[%s5679_s1 + $0x7c8] sm:$0xf] }
  0xa6   : > { %2156 = vmatpush.bf16.msra.mxu2 %v2878_v10  ;;  %v3873_v7 = vld [vmem:[%s5679_s1 + $0x7d4] sm:$0xf0]  ;;  %v3454_v10 = vor.u32 %v3841_v59, %v3453_v58  ;;  %v3326_v12 = vor.u32 %v3809_v3, %v3325_v2  ;;  %v3181_v18 = vld [vmem:[%s5679_s1 + $0x4a8] sm:$0xf] }
  0xa7   : > { %2137 = vmatpush.bf16.msra.mxu1 %v2750_v16  ;;  %v3582_v15 = vor.u32 %v3873_v7, %v3581_v4  ;;  %v3437_v16 = vld [vmem:[%s5679_s1 + $0x6a8] sm:$0xf]  ;;  %v3773_v19 = vld [vmem:[%s5679_s1 + $0x4b4] sm:$0xf0] }
  0xa8   : > { %2118 = vmatpush.bf16.msra.mxu0 %v2622_v11  ;;  %v3198_v11 = vor.u32 %v3777_v63, %v3197_v62  ;;  %v3309_v20 = vld [vmem:[%s5679_s1 + $0x5a8] sm:$0xf]  ;;  %v3805_v22 = vld [vmem:[%s5679_s1 + $0x5b4] sm:$0xf0]  ;;  %v3182_v28 = vor.u32 %v3773_v19, %v3181_v18 }
  0xa9   : > { %2175 = vmatpush.bf16.msra.mxu3 %v3006_v17  ;;  %v3837_v17 = vld [vmem:[%s5679_s1 + $0x6b4] sm:$0xf0]  ;;  %v3565_v23 = vld [vmem:[%s5679_s1 + $0x7a8] sm:$0xf] }
  0xaa   : > { %2157 = vmatpush.bf16.msra.mxu2 %v2862_v25  ;;  %v3869_v24 = vld [vmem:[%s5679_s1 + $0x7b4] sm:$0xf0]  ;;  %v3438_v27 = vor.u32 %v3837_v17, %v3437_v16  ;;  %v3421_v29 = vld [vmem:[%s5679_s1 + $0x688] sm:$0xf] }
  0xab   : > { %2138 = vmatpush.bf16.msra.mxu1 %v2734_v30  ;;  %v1837_v25 = vpop.f32.mrf.mxu1  ;;  %v3833_v30 = vld [vmem:[%s5679_s1 + $0x694] sm:$0xf0]  ;;  %v3566_v32 = vor.u32 %v3869_v24, %v3565_v23  ;;  %v3165_v33 = vld [vmem:[%s5679_s1 + $0x488] sm:$0xf] }
  0xac   : > { %2119 = vmatpush.bf16.msra.mxu0 %v2606_v26  ;;  %v3769_v34 = vld [vmem:[%s5679_s1 + $0x494] sm:$0xf0]  ;;  %v3293_v35 = vld [vmem:[%s5679_s1 + $0x588] sm:$0xf]  ;;  %v3422_v39 = vor.u32 %v3833_v30, %v3421_v29 }
  0xad   : > { %2176 = vmatpush.bf16.msra.mxu3 %v2990_v31  ;;  %v3310_v31 = vor.u32 %v3805_v22, %v3309_v20  ;;  %v3801_v36 = vld [vmem:[%s5679_s1 + $0x594] sm:$0xf0]  ;;  %v3549_v37 = vld [vmem:[%s5679_s1 + $0x788] sm:$0xf]  ;;  %v3166_v40 = vor.u32 %v3769_v34, %v3165_v33 }
  0xae   : > { %2158 = vmatpush.bf16.msra.mxu2 %v2846_v41  ;;  %v3865_v38 = vld [vmem:[%s5679_s1 + $0x794] sm:$0xf0]  ;;  %v3405_v41 = vld [vmem:[%s5679_s1 + $0x668] sm:$0xf]  ;;  %v3294_v45 = vor.u32 %v3801_v36, %v3293_v35 }
  0xaf   : > { %2139 = vmatpush.bf16.msra.mxu1 %v2718_v47  ;;  %v1818_v21 = vpop.f32.mrf.mxu0  ;;  %v3550_v46 = vor.u32 %v3865_v38, %v3549_v37  ;;  %v3149_v47 = vld [vmem:[%s5679_s1 + $0x468] sm:$0xf]  ;;  %v3861_v62 = vld [vmem:[%s5679_s1 + $0x774] sm:$0xf0] }
  0xb0   : > { %2120 = vmatpush.bf16.msra.mxu0 %v2590_v42  ;;  %v1838_v26 = vadd.f32 %v1837_v25, %v1818_v21  ;;  %v3829_v42 = vld [vmem:[%s5679_s1 + $0x674] sm:$0xf0]  ;;  %v3133_v16 = vld [vmem:[%s5679_s1 + $0x448] sm:$0xf] }
  0xb1   : > { %2177 = vmatpush.bf16.msra.mxu3 %v2974_v49  ;;  %2159 = vmatmul.bf16.vlgmr.msra.gmra.mxu2 %v4178_v54  ;;  %v3765_v49 = vld [vmem:[%s5679_s1 + $0x474] sm:$0xf0]  ;;  %v3406_v2 = vor.u32 %v3829_v42, %v3405_v41  ;;  %v3261_v18 = vld [vmem:[%s5679_s1 + $0x548] sm:$0xf] }
  0xb2   : > { %2227 = vmatpush.bf16.msrb.mxu2 %v3470_v52  ;;  %2140 = vmatmul.bf16.vlgmr.msra.gmra.mxu1 %v4176_v53  ;;  %v1856_v43 = vpop.f32.mrf.mxu2  ;;  %v3277_v52 = vld [vmem:[%s5679_s1 + $0x568] sm:$0xf]  ;;  %v3150_v7 = vor.u32 %v3765_v49, %v3149_v47  ;;  %v3761_v17 = vld [vmem:[%s5679_s1 + $0x454] sm:$0xf0] }
  0xb3   : > { %2208 = vmatpush.bf16.msrb.mxu1 %v3342_v60  ;;  %2121 = vmatmul.bf16.vlgmr.msra.gmra.mxu0 %v4169_v48  ;;  %v3797_v60 = vld [vmem:[%s5679_s1 + $0x574] sm:$0xf0]  ;;  %v1839_v63 = vpop.f32.mrf.mxu1  ;;  %v3517_v20 = vld [vmem:[%s5679_s1 + $0x748] sm:$0xf]  ;;  %v3134_v23 = vor.u32 %v3761_v17, %v3133_v16 }
  0xb4   : > { %2189 = vmatpush.bf16.msrb.mxu0 %v3214_v55  ;;  %2178 = vmatmul.bf16.vlgmr.msra.gmra.mxu3 %v4186_v57  ;;  %v1857_v55 = vadd.f32 %v1856_v43, %v1838_v26  ;;  %v1875_v58 = vpop.f32.mrf.mxu3  ;;  %v3793_v19 = vld [vmem:[%s5679_s1 + $0x554] sm:$0xf0]  ;;  %v3373_v24 = vld [vmem:[%s5679_s1 + $0x628] sm:$0xf] }
  0xb5   : > { %2246 = vmatpush.bf16.msrb.mxu3 %v3598_v61  ;;  %v3533_v61 = vld [vmem:[%s5679_s1 + $0x768] sm:$0xf]  ;;  %v3857_v21 = vld [vmem:[%s5679_s1 + $0x754] sm:$0xf0] }
  0xb6   : > { %2228 = vmatpush.bf16.msrb.mxu2 %v3454_v10  ;;  %v5124_v3 = vadd.f32 %v1875_v58, %v1857_v55  ;;  %v3389_v10 = vld [vmem:[%s5679_s1 + $0x648] sm:$0xf]  ;;  %v3821_v25 = vld [vmem:[%s5679_s1 + $0x634] sm:$0xf0] }
  0xb7   : > { %2209 = vmatpush.bf16.msrb.mxu1 %v3326_v12  ;;  %v1820_v59 = vpop.f32.mrf.mxu0  ;;  %v3278_v12 = vor.u32 %v3797_v60, %v3277_v52  ;;  %v3117_v29 = vld [vmem:[%s5679_s1 + $0x428] sm:$0xf]  ;;  %v3757_v30 = vld [vmem:[%s5679_s1 + $0x434] sm:$0xf0] }
  0xb8   : > { %2190 = vmatpush.bf16.msrb.mxu0 %v3198_v11  ;;  %v1840_v4 = vadd.f32 %v1839_v63, %v1820_v59  ;;  %v3825_v11 = vld [vmem:[%s5679_s1 + $0x654] sm:$0xf0]  ;;  %v3501_v36 = vld [vmem:[%s5679_s1 + $0x728] sm:$0xf]  ;;  %v3118_v43 = vor.u32 %v3757_v30, %v3117_v29  ;;  %v3651_v63 = vld [vmem:[%s5679_s1 + $0xec] sm:$0xf] }
  0xb9   : > { %2247 = vmatpush.bf16.msrb.mxu3 %v3582_v15  ;;  %v3534_v15 = vor.u32 %v3861_v62, %v3533_v61  ;;  %v3390_v22 = vor.u32 %v3825_v11, %v3389_v10  ;;  %v3789_v35 = vld [vmem:[%s5679_s1 + $0x534] sm:$0xf0]  ;;  %v3229_v55 = vld [vmem:[%s5679_s1 + $0x508] sm:$0xf]  ;;  %v3715_v61 = vld [vmem:[%s5679_s1 + $0x2ec] sm:$0xf] }
  0xba   : > { %2229 = vmatpush.bf16.msrb.mxu2 %v3438_v27  ;;  %v1858_v26 = vpop.f32.mrf.mxu2  ;;  %v3262_v27 = vor.u32 %v3793_v19, %v3261_v18  ;;  %v3853_v37 = vld [vmem:[%s5679_s1 + $0x734] sm:$0xf0]  ;;  %v3485_v59 = vld [vmem:[%s5679_s1 + $0x708] sm:$0xf]  ;;  %v2959_v62 = vld [vmem:[%s5679_s1 + $0x2f8] sm:$0xf0] }
  0xbb   : > { %2210 = vmatpush.bf16.msrb.mxu1 %v3310_v31  ;;  %v3245_v31 = vld [vmem:[%s5679_s1 + $0x528] sm:$0xf]  ;;  %v1842_v38 = vpop.f32.mrf.mxu1  ;;  %v3753_v47 = vld [vmem:[%s5679_s1 + $0x414] sm:$0xf0]  ;;  %v3502_v52 = vor.u32 %v3853_v37, %v3501_v36  ;;  %v2831_v11 = vld [vmem:[%s5679_s1 + $0x1f8] sm:$0xf0] }
  0xbc   : > { %2191 = vmatpush.bf16.msrb.mxu0 %v3182_v28  ;;  %v3518_v28 = vor.u32 %v3857_v21, %v3517_v20  ;;  %v1877_v33 = vpop.f32.mrf.mxu3  ;;  %v3246_v49 = vor.u32 %v3789_v35, %v3245_v31  ;;  %v3785_v58 = vld [vmem:[%s5679_s1 + $0x514] sm:$0xf0]  ;;  %v3647_v29 = vld [vmem:[%s5679_s1 + $0xcc] sm:$0xf]  ;;  %v2687_v30 = vld [vmem:[%s5679_s1 + $0xd8] sm:$0xf0] }
  0xbd   : > { %2248 = vmatpush.bf16.msrb.mxu3 %v3566_v32  ;;  %v1859_v32 = vadd.f32 %v1858_v26, %v1840_v4  ;;  %v3849_v60 = vld [vmem:[%s5679_s1 + $0x714] sm:$0xf0]  ;;  %v3683_v4 = vld [vmem:[%s5679_s1 + $0x1ec] sm:$0xf]  ;;  %v3230_v17 = vor.u32 %v3785_v58, %v3229_v55  ;;  %v3071_v36 = vld [vmem:[%s5679_s1 + $0x3d8] sm:$0xf0] }
  0xbe   : > { %2230 = vmatpush.bf16.msrb.mxu2 %v3422_v39  ;;  %v3374_v39 = vor.u32 %v3821_v25, %v3373_v24  ;;  %v3486_v18 = vor.u32 %v3849_v60, %v3485_v59  ;;  %v3711_v24 = vld [vmem:[%s5679_s1 + $0x2cc] sm:$0xf]  ;;  %v2943_v25 = vld [vmem:[%s5679_s1 + $0x2d8] sm:$0xf0] }
  0xbf   : > { %2211 = vmatpush.bf16.msrb.mxu1 %v3294_v45  ;;  %v1823_v34 = vpop.f32.mrf.mxu0  ;;  %v5177_v41 = vadd.f32 %v1877_v33, %v1859_v32  ;;  %v3817_v45 = vld [vmem:[%s5679_s1 + $0x614] sm:$0xf0]  ;;  %v3679_v31 = vld [vmem:[%s5679_s1 + $0x1cc] sm:$0xf]  ;;  %v2946_v37 = vor.u32 %v3711_v24, %v2943_v25  ;;  %v2799_v58 = vld [vmem:[%s5679_s1 + $0x1b8] sm:$0xf0] }
  0xc0   : > { %2192 = vmatpush.bf16.msrb.mxu0 %v3166_v40  ;;  %v3357_v40 = vld [vmem:[%s5679_s1 + $0x608] sm:$0xf]  ;;  %v1843_v42 = vadd.f32 %v1842_v38, %v1823_v34  ;;  %v2815_v34 = vld [vmem:[%s5679_s1 + $0x1d8] sm:$0xf0]  ;;  %v3743_v35 = vld [vmem:[%s5679_s1 + $0x3cc] sm:$0xf]  ;;  %v2690_v38 = vor.u32 %v3647_v29, %v2687_v30 }
  0xc1   : > { %2249 = vmatpush.bf16.msrb.mxu3 %v3550_v46  ;;  %v3101_v46 = vld [vmem:[%s5679_s1 + $0x408] sm:$0xf]  ;;  %2164 = vmatmul.bf16.gmra.mxu2 %v4294_v51  ;;  %v3739_v59 = vld [vmem:[%s5679_s1 + $0x3ac] sm:$0xf]  ;;  %v3055_v60 = vld [vmem:[%s5679_s1 + $0x3b8] sm:$0xf0] }
  0xc2   : > { %2231 = vmatpush.bf16.msrb.mxu2 %v3406_v2  ;;  %2145 = vmatmul.bf16.gmra.mxu1 %v4292_v50  ;;  %v2703_v2 = vld [vmem:[%s5679_s1 + $0xf8] sm:$0xf0]  ;;  %v3102_v10 = vor.u32 %v3753_v47, %v3101_v46  ;;  %v1861_v16 = vpop.f32.mrf.mxu2  ;;  %v3643_v46 = vld [vmem:[%s5679_s1 + $0xac] sm:$0xf] }
  0xc3   : > { %2212 = vmatpush.bf16.msrb.mxu1 %v3278_v12  ;;  %2126 = vmatmul.bf16.gmra.mxu0 %v4281_v44  ;;  %v3747_v12 = vld [vmem:[%s5679_s1 + $0x3ec] sm:$0xf]  ;;  %v1862_v19 = vadd.f32 %v1861_v16, %v1843_v42  ;;  %v1844_v26 = vpop.f32.mrf.mxu1  ;;  %v2671_v47 = vld [vmem:[%s5679_s1 + $0xb8] sm:$0xf0] }
  0xc4   : > { %2193 = vmatpush.bf16.msrb.mxu0 %v3150_v7  ;;  %2183 = vmatmul.bf16.gmra.mxu3 %v4302_v56  ;;  %v3358_v7 = vor.u32 %v3817_v45, %v3357_v40  ;;  %v1880_v20 = vpop.f32.mrf.mxu3  ;;  %v3074_v40 = vor.u32 %v3743_v35, %v3071_v36  ;;  %v3707_v42 = vld [vmem:[%s5679_s1 + $0x2ac] sm:$0xf]  ;;  %v2895_v25 = vld [vmem:[%s5679_s1 + $0x278] sm:$0xf0] }
  0xc5   : > { %2250 = vmatpush.bf16.msrb.mxu3 %v3534_v15  ;;  %v3087_v15 = vld [vmem:[%s5679_s1 + $0x3f8] sm:$0xf0]  ;;  %v5243_v32 = vadd.f32 %v1880_v20, %v1862_v19  ;;  %v3639_v16 = vld [vmem:[%s5679_s1 + $0x8c] sm:$0xf] }
  0xc6   : > { %2232 = vmatpush.bf16.msrb.mxu2 %v3390_v22  ;;  %v2962_v22 = vor.u32 %v3715_v61, %v2959_v62  ;;  %v2783_v19 = vld [vmem:[%s5679_s1 + $0x198] sm:$0xf0]  ;;  %v3735_v20 = vld [vmem:[%s5679_s1 + $0x38c] sm:$0xf] }
  0xc7   : > { %2213 = vmatpush.bf16.msrb.mxu1 %v3262_v27  ;;  %v1825_v21 = vpop.f32.mrf.mxu0  ;;  %v2834_v27 = vor.u32 %v3683_v4, %v2831_v11  ;;  %v2911_v11 = vld [vmem:[%s5679_s1 + $0x298] sm:$0xf0]  ;;  %v3699_v24 = vld [vmem:[%s5679_s1 + $0x26c] sm:$0xf] }
  0xc8   : > { %2194 = vmatpush.bf16.msrb.mxu0 %v3134_v23  ;;  %v2706_v23 = vor.u32 %v3651_v63, %v2703_v2  ;;  %v1845_v33 = vadd.f32 %v1844_v26, %v1825_v21  ;;  %v3039_v21 = vld [vmem:[%s5679_s1 + $0x398] sm:$0xf0]  ;;  %v3667_v30 = vld [vmem:[%s5679_s1 + $0x16c] sm:$0xf] }
  0xc9   : > { %2251 = vmatpush.bf16.msrb.mxu3 %v3518_v28  ;;  %v3090_v28 = vor.u32 %v3747_v12, %v3087_v15  ;;  %v3058_v15 = vor.u32 %v3739_v59, %v3055_v60  ;;  %v2639_v29 = vld [vmem:[%s5679_s1 + $0x78] sm:$0xf0]  ;;  %v3731_v35 = vld [vmem:[%s5679_s1 + $0x36c] sm:$0xf] }
  0xca   : > { %2233 = vmatpush.bf16.msrb.mxu2 %v3374_v39  ;;  %v2818_v39 = vor.u32 %v3679_v31, %v2815_v34  ;;  %v1863_v45 = vpop.f32.mrf.mxu2  ;;  %v2767_v34 = vld [vmem:[%s5679_s1 + $0x178] sm:$0xf0] }
  0xcb   : > { %2214 = vmatpush.bf16.msrb.mxu1 %v3246_v49  ;;  %v3675_v49 = vld [vmem:[%s5679_s1 + $0x1ac] sm:$0xf]  ;;  %v3023_v36 = vld [vmem:[%s5679_s1 + $0x378] sm:$0xf0] }
  0xcc   : > { %2195 = vmatpush.bf16.msrb.mxu0 %v3118_v43  ;;  %v2927_v43 = vld [vmem:[%s5679_s1 + $0x2b8] sm:$0xf0]  ;;  %v1882_v55 = vpop.f32.mrf.mxu3  ;;  %v2802_v12 = vor.u32 %v3675_v49, %v2799_v58  ;;  %v2770_v49 = vor.u32 %v3667_v30, %v2767_v34  ;;  %v3663_v58 = vld [vmem:[%s5679_s1 + $0x14c] sm:$0xf] }
  0xcd   : > { %2252 = vmatpush.bf16.msrb.mxu3 %v3502_v52  ;;  %v1864_v52 = vadd.f32 %v1863_v45, %v1845_v33  ;;  %v2930_v4 = vor.u32 %v3707_v42, %v2927_v43  ;;  %v2898_v42 = vor.u32 %v3699_v24, %v2895_v25  ;;  %v3695_v45 = vld [vmem:[%s5679_s1 + $0x24c] sm:$0xf]  ;;  %v2751_v60 = vld [vmem:[%s5679_s1 + $0x158] sm:$0xf0] }
  0xce   : > { %2234 = vmatpush.bf16.msrb.mxu2 %v3358_v7  ;;  %v2674_v7 = vor.u32 %v3643_v46, %v2671_v47  ;;  %v2879_v46 = vld [vmem:[%s5679_s1 + $0x258] sm:$0xf0]  ;;  %v3687_v25 = vld [vmem:[%s5679_s1 + $0x20c] sm:$0xf] }
  0xcf   : > { %2215 = vmatpush.bf16.msrb.mxu1 %v3230_v17  ;;  %v1913_v62 = vpop.f32.mrf.mxu1  ;;  %v5278_v63 = vadd.f32 %v1882_v55, %v1864_v52  ;;  %v3671_v17 = vld [vmem:[%s5679_s1 + $0x18c] sm:$0xf]  ;;  %v3026_v52 = vor.u32 %v3731_v35, %v3023_v36  ;;  %v2623_v55 = vld [vmem:[%s5679_s1 + $0x58] sm:$0xf0] }
  0xd0   : > { %2196 = vmatpush.bf16.msrb.mxu0 %v3102_v10  ;;  %v1894_v61 = vpop.f32.mrf.mxu0  ;;  %v3703_v10 = vld [vmem:[%s5679_s1 + $0x28c] sm:$0xf]  ;;  %v2786_v26 = vor.u32 %v3671_v17, %v2783_v19  ;;  %v2735_v19 = vld [vmem:[%s5679_s1 + $0x138] sm:$0xf0] }
  0xd1   : > { %2253 = vmatpush.bf16.msrb.mxu3 %v3486_v18  ;;  %v1895_v2 = vadd.f32 %v1894_v61, %v5124_v3  ;;  %v2655_v3 = vld [vmem:[%s5679_s1 + $0x98] sm:$0xf0]  ;;  %2235 = vmatmul.bf16.vlgmr.msrb.gmra.mxu2 %v4434_v5  ;;  %v3727_v61 = vld [vmem:[%s5679_s1 + $0x34c] sm:$0xf] }
  0xd2   : > { %2303 = vmatpush.bf16.msra.mxu2 %v2962_v22  ;;  %2216 = vmatmul.bf16.vlgmr.msrb.gmra.mxu1 %v4423_v1  ;;  %v2914_v22 = vor.u32 %v3703_v10, %v2911_v11  ;;  %v2863_v10 = vld [vmem:[%s5679_s1 + $0x238] sm:$0xf0]  ;;  %v2754_v11 = vor.u32 %v3663_v58, %v2751_v60  ;;  %v3623_v30 = vld [vmem:[%s5679_s1 + $0xc] sm:$0xf] }
  0xd3   : > { %2284 = vmatpush.bf16.msra.mxu1 %v2834_v27  ;;  %v1914_v18 = vadd.f32 %v1913_v62, %v1895_v2  ;;  %2197 = vmatmul.bf16.vlgmr.msrb.gmra.mxu0 %v4421_v0  ;;  %v3042_v27 = vor.u32 %v3735_v20, %v3039_v21  ;;  %v3007_v62 = vld [vmem:[%s5679_s1 + $0x358] sm:$0xf0]  ;;  %v2882_v2 = vor.u32 %v3695_v45, %v2879_v46  ;;  %v3723_v20 = vld [vmem:[%s5679_s1 + $0x32c] sm:$0xf] }
  0xd4   : > { %2265 = vmatpush.bf16.msra.mxu0 %v2706_v23  ;;  %2254 = vmatmul.bf16.vlgmr.msrb.gmra.mxu3 %v4436_v6  ;;  %v2658_v23 = vor.u32 %v3639_v16, %v2655_v3  ;;  %v1932_v31 = vpop.f32.mrf.mxu2  ;;  %v2607_v16 = vld [vmem:[%s5679_s1 + $0x38] sm:$0xf0]  ;;  %v3659_v3 = vld [vmem:[%s5679_s1 + $0x12c] sm:$0xf] }
  0xd5   : > { %2322 = vmatpush.bf16.msra.mxu3 %v3090_v28  ;;  %v3635_v28 = vld [vmem:[%s5679_s1 + $0x6c] sm:$0xf]  ;;  %v2991_v21 = vld [vmem:[%s5679_s1 + $0x338] sm:$0xf0] }
  0xd6   : > { %2304 = vmatpush.bf16.msra.mxu2 %v2946_v37  ;;  %v1933_v37 = vadd.f32 %v1932_v31, %v1914_v18  ;;  %v2642_v43 = vor.u32 %v3635_v28, %v2639_v29  ;;  %v2847_v29 = vld [vmem:[%s5679_s1 + $0x218] sm:$0xf0]  ;;  %v2994_v34 = vor.u32 %v3723_v20, %v2991_v21  ;;  %v3655_v35 = vld [vmem:[%s5679_s1 + $0x10c] sm:$0xf] }
  0xd7   : > { %2285 = vmatpush.bf16.msra.mxu1 %v2818_v39  ;;  %v1951_v33 = vpop.f32.mrf.mxu3  ;;  %v1915_v39 = vpop.f32.mrf.mxu1  ;;  %v2591_v31 = vld [vmem:[%s5679_s1 + $0x18] sm:$0xf0]  ;;  %v3811_v46 = vld [vmem:[%s5679_s1 + $0x5ec] sm:$0xf] }
  0xd8   : > { %2266 = vmatpush.bf16.msra.mxu0 %v2690_v38  ;;  %v1896_v38 = vpop.f32.mrf.mxu0  ;;  %v5340_v47 = vadd.f32 %v1951_v33, %v1933_v37  ;;  %v2719_v36 = vld [vmem:[%s5679_s1 + $0x118] sm:$0xf0]  ;;  %v3719_v37 = vld [vmem:[%s5679_s1 + $0x30c] sm:$0xf] }
  0xd9   : > { %2323 = vmatpush.bf16.msra.mxu3 %v3074_v40  ;;  %v1897_v40 = vadd.f32 %v1896_v38, %v5177_v41  ;;  %v3631_v41 = vld [vmem:[%s5679_s1 + $0x4c] sm:$0xf]  ;;  %v3215_v45 = vld [vmem:[%s5679_s1 + $0x4f8] sm:$0xf0] }
  0xda   : > { %2305 = vmatpush.bf16.msra.mxu2 %v2930_v4  ;;  %v2626_v4 = vor.u32 %v3631_v41, %v2623_v55  ;;  %v3343_v41 = vld [vmem:[%s5679_s1 + $0x5f8] sm:$0xf0]  ;;  %v3875_v55 = vld [vmem:[%s5679_s1 + $0x7ec] sm:$0xf] }
  0xdb   : > { %2286 = vmatpush.bf16.msra.mxu1 %v2802_v12  ;;  %v1916_v59 = vadd.f32 %v1915_v39, %v1897_v40  ;;  %v3010_v12 = vor.u32 %v3727_v61, %v3007_v62  ;;  %v2975_v39 = vld [vmem:[%s5679_s1 + $0x318] sm:$0xf0]  ;;  %v3843_v40 = vld [vmem:[%s5679_s1 + $0x6ec] sm:$0xf] }
  0xdc   : > { %2267 = vmatpush.bf16.msra.mxu0 %v2674_v7  ;;  %v3691_v7 = vld [vmem:[%s5679_s1 + $0x22c] sm:$0xf]  ;;  %v1934_v17 = vpop.f32.mrf.mxu2  ;;  %v3599_v58 = vld [vmem:[%s5679_s1 + $0x7f8] sm:$0xf0]  ;;  %v2978_v60 = vor.u32 %v3719_v37, %v2975_v39 }
  0xdd   : > { %2324 = vmatpush.bf16.msra.mxu3 %v3058_v15  ;;  %v3627_v15 = vld [vmem:[%s5679_s1 + $0x2c] sm:$0xf]  ;;  %v3327_v21 = vld [vmem:[%s5679_s1 + $0x5d8] sm:$0xf0] }
  0xde   : > { %2306 = vmatpush.bf16.msra.mxu2 %v2914_v22  ;;  %v1935_v22 = vadd.f32 %v1934_v17, %v1916_v59  ;;  %v2610_v28 = vor.u32 %v3627_v15, %v2607_v16  ;;  %v2722_v59 = vor.u32 %v3655_v35, %v2719_v36  ;;  %v3346_v16 = vor.u32 %v3811_v46, %v3343_v41  ;;  %v3775_v17 = vld [vmem:[%s5679_s1 + $0x4cc] sm:$0xf]  ;;  %v3311_v37 = vld [vmem:[%s5679_s1 + $0x5b8] sm:$0xf0] }
  0xdf   : > { %2287 = vmatpush.bf16.msra.mxu1 %v2786_v26  ;;  %v1953_v18 = vpop.f32.mrf.mxu3  ;;  %v1918_v24 = vpop.f32.mrf.mxu1  ;;  %v3567_v39 = vld [vmem:[%s5679_s1 + $0x7b8] sm:$0xf0] }
  0xe0   : > { %2268 = vmatpush.bf16.msra.mxu0 %v2658_v23  ;;  %v1899_v23 = vpop.f32.mrf.mxu0  ;;  %v5397_v33 = vadd.f32 %v1953_v18, %v1935_v22  ;;  %v3199_v18 = vld [vmem:[%s5679_s1 + $0x4d8] sm:$0xf0]  ;;  %v3871_v22 = vld [vmem:[%s5679_s1 + $0x7cc] sm:$0xf] }
  0xe1   : > { %2325 = vmatpush.bf16.msra.mxu3 %v3042_v27  ;;  %v1900_v26 = vadd.f32 %v1899_v23, %v5243_v32  ;;  %v2866_v27 = vor.u32 %v3691_v7, %v2863_v10  ;;  %v2738_v32 = vor.u32 %v3659_v3, %v2735_v19  ;;  %2240 = vmatmul.bf16.gmra.mxu2 %v4550_v13  ;;  %v3839_v7 = vld [vmem:[%s5679_s1 + $0x6cc] sm:$0xf]  ;;  %v3455_v10 = vld [vmem:[%s5679_s1 + $0x6d8] sm:$0xf0] }
  0xe2   : > { %2307 = vmatpush.bf16.msra.mxu2 %v2898_v42  ;;  %2221 = vmatmul.bf16.gmra.mxu1 %v4539_v9  ;;  %v3471_v42 = vld [vmem:[%s5679_s1 + $0x6f8] sm:$0xf0]  ;;  %v3602_v3 = vor.u32 %v3875_v55, %v3599_v58  ;;  %v3807_v19 = vld [vmem:[%s5679_s1 + $0x5cc] sm:$0xf] }
  0xe3   : > { %2288 = vmatpush.bf16.msra.mxu1 %v2770_v49  ;;  %v1919_v38 = vadd.f32 %v1918_v24, %v1900_v26  ;;  %2202 = vmatmul.bf16.gmra.mxu0 %v4537_v8  ;;  %v2850_v49 = vor.u32 %v3687_v25, %v2847_v29  ;;  %v3583_v23 = vld [vmem:[%s5679_s1 + $0x7d8] sm:$0xf0]  ;;  %v3202_v26 = vor.u32 %v3775_v17, %v3199_v18  ;;  %v3835_v29 = vld [vmem:[%s5679_s1 + $0x6ac] sm:$0xf] }
  0xe4   : > { %2269 = vmatpush.bf16.msra.mxu0 %v2642_v43  ;;  %2259 = vmatmul.bf16.gmra.mxu3 %v4552_v14  ;;  %v3779_v43 = vld [vmem:[%s5679_s1 + $0x4ec] sm:$0xf]  ;;  %v1937_v61 = vpop.f32.mrf.mxu2  ;;  %v3423_v41 = vld [vmem:[%s5679_s1 + $0x698] sm:$0xf0] }
  0xe5   : > { %2326 = vmatpush.bf16.msra.mxu3 %v3026_v52  ;;  %v2594_v52 = vor.u32 %v3623_v30, %v2591_v31  ;;  %v3439_v30 = vld [vmem:[%s5679_s1 + $0x6b8] sm:$0xf0]  ;;  %v3771_v31 = vld [vmem:[%s5679_s1 + $0x4ac] sm:$0xf] }
  0xe6   : > { %2308 = vmatpush.bf16.msra.mxu2 %v2882_v2  ;;  %v3474_v2 = vor.u32 %v3843_v40, %v3471_v42  ;;  %v3442_v46 = vor.u32 %v3835_v29, %v3439_v30  ;;  %v3279_v18 = vld [vmem:[%s5679_s1 + $0x578] sm:$0xf0] }
  0xe7   : > { %2289 = vmatpush.bf16.msra.mxu1 %v2754_v11  ;;  %v1956_v62 = vpop.f32.mrf.mxu3  ;;  %v1938_v11 = vadd.f32 %v1937_v61, %v1919_v38  ;;  %v1920_v15 = vpop.f32.mrf.mxu1  ;;  %v3867_v38 = vld [vmem:[%s5679_s1 + $0x7ac] sm:$0xf]  ;;  %v3167_v61 = vld [vmem:[%s5679_s1 + $0x498] sm:$0xf0] }
  0xe8   : > { %2270 = vmatpush.bf16.msra.mxu0 %v2626_v4  ;;  %v3218_v4 = vor.u32 %v3779_v43, %v3215_v45 }
  0xe9   : > { %2327 = vmatpush.bf16.msra.mxu3 %v3010_v12  ;;  %v1901_v12 = vpop.f32.mrf.mxu0  ;;  %v5464_v24 = vadd.f32 %v1956_v62, %v1938_v11  ;;  %v3799_v62 = vld [vmem:[%s5679_s1 + $0x58c] sm:$0xf]  ;;  %v3407_v11 = vld [vmem:[%s5679_s1 + $0x678] sm:$0xf0] }
  0xea   : > { %2309 = vmatpush.bf16.msra.mxu2 %v2866_v27  ;;  %v1902_v20 = vadd.f32 %v1901_v12, %v5278_v63  ;;  %v3458_v63 = vor.u32 %v3839_v7, %v3455_v10  ;;  %v3330_v27 = vor.u32 %v3807_v19, %v3327_v21  ;;  %v3551_v7 = vld [vmem:[%s5679_s1 + $0x798] sm:$0xf0]  ;;  %v3827_v10 = vld [vmem:[%s5679_s1 + $0x66c] sm:$0xf] }
  0xeb   : > { %2290 = vmatpush.bf16.msra.mxu1 %v2738_v32  ;;  %v3183_v32 = vld [vmem:[%s5679_s1 + $0x4b8] sm:$0xf0]  ;;  %v3859_v19 = vld [vmem:[%s5679_s1 + $0x76c] sm:$0xf] }
  0xec   : > { %2271 = vmatpush.bf16.msra.mxu0 %v2610_v28  ;;  %v1921_v25 = vadd.f32 %v1920_v15, %v1902_v20  ;;  %v3586_v28 = vor.u32 %v3871_v22, %v3583_v23  ;;  %v1939_v35 = vpop.f32.mrf.mxu2  ;;  %v3535_v20 = vld [vmem:[%s5679_s1 + $0x778] sm:$0xf0] }
  0xed   : > { %2328 = vmatpush.bf16.msra.mxu3 %v2994_v34  ;;  %v3803_v34 = vld [vmem:[%s5679_s1 + $0x5ac] sm:$0xf] }
  0xee   : > { %2310 = vmatpush.bf16.msra.mxu2 %v2850_v49  ;;  %v1940_v40 = vadd.f32 %v1939_v35, %v1921_v25  ;;  %v3186_v49 = vor.u32 %v3771_v31, %v3183_v32  ;;  %v3314_v58 = vor.u32 %v3803_v34, %v3311_v37  ;;  %v3538_v31 = vor.u32 %v3859_v19, %v3535_v20  ;;  %v3759_v32 = vld [vmem:[%s5679_s1 + $0x44c] sm:$0xf]  ;;  %v3135_v34 = vld [vmem:[%s5679_s1 + $0x458] sm:$0xf0] }
  0xef   : > { %2291 = vmatpush.bf16.msra.mxu1 %v2722_v59  ;;  %v1958_v36 = vpop.f32.mrf.mxu3  ;;  %v1989_v43 = vpop.f32.mrf.mxu1  ;;  %v3570_v59 = vor.u32 %v3867_v38, %v3567_v39  ;;  %v3791_v35 = vld [vmem:[%s5679_s1 + $0x54c] sm:$0xf]  ;;  %v3519_v38 = vld [vmem:[%s5679_s1 + $0x758] sm:$0xf0] }
  0xf0   : > { %2272 = vmatpush.bf16.msra.mxu0 %v2594_v52  ;;  %v3831_v52 = vld [vmem:[%s5679_s1 + $0x68c] sm:$0xf]  ;;  %v5496_v55 = vadd.f32 %v1958_v36, %v1940_v40  ;;  %v3263_v36 = vld [vmem:[%s5679_s1 + $0x558] sm:$0xf0]  ;;  %v3138_v40 = vor.u32 %v3759_v32, %v3135_v34 }
  0xf1   : > { %2329 = vmatpush.bf16.msra.mxu3 %v2978_v60  ;;  %v1970_v42 = vpop.f32.mrf.mxu0  ;;  %v3767_v60 = vld [vmem:[%s5679_s1 + $0x48c] sm:$0xf]  ;;  %2311 = vmatmul.bf16.vlgmr.msra.gmra.mxu2 %v4178_v54  ;;  %v3487_v20 = vld [vmem:[%s5679_s1 + $0x718] sm:$0xf0] }
  0xf2   : > { %2379 = vmatpush.bf16.msrb.mxu2 %v3474_v2  ;;  %v1990_v45 = vadd.f32 %v1989_v43, %v1970_v42  ;;  %2292 = vmatmul.bf16.vlgmr.msra.gmra.mxu1 %v4176_v53  ;;  %v3295_v2 = vld [vmem:[%s5679_s1 + $0x598] sm:$0xf0]  ;;  %v3170_v53 = vor.u32 %v3767_v60, %v3167_v61  ;;  %v3763_v54 = vld [vmem:[%s5679_s1 + $0x46c] sm:$0xf] }
  0xf3   : > { %2360 = vmatpush.bf16.msrb.mxu1 %v3346_v16  ;;  %2273 = vmatmul.bf16.vlgmr.msra.gmra.mxu0 %v4169_v48  ;;  %v3426_v48 = vor.u32 %v3831_v52, %v3423_v41  ;;  %v3298_v12 = vor.u32 %v3799_v62, %v3295_v2  ;;  %v3795_v16 = vld [vmem:[%s5679_s1 + $0x56c] sm:$0xf]  ;;  %v3375_v43 = vld [vmem:[%s5679_s1 + $0x638] sm:$0xf0] }
  0xf4   : > { %2341 = vmatpush.bf16.msrb.mxu0 %v3218_v4  ;;  %v3863_v4 = vld [vmem:[%s5679_s1 + $0x78c] sm:$0xf]  ;;  %2330 = vmatmul.bf16.vlgmr.msra.gmra.mxu3 %v4186_v57  ;;  %v3151_v57 = vld [vmem:[%s5679_s1 + $0x478] sm:$0xf0]  ;;  %v3282_v30 = vor.u32 %v3795_v16, %v3279_v18 }
  0xf5   : > { %2398 = vmatpush.bf16.msrb.mxu3 %v3602_v3  ;;  %v3554_v15 = vor.u32 %v3863_v4, %v3551_v7  ;;  %v2008_v3 = vpop.f32.mrf.mxu2  ;;  %v3855_v37 = vld [vmem:[%s5679_s1 + $0x74c] sm:$0xf]  ;;  %v3119_v52 = vld [vmem:[%s5679_s1 + $0x438] sm:$0xf0] }
  0xf6   : > { %2380 = vmatpush.bf16.msrb.mxu2 %v3458_v63  ;;  %v2009_v21 = vadd.f32 %v2008_v3, %v1990_v45  ;;  %v3410_v63 = vor.u32 %v3827_v10, %v3407_v11  ;;  %v3819_v42 = vld [vmem:[%s5679_s1 + $0x62c] sm:$0xf]  ;;  %v3266_v45 = vor.u32 %v3791_v35, %v3263_v36  ;;  %v3247_v60 = vld [vmem:[%s5679_s1 + $0x538] sm:$0xf0] }
  0xf7   : > { %2361 = vmatpush.bf16.msrb.mxu1 %v3330_v27  ;;  %v2027_v17 = vpop.f32.mrf.mxu3  ;;  %v1991_v23 = vpop.f32.mrf.mxu1  ;;  %v3823_v27 = vld [vmem:[%s5679_s1 + $0x64c] sm:$0xf]  ;;  %v3503_v62 = vld [vmem:[%s5679_s1 + $0x738] sm:$0xf0] }
  0xf8   : > { %2342 = vmatpush.bf16.msrb.mxu0 %v3202_v26  ;;  %v3154_v26 = vor.u32 %v3763_v54, %v3151_v57  ;;  %v5550_v29 = vadd.f32 %v2027_v17, %v2009_v21  ;;  %v3787_v41 = vld [vmem:[%s5679_s1 + $0x52c] sm:$0xf]  ;;  %v3103_v3 = vld [vmem:[%s5679_s1 + $0x418] sm:$0xf0] }
  0xf9   : > { %2399 = vmatpush.bf16.msrb.mxu3 %v3586_v28  ;;  %v1972_v22 = vpop.f32.mrf.mxu0  ;;  %v3391_v28 = vld [vmem:[%s5679_s1 + $0x658] sm:$0xf0]  ;;  %v3851_v61 = vld [vmem:[%s5679_s1 + $0x72c] sm:$0xf]  ;;  %v3250_v54 = vor.u32 %v3787_v41, %v3247_v60 }
  0xfa   : > { %2381 = vmatpush.bf16.msrb.mxu2 %v3442_v46  ;;  %v1992_v25 = vadd.f32 %v1991_v23, %v1972_v22  ;;  %v3394_v39 = vor.u32 %v3823_v27, %v3391_v28  ;;  %v3522_v46 = vor.u32 %v3855_v37, %v3519_v38  ;;  %v3815_v11 = vld [vmem:[%s5679_s1 + $0x60c] sm:$0xf]  ;;  %v3506_v57 = vor.u32 %v3851_v61, %v3503_v62  ;;  %v3231_v18 = vld [vmem:[%s5679_s1 + $0x518] sm:$0xf0] }
  0xfb   : > { %2362 = vmatpush.bf16.msrb.mxu1 %v3314_v58  ;;  %v3751_v16 = vld [vmem:[%s5679_s1 + $0x40c] sm:$0xf] }
  0xfc   : > { %2343 = vmatpush.bf16.msrb.mxu0 %v3186_v49  ;;  %v3755_v49 = vld [vmem:[%s5679_s1 + $0x42c] sm:$0xf] }
  0xfd   : > { %2400 = vmatpush.bf16.msrb.mxu3 %v3570_v59  ;;  %v2010_v58 = vpop.f32.mrf.mxu2  ;;  %v3122_v10 = vor.u32 %v3755_v49, %v3119_v52  ;;  %v3783_v17 = vld [vmem:[%s5679_s1 + $0x50c] sm:$0xf] }
  0xfe   : > { %2382 = vmatpush.bf16.msrb.mxu2 %v3426_v48  ;;  %v2011_v2 = vadd.f32 %v2010_v58, %v1992_v25  ;;  %v3847_v19 = vld [vmem:[%s5679_s1 + $0x70c] sm:$0xf]  ;;  %v3234_v21 = vor.u32 %v3783_v17, %v3231_v18 }
  0xff   : > { %2363 = vmatpush.bf16.msrb.mxu1 %v3298_v12  ;;  %v2029_v59 = vpop.f32.mrf.mxu3  ;;  %v1994_v7 = vpop.f32.mrf.mxu1  ;;  %v3359_v12 = vld [vmem:[%s5679_s1 + $0x618] sm:$0xf0]  ;;  %v3490_v22 = vor.u32 %v3847_v19, %v3487_v20 }
 0x100   : > { %2344 = vmatpush.bf16.msrb.mxu0 %v3170_v53  ;;  %v3378_v53 = vor.u32 %v3819_v42, %v3375_v43 }
 0x101   : > { %2401 = vmatpush.bf16.msrb.mxu3 %v3554_v15  ;;  %v1975_v4 = vpop.f32.mrf.mxu0  ;;  %v2030_v15 = vadd.f32 %v2029_v59, %v2011_v2  ;;  %2316 = vmatmul.bf16.gmra.mxu2 %v4294_v51 }
 0x102   : > { %2383 = vmatpush.bf16.msrb.mxu2 %v3410_v63  ;;  %v1995_v48 = vadd.f32 %v1994_v7, %v1975_v4  ;;  %2297 = vmatmul.bf16.gmra.mxu1 %v4292_v50  ;;  %v3106_v50 = vor.u32 %v3751_v16, %v3103_v3 }
 0x103   : > { %2364 = vmatpush.bf16.msrb.mxu1 %v3282_v30  ;;  %2278 = vmatmul.bf16.gmra.mxu0 %v4281_v44  ;;  %v3362_v44 = vor.u32 %v3815_v11, %v3359_v12 }
 0x104   : > { %2345 = vmatpush.bf16.msrb.mxu0 %v3154_v26  ;;  %2335 = vmatmul.bf16.gmra.mxu3 %v4302_v56 }
 0x105   : > { %2402 = vmatpush.bf16.msrb.mxu3 %v3538_v31  ;;  %v2013_v23 = vpop.f32.mrf.mxu2 }
 0x106   : > { %2384 = vmatpush.bf16.msrb.mxu2 %v3394_v39  ;;  %v2014_v63 = vadd.f32 %v2013_v23, %v1995_v48 }
 0x107   : > { %2365 = vmatpush.bf16.msrb.mxu1 %v3266_v45  ;;  %v2032_v25 = vpop.f32.mrf.mxu3  ;;  %v1996_v27 = vpop.f32.mrf.mxu1 }
 0x108   : > { %2346 = vmatpush.bf16.msrb.mxu0 %v3138_v40  ;;  %v2033_v30 = vadd.f32 %v2032_v25, %v2014_v63 }
 0x109   : > { %2403 = vmatpush.bf16.msrb.mxu3 %v3522_v46  ;;  %v1977_v26 = vpop.f32.mrf.mxu0 }
 0x10a   : > { %2385 = vmatpush.bf16.msrb.mxu2 %v3378_v53  ;;  %v1997_v28 = vadd.f32 %v1996_v27, %v1977_v26 }
 0x10b   : > { %2366 = vmatpush.bf16.msrb.mxu1 %v3250_v54 }
 0x10c   : > { %2347 = vmatpush.bf16.msrb.mxu0 %v3122_v10 }
 0x10d   : > { %2404 = vmatpush.bf16.msrb.mxu3 %v3506_v57  ;;  %v2015_v51 = vpop.f32.mrf.mxu2 }
 0x10e   : > { %2386 = vmatpush.bf16.msrb.mxu2 %v3362_v44  ;;  %v2016_v31 = vadd.f32 %v2015_v51, %v1997_v28 }
 0x10f   : > { %2367 = vmatpush.bf16.msrb.mxu1 %v3234_v21  ;;  %v2034_v56 = vpop.f32.mrf.mxu3  ;;  %v2065_v34 = vpop.f32.mrf.mxu1 }
 0x110   : > { %2348 = vmatpush.bf16.msrb.mxu0 %v3106_v50  ;;  %v2035_v36 = vadd.f32 %v2034_v56, %v2016_v31 }
 0x111   : > { %2405 = vmatpush.bf16.msrb.mxu3 %v3490_v22  ;;  %v2046_v32 = vpop.f32.mrf.mxu0  ;;  %2387 = vmatmul.bf16.vlgmr.msrb.gmra.mxu2 %v4434_v5 }
 0x112   : > { %v2047_v35 = vadd.f32 %v2046_v32, %v5550_v29  ;;  %2368 = vmatmul.bf16.vlgmr.msrb.gmra.mxu1 %v4423_v1 }
 0x113   : > { %2349 = vmatmul.bf16.vlgmr.msrb.gmra.mxu0 %v4421_v0 }
 0x114   : > { %v2066_v37 = vadd.f32 %v2065_v34, %v2047_v35  ;;  %2406 = vmatmul.bf16.vlgmr.msrb.gmra.mxu3 %v4436_v6 }
 0x115   : > { %v2084_v38 = vpop.f32.mrf.mxu2 }
 0x116   : > { %v2085_v40 = vadd.f32 %v2084_v38, %v2066_v37 }
 0x117   : > { %v2103_v39 = vpop.f32.mrf.mxu3  ;;  %v2067_v43 = vpop.f32.mrf.mxu1 }
 0x118   : > { %v5627_v46 = vadd.f32 %v2103_v39, %v2085_v40 }
 0x119   : > { %v2048_v42 = vpop.f32.mrf.mxu0 }
 0x11a   : > { %v2049_v45 = vadd.f32 %v2048_v42, %v2030_v15  ;;  %v2417_v29 = vmax.f32 %v5340_v47, %v5627_v46 }
 0x11c   : > { %v2068_v49 = vadd.f32 %v2067_v43, %v2049_v45 }
 0x11d   : > { %v2086_v52 = vpop.f32.mrf.mxu2 }
 0x11e   : > { %v2087_v41 = vadd.f32 %v2086_v52, %v2068_v49 }
 0x11f   : > { %v2105_v0 = vpop.f32.mrf.mxu3  ;;  %v2070_v58 = vpop.f32.mrf.mxu1 }
 0x120   : > { %v5631_v59 = vadd.f32 %v2105_v0, %v2087_v41 }
 0x121   : > { %v2051_v1 = vpop.f32.mrf.mxu0  ;;  %2392 = vmatmul.bf16.gmra.mxu2 %v4550_v13 }
 0x122   : > { %v2052_v5 = vadd.f32 %v2051_v1, %v2033_v30  ;;  %2373 = vmatmul.bf16.gmra.mxu1 %v4539_v9  ;;  %v2418_v60 = vmax.f32 %v5397_v33, %v5631_v59 }
 0x123   : > { %2354 = vmatmul.bf16.gmra.mxu0 %v4537_v8 }
 0x124   : > { %v2071_v6 = vadd.f32 %v2070_v58, %v2052_v5  ;;  %2411 = vmatmul.bf16.gmra.mxu3 %v4552_v14 }
 0x125   : > { %v2089_v61 = vpop.f32.mrf.mxu2 }
 0x126   : > { %v2090_v2 = vadd.f32 %v2089_v61, %v2071_v6 }
 0x127   : > { %v2108_v62 = vpop.f32.mrf.mxu3  ;;  %v2072_v7 = vpop.f32.mrf.mxu1 }
 0x128   : > { %v5639_v53 = vadd.f32 %v2108_v62, %v2090_v2 }
 0x129   : > { %v2053_v4 = vpop.f32.mrf.mxu0 }
 0x12a   : > { %v2054_v48 = vadd.f32 %v2053_v4, %v2035_v36  ;;  %v2419_v8 = vmax.f32 %v5464_v24, %v5639_v53 }
 0x12c   : > { %v2073_v10 = vadd.f32 %v2072_v7, %v2054_v48 }
 0x12d   : > { %v2091_v9 = vpop.f32.mrf.mxu2 }
 0x12e   : > { %v2092_v12 = vadd.f32 %v2091_v9, %v2073_v10 }
 0x12f   : > { %v2110_v11 = vpop.f32.mrf.mxu3  ;;  %v2141_v54 = vpop.f32.mrf.mxu1 }
 0x130   : > { %v5643_v57 = vadd.f32 %v2110_v11, %v2092_v12 }
 0x131   : > { %v2122_v15 = vpop.f32.mrf.mxu0 }
 0x132   : > { %v2142_v13 = vadd.f32 %v2141_v54, %v2122_v15  ;;  %v2420_v14 = vmax.f32 %v5496_v55, %v5643_v57 }
 0x135   : > { %v2160_v16 = vpop.f32.mrf.mxu2 }
 0x136   : > { %v2161_v17 = vadd.f32 %v2160_v16, %v2142_v13 }
 0x137   : > { %v2179_v3 = vpop.f32.mrf.mxu3  ;;  %v2143_v19 = vpop.f32.mrf.mxu1 }
 0x138   : > { %v2180_v44 = vadd.f32 %v2179_v3, %v2161_v17 }
 0x139   : > { %v2124_v18 = vpop.f32.mrf.mxu0 }
 0x13a   : > { %v2144_v20 = vadd.f32 %v2143_v19, %v2124_v18 }
 0x13d   : > { %v2162_v50 = vpop.f32.mrf.mxu2 }
 0x13e   : > { %v2163_v22 = vadd.f32 %v2162_v50, %v2144_v20 }
 0x13f   : > { %v2181_v21 = vpop.f32.mrf.mxu3  ;;  %v2146_v25 = vpop.f32.mrf.mxu1 }
 0x140   : > { %v2182_v26 = vadd.f32 %v2181_v21, %v2163_v22 }
 0x141   : > { %v2127_v23 = vpop.f32.mrf.mxu0 }
 0x142   : > { %v2147_v63 = vadd.f32 %v2146_v25, %v2127_v23 }
 0x145   : > { %v2165_v27 = vpop.f32.mrf.mxu2 }
 0x146   : > { %v2166_v30 = vadd.f32 %v2165_v27, %v2147_v63 }
 0x147   : > { %v2184_v28 = vpop.f32.mrf.mxu3  ;;  %v2148_v56 = vpop.f32.mrf.mxu1 }
 0x148   : > { %v2185_v32 = vadd.f32 %v2184_v28, %v2166_v30 }
 0x149   : > { %v2129_v51 = vpop.f32.mrf.mxu0 }
 0x14a   : > { %v2149_v31 = vadd.f32 %v2148_v56, %v2129_v51 }
 0x14d   : > { %v2167_v34 = vpop.f32.mrf.mxu2 }
 0x14e   : > { %v2168_v36 = vadd.f32 %v2167_v34, %v2149_v31 }
 0x14f   : > { %v2186_v35 = vpop.f32.mrf.mxu3  ;;  %v2217_v38 = vpop.f32.mrf.mxu1 }
 0x150   : > { %v2187_v40 = vadd.f32 %v2186_v35, %v2168_v36 }
 0x151   : > { %v2198_v37 = vpop.f32.mrf.mxu0 }
 0x152   : > { %v2199_v39 = vadd.f32 %v2198_v37, %v2180_v44 }
 0x154   : > { %v2218_v42 = vadd.f32 %v2217_v38, %v2199_v39 }
 0x155   : > { %v2236_v43 = vpop.f32.mrf.mxu2 }
 0x156   : > { %v2237_v49 = vadd.f32 %v2236_v43, %v2218_v42 }
 0x157   : > { %v2255_v45 = vpop.f32.mrf.mxu3  ;;  %v2219_v0 = vpop.f32.mrf.mxu1 }
 0x158   : > { %v2256_v1 = vadd.f32 %v2255_v45, %v2237_v49 }
 0x159   : > { %v2200_v52 = vpop.f32.mrf.mxu0 }
 0x15a   : > { %v2201_v41 = vadd.f32 %v2200_v52, %v2182_v26 }
 0x15c   : > { %v2220_v58 = vadd.f32 %v2219_v0, %v2201_v41 }
 0x15d   : > { %v2238_v5 = vpop.f32.mrf.mxu2 }
 0x15e   : > { %v2239_v61 = vadd.f32 %v2238_v5, %v2220_v58 }
 0x15f   : > { %v2257_v6 = vpop.f32.mrf.mxu3  ;;  %v2222_v2 = vpop.f32.mrf.mxu1 }
 0x160   : > { %v5647_v7 = vadd.f32 %v2257_v6, %v2239_v61 }
 0x161   : > { %v2203_v62 = vpop.f32.mrf.mxu0 }
 0x162   : > { %v2204_v4 = vadd.f32 %v2203_v62, %v2185_v32 }
 0x164   : > { %v2223_v48 = vadd.f32 %v2222_v2, %v2204_v4 }
 0x165   : > { %v2241_v10 = vpop.f32.mrf.mxu2 }
 0x166   : > { %v2242_v11 = vadd.f32 %v2241_v10, %v2223_v48 }
 0x167   : > { %v2260_v9 = vpop.f32.mrf.mxu3  ;;  %v2224_v15 = vpop.f32.mrf.mxu1 }
 0x168   : > { %v5649_v13 = vadd.f32 %v2260_v9, %v2242_v11 }
 0x169   : > { %v2205_v12 = vpop.f32.mrf.mxu0 }
 0x16a   : > { %v2206_v54 = vadd.f32 %v2205_v12, %v2187_v40 }
 0x16c   : > { %v2225_v16 = vadd.f32 %v2224_v15, %v2206_v54 }
 0x16d   : > { %v2243_v3 = vpop.f32.mrf.mxu2 }
 0x16e   : > { %v2244_v18 = vadd.f32 %v2243_v3, %v2225_v16  ;;  %v3897_v16 = vld [vmem:[%s5680_s2] ss:$0 sm:$0xff] }
 0x16f   : > { %v2262_v17 = vpop.f32.mrf.mxu3  ;;  %v2293_v20 = vpop.f32.mrf.mxu1 }
 0x170   : > { %v5651_v44 = vadd.f32 %v2262_v17, %v2244_v18 }
 0x171   : > { %v2274_v19 = vpop.f32.mrf.mxu0 }
 0x172   : > { %v2294_v31 = vadd.f32 %v2293_v20, %v2274_v19 }
 0x175   : > { %v2312_v50 = vpop.f32.mrf.mxu2 }
 0x176   : > { %v2313_v32 = vadd.f32 %v2312_v50, %v2294_v31 }
 0x177   : > { %v2331_v21 = vpop.f32.mrf.mxu3  ;;  %v2295_v23 = vpop.f32.mrf.mxu1 }
 0x178   : > { %v2332_v36 = vadd.f32 %v2331_v21, %v2313_v32 }
 0x179   : > { %v2276_v22 = vpop.f32.mrf.mxu0 }
 0x17a   : > { %v2296_v39 = vadd.f32 %v2295_v23, %v2276_v22 }
 0x17d   : > { %v2314_v25 = vpop.f32.mrf.mxu2 }
 0x17e   : > { %v2315_v42 = vadd.f32 %v2314_v25, %v2296_v39 }
 0x17f   : > { %v2333_v63 = vpop.f32.mrf.mxu3  ;;  %v2298_v27 = vpop.f32.mrf.mxu1 }
 0x180   : > { %v2334_v52 = vadd.f32 %v2333_v63, %v2315_v42 }
 0x181   : > { %v2279_v26 = vpop.f32.mrf.mxu0 }
 0x182   : > { %v2299_v5 = vadd.f32 %v2298_v27, %v2279_v26 }
 0x185   : > { %v2317_v28 = vpop.f32.mrf.mxu2 }
 0x186   : > { %v2318_v62 = vadd.f32 %v2317_v28, %v2299_v5 }
 0x187   : > { %v2336_v30 = vpop.f32.mrf.mxu3  ;;  %v2300_v56 = vpop.f32.mrf.mxu1 }
 0x188   : > { %v2337_v11 = vadd.f32 %v2336_v30, %v2318_v62 }
 0x189   : > { %v2281_v51 = vpop.f32.mrf.mxu0 }
 0x18a   : > { %v2301_v54 = vadd.f32 %v2300_v56, %v2281_v51 }
 0x18d   : > { %v2319_v34 = vpop.f32.mrf.mxu2 }
 0x18f   : > { %v2338_v35 = vpop.f32.mrf.mxu3  ;;  %v2369_v38 = vpop.f32.mrf.mxu1 }
 0x191   : > { %v2350_v37 = vpop.f32.mrf.mxu0 }
 0x192   : > { %v2351_v40 = vadd.f32 %v2350_v37, %v2332_v36 }
 0x194   : > { %v2370_v43 = vadd.f32 %v2369_v38, %v2351_v40 }
 0x195   : > { %v2388_v45 = vpop.f32.mrf.mxu2 }
 0x196   : > { %v2389_v0 = vadd.f32 %v2388_v45, %v2370_v43 }
 0x197   : > { %v2407_v49 = vpop.f32.mrf.mxu3  ;;  %v2371_v58 = vpop.f32.mrf.mxu1 }
 0x198   : > { %v2408_v6 = vadd.f32 %v2407_v49, %v2389_v0 }
 0x199   : > { %v2352_v41 = vpop.f32.mrf.mxu0 }
 0x19a   : > { %v2353_v61 = vadd.f32 %v2352_v41, %v2334_v52  ;;  %v2421_v2 = vmax.f32 %v2256_v1, %v2408_v6  ;;  %v2320_v1 = vadd.f32 %v2319_v34, %v2301_v54 }
 0x19c   : > { %v2425_v4 = vmax.f32 %v2417_v29, %v2421_v2  ;;  %v2372_v48 = vadd.f32 %v2371_v58, %v2353_v61  ;;  %v2339_v21 = vadd.f32 %v2338_v35, %v2320_v1 }
 0x19d   : > { %v2390_v10 = vpop.f32.mrf.mxu2 }
 0x19e   : > { %v2391_v12 = vadd.f32 %v2390_v10, %v2372_v48  ;;  %v2433_v47 = vadd.f32 %v3897_v16, %v2425_v4 }
 0x19f   : > { %v2409_v9 = vpop.f32.mrf.mxu3  ;;  %v2374_v18 = vpop.f32.mrf.mxu1 }
 0x1a0   : > { %v2410_v3 = vadd.f32 %v2409_v9, %v2391_v12  ;;  %v2437_v63 = vmax.f32 %v2433_v47, 0.0 }
 0x1a1   : > { %v2355_v15 = vpop.f32.mrf.mxu0 }
 0x1a2   : > { %v2356_v17 = vadd.f32 %v2355_v15, %v2337_v11  ;;  %v2422_v19 = vmax.f32 %v5647_v7, %v2410_v3 }
 0x1a4   : > { %v2426_v46 = vmax.f32 %v2418_v60, %v2422_v19  ;;  %v2375_v29 = vadd.f32 %v2374_v18, %v2356_v17 }
 0x1a5   : > { %v2393_v20 = vpop.f32.mrf.mxu2 }
 0x1a6   : > { %v2434_v22 = vadd.f32 %v3897_v16, %v2426_v46  ;;  %v2394_v23 = vadd.f32 %v2393_v20, %v2375_v29 }
 0x1a7   : > { %v2412_v50 = vpop.f32.mrf.mxu3  ;;  %v2376_v59 = vpop.f32.mrf.mxu1 }
 0x1a8   : > { %v2438_v26 = vmax.f32 %v2434_v22, 0.0  ;;  %v2413_v27 = vadd.f32 %v2412_v50, %v2394_v23 }
 0x1a9   : > { %v2357_v25 = vpop.f32.mrf.mxu0 }
 0x1aa   : > { %v2358_v28 = vadd.f32 %v2357_v25, %v2339_v21  ;;  %v3881_v7 = vpack.c.bf16 %v2438_v26, %v2437_v63  ;;  %v2423_v33 = vmax.f32 %v5649_v13, %v2413_v27 }
 0x1ac   : > { %3882 = vst [vmem:[%s175_s13] sm:$0xff] %v3881_v7   ;;  %v2427_v60 = vmax.f32 %v2419_v8, %v2423_v33  ;;  %v2377_v30 = vadd.f32 %v2376_v59, %v2358_v28 }
 0x1ad   : > { %v2395_v51 = vpop.f32.mrf.mxu2 }
 0x1ae   : > { %v2396_v56 = vadd.f32 %v2395_v51, %v2377_v30  ;;  %v2435_v35 = vadd.f32 %v3897_v16, %v2427_v60 }
 0x1af   : > { %v2414_v31 = vpop.f32.mrf.mxu3 }
 0x1b0   : > { %v2415_v32 = vadd.f32 %v2414_v31, %v2396_v56  ;;  %v2439_v13 = vmax.f32 %v2435_v35, 0.0 }
 0x1b2   : > { %v2424_v34 = vmax.f32 %v5651_v44, %v2415_v32 }
 0x1b4   : > { %v2428_v36 = vmax.f32 %v2420_v14, %v2424_v34 }
 0x1b6   : > { %v2436_v37 = vadd.f32 %v3897_v16, %v2428_v36 }
 0x1b8   : > { %v2440_v38 = vmax.f32 %v2436_v37, 0.0 }
 0x1ba   : > { %v3886_v39 = vpack.c.bf16 %v2440_v38, %v2439_v13 }
 0x1bc   : > { %3888 = vst [vmem:[%s175_s13 + $0x8] sm:$0xff] %v3886_v39  }
 0x1bd PF: > { %s13_s12 = sadd.s32 1, %s3904_s12  }
 0x1be   : > { %p10_p4 = scmp.ge.s32.totalorder %s13_s12, 4  }
 0x1c0   :  { %12 = sbr.rel (!%p10_p4) target bundleno = 1 (0x1), region = 62 }

// kernel: simple_cnn_forward.5
= control target key start
LH: loop header
LB: loop body
LE: loop exit
PB: predicated region body
PF: predicated region fallthrough
CT: control target
= control target key end

     0   :  { %vm1744_vm0 = vcmask 523264   ;;  %s4169_s1 = inlined_call_operand.vmem [shape: bf16[3136,128], index: 1, kind: input, shape index: {}]   ;;  %s4170_s0 = inlined_call_operand.vmem [shape: bf16[16,3136], index: 0, kind: input, shape index: {}]   ;;  %s4171_s2 = inlined_call_operand.vmem [shape: f32[1,128], index: 2, kind: input, shape index: {}]   ;;  %s4172_s4 = inlined_call_operand.vmem [shape: f32[1,128], index: 4, kind: input, shape index: {}]   ;;  %s4173_s3 = inlined_call_operand.vmem [shape: bf16[128,128], index: 3, kind: input, shape index: {}]   ;;  %s4174_s5 = inlined_call_operand.vmem [shape: f32[16,128], index: 5, kind: output, shape index: {}]  }
   0x1   :  { %v3158_v0 = vld [vmem:[%s4169_s1 + $0x38] sm:$0xff]  ;;  %v3157_v4 = vld [vmem:[%s4169_s1 + $0x30] sm:$0xff]  ;;  %v3156_v8 = vld [vmem:[%s4169_s1 + $0x28] sm:$0xff] }
   0x2   :  { %v3174_v1 = vld [vmem:[%s4169_s1 + $0xb8] sm:$0xff]  ;;  %1748 = vmatpush.bf16.msra.mxu0 %v3158_v0  ;;  %v3173_v5 = vld [vmem:[%s4169_s1 + $0xb0] sm:$0xff]  ;;  %v3172_v9 = vld [vmem:[%s4169_s1 + $0xa8] sm:$0xff] }
   0x3   :  { %v3182_v2 = vld [vmem:[%s4169_s1 + $0xf8] sm:$0xff]  ;;  %1776 = vmatpush.bf16.msra.mxu2 %v3174_v1  ;;  %v3181_v6 = vld [vmem:[%s4169_s1 + $0xf0] sm:$0xff]  ;;  %v3180_v10 = vld [vmem:[%s4169_s1 + $0xe8] sm:$0xff] }
   0x4   :  { %v3166_v3 = vld [vmem:[%s4169_s1 + $0x78] sm:$0xff]  ;;  %1790 = vmatpush.bf16.msra.mxu3 %v3182_v2  ;;  %v3165_v7 = vld [vmem:[%s4169_s1 + $0x70] sm:$0xff]  ;;  %v3164_v11 = vld [vmem:[%s4169_s1 + $0x68] sm:$0xff] }
   0x5   :  { %1762 = vmatpush.bf16.msra.mxu1 %v3166_v3  ;;  %v3155_v12 = vld [vmem:[%s4169_s1 + $0x20] sm:$0xff]  ;;  %v3154_v16 = vld [vmem:[%s4169_s1 + $0x18] sm:$0xff]  ;;  %v3153_v20 = vld [vmem:[%s4169_s1 + $0x10] sm:$0xff] }
   0x6   :  { %1749 = vmatpush.bf16.msra.mxu0 %v3157_v4  ;;  %v3171_v13 = vld [vmem:[%s4169_s1 + $0xa0] sm:$0xff]  ;;  %v3170_v17 = vld [vmem:[%s4169_s1 + $0x98] sm:$0xff]  ;;  %v3169_v21 = vld [vmem:[%s4169_s1 + $0x90] sm:$0xff] }
   0x7   :  { %1777 = vmatpush.bf16.msra.mxu2 %v3173_v5  ;;  %v3179_v14 = vld [vmem:[%s4169_s1 + $0xe0] sm:$0xff]  ;;  %v3178_v18 = vld [vmem:[%s4169_s1 + $0xd8] sm:$0xff]  ;;  %v3177_v22 = vld [vmem:[%s4169_s1 + $0xd0] sm:$0xff] }
   0x8   :  { %1791 = vmatpush.bf16.msra.mxu3 %v3181_v6  ;;  %v3163_v15 = vld [vmem:[%s4169_s1 + $0x60] sm:$0xff]  ;;  %v3162_v19 = vld [vmem:[%s4169_s1 + $0x58] sm:$0xff]  ;;  %v3161_v23 = vld [vmem:[%s4169_s1 + $0x50] sm:$0xff] }
   0x9   :  { %1763 = vmatpush.bf16.msra.mxu1 %v3165_v7  ;;  %v3152_v24 = vld [vmem:[%s4169_s1 + $0x8] sm:$0xff]  ;;  %v3151_v28 = vld [vmem:[%s4169_s1] sm:$0xff]  ;;  %v3190_v31 = vld [vmem:[%s4169_s1 + $0x138] sm:$0xff] }
   0xa   :  { %1750 = vmatpush.bf16.msra.mxu0 %v3156_v8  ;;  %v3168_v25 = vld [vmem:[%s4169_s1 + $0x88] sm:$0xff]  ;;  %v3167_v29 = vld [vmem:[%s4169_s1 + $0x80] sm:$0xff]  ;;  %v3206_v34 = vld [vmem:[%s4169_s1 + $0x1b8] sm:$0xff] }
   0xb   :  { %1778 = vmatpush.bf16.msra.mxu2 %v3172_v9  ;;  %v3176_v26 = vld [vmem:[%s4169_s1 + $0xc8] sm:$0xff]  ;;  %v3175_v30 = vld [vmem:[%s4169_s1 + $0xc0] sm:$0xff]  ;;  %v3214_v37 = vld [vmem:[%s4169_s1 + $0x1f8] sm:$0xff] }
   0xc   :  { %1792 = vmatpush.bf16.msra.mxu3 %v3180_v10  ;;  %v3160_v27 = vld [vmem:[%s4169_s1 + $0x48] sm:$0xff]  ;;  %v2211_v32 = vld [vmem:[%s4170_s0] sm:$0xf]  ;;  %v3138_v33 = vld [vmem:[%s4170_s0 + $0x60] sm:$0xf0] }
   0xd   :  { %1764 = vmatpush.bf16.msra.mxu1 %v3164_v11  ;;  %v2219_v35 = vld [vmem:[%s4170_s0 + $0x8] sm:$0xf]  ;;  %v3139_v36 = vld [vmem:[%s4170_s0 + $0x68] sm:$0xf0]  ;;  %v2221_v39 = vld [vmem:[%s4170_s0 + $0x6c] sm:$0xf0]  ;;  %v2212_v41 = vor.u32 %v3138_v33, %v2211_v32 }
   0xe   :  { %1751 = vmatpush.bf16.msra.mxu0 %v3155_v12  ;;  %v3127_v38 = vld [vmem:[%s4170_s0 + $0xc] sm:$0xf]  ;;  %v3159_v40 = vld [vmem:[%s4169_s1 + $0x40] sm:$0xff]  ;;  %v3198_v42 = vld [vmem:[%s4169_s1 + $0x178] sm:$0xff]  ;;  %v2220_v43 = vor.u32 %v3139_v36, %v2219_v35 }
   0xf   :  { %1779 = vmatpush.bf16.msra.mxu2 %v3171_v13  ;;  %v3126_v44 = vld [vmem:[%s4170_s0 + $0x4] sm:$0xf]  ;;  %v2213_v45 = vld [vmem:[%s4170_s0 + $0x64] sm:$0xf0]  ;;  %v3189_v46 = vld [vmem:[%s4169_s1 + $0x130] sm:$0xff]  ;;  %v2224_v47 = vor.u32 %v3127_v38, %v2221_v39 }
  0x10   :  { %1793 = vmatpush.bf16.msra.mxu3 %v3179_v14  ;;  %v3205_v48 = vld [vmem:[%s4169_s1 + $0x1b0] sm:$0xff]  ;;  %v2216_v50 = vor.u32 %v3126_v44, %v2213_v45  ;;  %v3188_v52 = vld [vmem:[%s4169_s1 + $0x128] sm:$0xff]  ;;  %v3187_v56 = vld [vmem:[%s4169_s1 + $0x120] sm:$0xff] }
  0x11   :  { %1765 = vmatpush.bf16.msra.mxu1 %v3163_v15  ;;  %v3213_v49 = vld [vmem:[%s4169_s1 + $0x1f0] sm:$0xff]  ;;  %v3204_v53 = vld [vmem:[%s4169_s1 + $0x1a8] sm:$0xff]  ;;  %v3203_v57 = vld [vmem:[%s4169_s1 + $0x1a0] sm:$0xff] }
  0x12   :  { %1752 = vmatpush.bf16.msra.mxu0 %v3154_v16  ;;  %v3197_v51 = vld [vmem:[%s4169_s1 + $0x170] sm:$0xff]  ;;  %v3212_v54 = vld [vmem:[%s4169_s1 + $0x1e8] sm:$0xff]  ;;  %v3211_v58 = vld [vmem:[%s4169_s1 + $0x1e0] sm:$0xff] }
  0x13   :  { %1780 = vmatpush.bf16.msra.mxu2 %v3170_v17  ;;  %v3196_v55 = vld [vmem:[%s4169_s1 + $0x168] sm:$0xff]  ;;  %v3195_v59 = vld [vmem:[%s4169_s1 + $0x160] sm:$0xff]  ;;  %v3186_v60 = vld [vmem:[%s4169_s1 + $0x118] sm:$0xff] }
  0x14   :  { %1794 = vmatpush.bf16.msra.mxu3 %v3178_v18  ;;  %v3202_v61 = vld [vmem:[%s4169_s1 + $0x198] sm:$0xff]  ;;  %v3185_v0 = vld [vmem:[%s4169_s1 + $0x110] sm:$0xff]  ;;  %v3184_v4 = vld [vmem:[%s4169_s1 + $0x108] sm:$0xff] }
  0x15   :  { %1766 = vmatpush.bf16.msra.mxu1 %v3162_v19  ;;  %v3210_v62 = vld [vmem:[%s4169_s1 + $0x1d8] sm:$0xff]  ;;  %v3201_v1 = vld [vmem:[%s4169_s1 + $0x190] sm:$0xff]  ;;  %v3200_v5 = vld [vmem:[%s4169_s1 + $0x188] sm:$0xff] }
  0x16   :  { %1753 = vmatpush.bf16.msra.mxu0 %v3153_v20  ;;  %v3194_v63 = vld [vmem:[%s4169_s1 + $0x158] sm:$0xff]  ;;  %v3209_v2 = vld [vmem:[%s4169_s1 + $0x1d0] sm:$0xff]  ;;  %v3208_v6 = vld [vmem:[%s4169_s1 + $0x1c8] sm:$0xff] }
  0x17   :  { %1781 = vmatpush.bf16.msra.mxu2 %v3169_v21  ;;  %v3193_v3 = vld [vmem:[%s4169_s1 + $0x150] sm:$0xff]  ;;  %v3192_v7 = vld [vmem:[%s4169_s1 + $0x148] sm:$0xff]  ;;  %v3183_v8 = vld [vmem:[%s4169_s1 + $0x100] sm:$0xff] }
  0x18   :  { %1795 = vmatpush.bf16.msra.mxu3 %v3177_v22  ;;  %v3199_v9 = vld [vmem:[%s4169_s1 + $0x180] sm:$0xff]  ;;  %v3222_v11 = vld [vmem:[%s4169_s1 + $0x238] sm:$0xff]  ;;  %v2227_v13 = vld [vmem:[%s4170_s0 + $0x10] sm:$0xf] }
  0x19   :  { %1767 = vmatpush.bf16.msra.mxu1 %v3161_v23  ;;  %v3207_v10 = vld [vmem:[%s4169_s1 + $0x1c0] sm:$0xff]  ;;  %v3238_v12 = vld [vmem:[%s4169_s1 + $0x2b8] sm:$0xff]  ;;  %v3140_v14 = vld [vmem:[%s4170_s0 + $0x70] sm:$0xf0] }
  0x1a   :  { %1754 = vmatpush.bf16.msra.mxu0 %v3152_v24  ;;  %v2235_v15 = vld [vmem:[%s4170_s0 + $0x18] sm:$0xf]  ;;  %v3141_v16 = vld [vmem:[%s4170_s0 + $0x78] sm:$0xf0]  ;;  %v2237_v19 = vld [vmem:[%s4170_s0 + $0x7c] sm:$0xf0]  ;;  %v2228_v23 = vor.u32 %v3140_v14, %v2227_v13 }
  0x1b   :  { %1782 = vmatpush.bf16.msra.mxu2 %v3168_v25  ;;  %v3246_v17 = vld [vmem:[%s4169_s1 + $0x2f8] sm:$0xff]  ;;  %v3191_v20 = vld [vmem:[%s4169_s1 + $0x140] sm:$0xff]  ;;  %v3128_v21 = vld [vmem:[%s4170_s0 + $0x14] sm:$0xf]  ;;  %v2236_v24 = vor.u32 %v3141_v16, %v2235_v15 }
  0x1c   :  { %1796 = vmatpush.bf16.msra.mxu3 %v3176_v26  ;;  %v3129_v18 = vld [vmem:[%s4170_s0 + $0x1c] sm:$0xf]  ;;  %v2229_v22 = vld [vmem:[%s4170_s0 + $0x74] sm:$0xf0]  ;;  %v3220_v32 = vld [vmem:[%s4169_s1 + $0x228] sm:$0xff] }
  0x1d   :  { %1768 = vmatpush.bf16.msra.mxu1 %v3160_v27  ;;  %v3230_v25 = vld [vmem:[%s4169_s1 + $0x278] sm:$0xff]  ;;  %v2240_v26 = vor.u32 %v3129_v18, %v2237_v19  ;;  %v2232_v27 = vor.u32 %v3128_v21, %v2229_v22  ;;  %v3236_v33 = vld [vmem:[%s4169_s1 + $0x2a8] sm:$0xff]  ;;  %v3219_v36 = vld [vmem:[%s4169_s1 + $0x220] sm:$0xff] }
  0x1e   :  { %1755 = vmatpush.bf16.msra.mxu0 %v3151_v28  ;;  %v3221_v28 = vld [vmem:[%s4169_s1 + $0x230] sm:$0xff]  ;;  %v3228_v35 = vld [vmem:[%s4169_s1 + $0x268] sm:$0xff]  ;;  %v3243_v38 = vld [vmem:[%s4169_s1 + $0x2e0] sm:$0xff] }
  0x1f   :  { %1783 = vmatpush.bf16.msra.mxu2 %v3167_v29  ;;  %v3237_v29 = vld [vmem:[%s4169_s1 + $0x2b0] sm:$0xff]  ;;  %v3227_v39 = vld [vmem:[%s4169_s1 + $0x260] sm:$0xff]  ;;  %v3268_v13 = vld [vmem:[%s4169_s1 + $0x3a8] sm:$0xff] }
  0x20   :  { %1797 = vmatpush.bf16.msra.mxu3 %v3175_v30  ;;  %v3245_v30 = vld [vmem:[%s4169_s1 + $0x2f0] sm:$0xff]  ;;  %v3276_v14 = vld [vmem:[%s4169_s1 + $0x3e8] sm:$0xff]  ;;  %v3251_v16 = vld [vmem:[%s4169_s1 + $0x320] sm:$0xff] }
  0x21   :  { %1769 = vmatpush.bf16.msra.mxu1 %v3159_v40  ;;  %1756 = vmatmul.bf16.vlgmr.msra.gmra.mxu0 %v2212_v41  ;;  %v3218_v40 = vld [vmem:[%s4169_s1 + $0x218] sm:$0xff]  ;;  %v3217_v44 = vld [vmem:[%s4169_s1 + $0x210] sm:$0xff]  ;;  %v3260_v15 = vld [vmem:[%s4169_s1 + $0x368] sm:$0xff] }
  0x22   :  { %1804 = vmatpush.bf16.msrb.mxu0 %v3190_v31  ;;  %1784 = vmatmul.bf16.vlgmr.msra.gmra.mxu2 %v2220_v43  ;;  %v3229_v31 = vld [vmem:[%s4169_s1 + $0x270] sm:$0xff]  ;;  %v3234_v41 = vld [vmem:[%s4169_s1 + $0x298] sm:$0xff]  ;;  %v3275_v18 = vld [vmem:[%s4169_s1 + $0x3e0] sm:$0xff] }
  0x23   :  { %1832 = vmatpush.bf16.msrb.mxu2 %v3206_v34  ;;  %1798 = vmatmul.bf16.vlgmr.msra.gmra.mxu3 %v2224_v47  ;;  %v3244_v34 = vld [vmem:[%s4169_s1 + $0x2e8] sm:$0xff]  ;;  %v3226_v43 = vld [vmem:[%s4169_s1 + $0x258] sm:$0xff]  ;;  %v3233_v45 = vld [vmem:[%s4169_s1 + $0x290] sm:$0xff] }
  0x24   :  { %1846 = vmatpush.bf16.msrb.mxu3 %v3214_v37  ;;  %1770 = vmatmul.bf16.vlgmr.msra.gmra.mxu1 %v2216_v50  ;;  %v3235_v37 = vld [vmem:[%s4169_s1 + $0x2a0] sm:$0xff]  ;;  %v3225_v47 = vld [vmem:[%s4169_s1 + $0x250] sm:$0xff]  ;;  %v3240_v50 = vld [vmem:[%s4169_s1 + $0x2c8] sm:$0xff] }
  0x25   :  { %1818 = vmatpush.bf16.msrb.mxu1 %v3198_v42  ;;  %v3242_v42 = vld [vmem:[%s4169_s1 + $0x2d8] sm:$0xff]  ;;  %v3259_v19 = vld [vmem:[%s4169_s1 + $0x360] sm:$0xff] }
  0x26   :  { %1805 = vmatpush.bf16.msrb.mxu0 %v3189_v46  ;;  %v3241_v46 = vld [vmem:[%s4169_s1 + $0x2d0] sm:$0xff]  ;;  %v3266_v21 = vld [vmem:[%s4169_s1 + $0x398] sm:$0xff] }
  0x27   :  { %1833 = vmatpush.bf16.msrb.mxu2 %v3205_v48  ;;  %v3216_v48 = vld [vmem:[%s4169_s1 + $0x208] sm:$0xff]  ;;  %v3274_v22 = vld [vmem:[%s4169_s1 + $0x3d8] sm:$0xff] }
  0x28   :  { %1847 = vmatpush.bf16.msrb.mxu3 %v3213_v49  ;;  %v3232_v49 = vld [vmem:[%s4169_s1 + $0x288] sm:$0xff] }
  0x29   :  { %1819 = vmatpush.bf16.msrb.mxu1 %v3197_v51  ;;  %v3224_v51 = vld [vmem:[%s4169_s1 + $0x248] sm:$0xff] }
  0x2a   :  { %1806 = vmatpush.bf16.msrb.mxu0 %v3188_v52  ;;  %v3215_v52 = vld [vmem:[%s4169_s1 + $0x200] sm:$0xff] }
  0x2b   :  { %1834 = vmatpush.bf16.msrb.mxu2 %v3204_v53  ;;  %v3231_v53 = vld [vmem:[%s4169_s1 + $0x280] sm:$0xff] }
  0x2c   :  { %1848 = vmatpush.bf16.msrb.mxu3 %v3212_v54  ;;  %v3239_v54 = vld [vmem:[%s4169_s1 + $0x2c0] sm:$0xff] }
  0x2d   :  { %1820 = vmatpush.bf16.msrb.mxu1 %v3196_v55  ;;  %v3254_v55 = vld [vmem:[%s4169_s1 + $0x338] sm:$0xff] }
  0x2e   :  { %1807 = vmatpush.bf16.msrb.mxu0 %v3187_v56  ;;  %v3270_v56 = vld [vmem:[%s4169_s1 + $0x3b8] sm:$0xff] }
  0x2f   :  { %1835 = vmatpush.bf16.msrb.mxu2 %v3203_v57  ;;  %v2243_v57 = vld [vmem:[%s4170_s0 + $0x20] sm:$0xf] }
  0x30   :  { %1849 = vmatpush.bf16.msrb.mxu3 %v3211_v58  ;;  %v3142_v58 = vld [vmem:[%s4170_s0 + $0x80] sm:$0xf0] }
  0x31   :  { %1821 = vmatpush.bf16.msrb.mxu1 %v3195_v59  ;;  %v2251_v59 = vld [vmem:[%s4170_s0 + $0x28] sm:$0xf] }
  0x32   :  { %1808 = vmatpush.bf16.msrb.mxu0 %v3186_v60  ;;  %v3143_v60 = vld [vmem:[%s4170_s0 + $0x88] sm:$0xf0] }
  0x33   :  { %1836 = vmatpush.bf16.msrb.mxu2 %v3202_v61  ;;  %v3278_v61 = vld [vmem:[%s4169_s1 + $0x3f8] sm:$0xff] }
  0x34   :  { %1850 = vmatpush.bf16.msrb.mxu3 %v3210_v62  ;;  %v3131_v62 = vld [vmem:[%s4170_s0 + $0x2c] sm:$0xf] }
  0x35   :  { %1822 = vmatpush.bf16.msrb.mxu1 %v3194_v63  ;;  %v2253_v63 = vld [vmem:[%s4170_s0 + $0x8c] sm:$0xf0] }
  0x36   :  { %1809 = vmatpush.bf16.msrb.mxu0 %v3185_v0  ;;  %v3223_v0 = vld [vmem:[%s4169_s1 + $0x240] sm:$0xff] }
  0x37   :  { %1837 = vmatpush.bf16.msrb.mxu2 %v3201_v1  ;;  %v3130_v1 = vld [vmem:[%s4170_s0 + $0x24] sm:$0xf] }
  0x38   :  { %1851 = vmatpush.bf16.msrb.mxu3 %v3209_v2  ;;  %v2245_v2 = vld [vmem:[%s4170_s0 + $0x84] sm:$0xf0] }
  0x39   :  { %1823 = vmatpush.bf16.msrb.mxu1 %v3193_v3  ;;  %v2244_v3 = vor.u32 %v3142_v58, %v2243_v57  ;;  %v3300_v57 = vld [vmem:[%s4169_s1 + $0x4a8] sm:$0xff] }
  0x3a   :  { %1810 = vmatpush.bf16.msrb.mxu0 %v3184_v4  ;;  %v2252_v4 = vor.u32 %v3143_v60, %v2251_v59  ;;  %v3308_v58 = vld [vmem:[%s4169_s1 + $0x4e8] sm:$0xff]  ;;  %v3283_v60 = vld [vmem:[%s4169_s1 + $0x420] sm:$0xff] }
  0x3b   :  { %1838 = vmatpush.bf16.msrb.mxu2 %v3200_v5  ;;  %v3262_v5 = vld [vmem:[%s4169_s1 + $0x378] sm:$0xff]  ;;  %v3292_v59 = vld [vmem:[%s4169_s1 + $0x468] sm:$0xff] }
  0x3c   :  { %1852 = vmatpush.bf16.msrb.mxu3 %v3208_v6  ;;  %v2256_v6 = vor.u32 %v3131_v62, %v2253_v63  ;;  %v3307_v62 = vld [vmem:[%s4169_s1 + $0x4e0] sm:$0xff] }
  0x3d   :  { %1824 = vmatpush.bf16.msrb.mxu1 %v3192_v7  ;;  %v2248_v7 = vor.u32 %v3130_v1, %v2245_v2  ;;  %v3291_v63 = vld [vmem:[%s4169_s1 + $0x460] sm:$0xff]  ;;  %v3298_v1 = vld [vmem:[%s4169_s1 + $0x498] sm:$0xff] }
  0x3e   :  { %1811 = vmatpush.bf16.msrb.mxu0 %v3183_v8  ;;  %v3253_v8 = vld [vmem:[%s4169_s1 + $0x330] sm:$0xff]  ;;  %v3306_v2 = vld [vmem:[%s4169_s1 + $0x4d8] sm:$0xff] }
  0x3f   :  { %1839 = vmatpush.bf16.msrb.mxu2 %v3199_v9  ;;  %v3269_v9 = vld [vmem:[%s4169_s1 + $0x3b0] sm:$0xff] }
  0x40   :  { %1853 = vmatpush.bf16.msrb.mxu3 %v3207_v10  ;;  %v3277_v10 = vld [vmem:[%s4169_s1 + $0x3f0] sm:$0xff] }
  0x41   :  { %1825 = vmatpush.bf16.msrb.mxu1 %v3191_v20  ;;  %1812 = vmatmul.bf16.vlgmr.msrb.gmra.mxu0 %v2228_v23  ;;  %v3250_v20 = vld [vmem:[%s4169_s1 + $0x318] sm:$0xff] }
  0x42   :  { %1860 = vmatpush.bf16.msra.mxu0 %v3222_v11  ;;  %1840 = vmatmul.bf16.vlgmr.msrb.gmra.mxu2 %v2236_v24  ;;  %v3261_v11 = vld [vmem:[%s4169_s1 + $0x370] sm:$0xff]  ;;  %v3258_v23 = vld [vmem:[%s4169_s1 + $0x358] sm:$0xff] }
  0x43   :  { %1888 = vmatpush.bf16.msra.mxu2 %v3238_v12  ;;  %1854 = vmatmul.bf16.vlgmr.msrb.gmra.mxu3 %v2240_v26  ;;  %v3252_v12 = vld [vmem:[%s4169_s1 + $0x328] sm:$0xff]  ;;  %v3249_v24 = vld [vmem:[%s4169_s1 + $0x310] sm:$0xff] }
  0x44   :  { %1902 = vmatpush.bf16.msra.mxu3 %v3246_v17  ;;  %1826 = vmatmul.bf16.vlgmr.msrb.gmra.mxu1 %v2232_v27  ;;  %v3267_v17 = vld [vmem:[%s4169_s1 + $0x3a0] sm:$0xff]  ;;  %v3273_v26 = vld [vmem:[%s4169_s1 + $0x3d0] sm:$0xff] }
  0x45   :  { %1874 = vmatpush.bf16.msra.mxu1 %v3230_v25  ;;  %v3265_v25 = vld [vmem:[%s4169_s1 + $0x390] sm:$0xff] }
  0x46   :  { %1861 = vmatpush.bf16.msra.mxu0 %v3221_v28  ;;  %v3257_v27 = vld [vmem:[%s4169_s1 + $0x350] sm:$0xff]  ;;  %v3248_v28 = vld [vmem:[%s4169_s1 + $0x308] sm:$0xff] }
  0x47   :  { %1889 = vmatpush.bf16.msra.mxu2 %v3237_v29  ;;  %v3264_v29 = vld [vmem:[%s4169_s1 + $0x388] sm:$0xff] }
  0x48   :  { %1903 = vmatpush.bf16.msra.mxu3 %v3245_v30  ;;  %v3272_v30 = vld [vmem:[%s4169_s1 + $0x3c8] sm:$0xff] }
  0x49   :  { %1875 = vmatpush.bf16.msra.mxu1 %v3229_v31  ;;  %v3256_v31 = vld [vmem:[%s4169_s1 + $0x348] sm:$0xff] }
  0x4a   :  { %1862 = vmatpush.bf16.msra.mxu0 %v3220_v32  ;;  %v3247_v32 = vld [vmem:[%s4169_s1 + $0x300] sm:$0xff] }
  0x4b   :  { %1890 = vmatpush.bf16.msra.mxu2 %v3236_v33  ;;  %v3263_v33 = vld [vmem:[%s4169_s1 + $0x380] sm:$0xff] }
  0x4c   :  { %1904 = vmatpush.bf16.msra.mxu3 %v3244_v34  ;;  %v3271_v34 = vld [vmem:[%s4169_s1 + $0x3c0] sm:$0xff] }
  0x4d   :  { %1876 = vmatpush.bf16.msra.mxu1 %v3228_v35  ;;  %v3286_v35 = vld [vmem:[%s4169_s1 + $0x438] sm:$0xff] }
  0x4e   :  { %1863 = vmatpush.bf16.msra.mxu0 %v3219_v36  ;;  %v3302_v36 = vld [vmem:[%s4169_s1 + $0x4b8] sm:$0xff] }
  0x4f   :  { %1891 = vmatpush.bf16.msra.mxu2 %v3235_v37  ;;  %v2259_v37 = vld [vmem:[%s4170_s0 + $0x30] sm:$0xf] }
  0x50   :  { %1905 = vmatpush.bf16.msra.mxu3 %v3243_v38  ;;  %v3144_v38 = vld [vmem:[%s4170_s0 + $0x90] sm:$0xf0] }
  0x51   :  { %1877 = vmatpush.bf16.msra.mxu1 %v3227_v39  ;;  %v2267_v39 = vld [vmem:[%s4170_s0 + $0x38] sm:$0xf] }
  0x52   :  { %1864 = vmatpush.bf16.msra.mxu0 %v3218_v40  ;;  %v3145_v40 = vld [vmem:[%s4170_s0 + $0x98] sm:$0xf0] }
  0x53   :  { %1892 = vmatpush.bf16.msra.mxu2 %v3234_v41  ;;  %v3310_v41 = vld [vmem:[%s4169_s1 + $0x4f8] sm:$0xff] }
  0x54   :  { %1906 = vmatpush.bf16.msra.mxu3 %v3242_v42  ;;  %v3133_v42 = vld [vmem:[%s4170_s0 + $0x3c] sm:$0xf] }
  0x55   :  { %1878 = vmatpush.bf16.msra.mxu1 %v3226_v43  ;;  %v2269_v43 = vld [vmem:[%s4170_s0 + $0x9c] sm:$0xf0] }
  0x56   :  { %1865 = vmatpush.bf16.msra.mxu0 %v3217_v44  ;;  %v3255_v44 = vld [vmem:[%s4169_s1 + $0x340] sm:$0xff] }
  0x57   :  { %1893 = vmatpush.bf16.msra.mxu2 %v3233_v45  ;;  %v3132_v45 = vld [vmem:[%s4170_s0 + $0x34] sm:$0xf] }
  0x58   :  { %1907 = vmatpush.bf16.msra.mxu3 %v3241_v46  ;;  %v2261_v46 = vld [vmem:[%s4170_s0 + $0x94] sm:$0xf0] }
  0x59   :  { %1879 = vmatpush.bf16.msra.mxu1 %v3225_v47  ;;  %v2260_v47 = vor.u32 %v3144_v38, %v2259_v37  ;;  %v3332_v37 = vld [vmem:[%s4169_s1 + $0x5a8] sm:$0xff] }
  0x5a   :  { %1866 = vmatpush.bf16.msra.mxu0 %v3216_v48  ;;  %v2268_v48 = vor.u32 %v3145_v40, %v2267_v39  ;;  %v3340_v38 = vld [vmem:[%s4169_s1 + $0x5e8] sm:$0xff]  ;;  %v3315_v40 = vld [vmem:[%s4169_s1 + $0x520] sm:$0xff] }
  0x5b   :  { %1894 = vmatpush.bf16.msra.mxu2 %v3232_v49  ;;  %v3294_v49 = vld [vmem:[%s4169_s1 + $0x478] sm:$0xff]  ;;  %v3324_v39 = vld [vmem:[%s4169_s1 + $0x568] sm:$0xff] }
  0x5c   :  { %1908 = vmatpush.bf16.msra.mxu3 %v3240_v50  ;;  %v2272_v50 = vor.u32 %v3133_v42, %v2269_v43  ;;  %v3339_v42 = vld [vmem:[%s4169_s1 + $0x5e0] sm:$0xff] }
  0x5d   :  { %1880 = vmatpush.bf16.msra.mxu1 %v3224_v51  ;;  %v2264_v51 = vor.u32 %v3132_v45, %v2261_v46  ;;  %v3323_v43 = vld [vmem:[%s4169_s1 + $0x560] sm:$0xff]  ;;  %v3330_v45 = vld [vmem:[%s4169_s1 + $0x598] sm:$0xff] }
  0x5e   :  { %1867 = vmatpush.bf16.msra.mxu0 %v3215_v52  ;;  %v3285_v52 = vld [vmem:[%s4169_s1 + $0x430] sm:$0xff]  ;;  %v3338_v46 = vld [vmem:[%s4169_s1 + $0x5d8] sm:$0xff] }
  0x5f   :  { %1895 = vmatpush.bf16.msra.mxu2 %v3231_v53  ;;  %v3301_v53 = vld [vmem:[%s4169_s1 + $0x4b0] sm:$0xff] }
  0x60   :  { %1909 = vmatpush.bf16.msra.mxu3 %v3239_v54  ;;  %v3309_v54 = vld [vmem:[%s4169_s1 + $0x4f0] sm:$0xff] }
  0x61   :  { %1881 = vmatpush.bf16.msra.mxu1 %v3223_v0  ;;  %1868 = vmatmul.bf16.vlgmr.msra.gmra.mxu0 %v2244_v3  ;;  %v3282_v0 = vld [vmem:[%s4169_s1 + $0x418] sm:$0xff] }
  0x62   :  { %1916 = vmatpush.bf16.msrb.mxu0 %v3254_v55  ;;  %1896 = vmatmul.bf16.vlgmr.msra.gmra.mxu2 %v2252_v4  ;;  %v3293_v55 = vld [vmem:[%s4169_s1 + $0x470] sm:$0xff]  ;;  %v3290_v3 = vld [vmem:[%s4169_s1 + $0x458] sm:$0xff] }
  0x63   :  { %1944 = vmatpush.bf16.msrb.mxu2 %v3270_v56  ;;  %1910 = vmatmul.bf16.vlgmr.msra.gmra.mxu3 %v2256_v6  ;;  %v3284_v56 = vld [vmem:[%s4169_s1 + $0x428] sm:$0xff]  ;;  %v3281_v4 = vld [vmem:[%s4169_s1 + $0x410] sm:$0xff] }
  0x64   :  { %1958 = vmatpush.bf16.msrb.mxu3 %v3278_v61  ;;  %1882 = vmatmul.bf16.vlgmr.msra.gmra.mxu1 %v2248_v7  ;;  %v3299_v61 = vld [vmem:[%s4169_s1 + $0x4a0] sm:$0xff]  ;;  %v3305_v6 = vld [vmem:[%s4169_s1 + $0x4d0] sm:$0xff] }
  0x65   :  { %1930 = vmatpush.bf16.msrb.mxu1 %v3262_v5  ;;  %v3297_v5 = vld [vmem:[%s4169_s1 + $0x490] sm:$0xff] }
  0x66   :  { %1917 = vmatpush.bf16.msrb.mxu0 %v3253_v8  ;;  %v3289_v7 = vld [vmem:[%s4169_s1 + $0x450] sm:$0xff]  ;;  %v3280_v8 = vld [vmem:[%s4169_s1 + $0x408] sm:$0xff] }
  0x67   :  { %1945 = vmatpush.bf16.msrb.mxu2 %v3269_v9  ;;  %v3296_v9 = vld [vmem:[%s4169_s1 + $0x488] sm:$0xff] }
  0x68   :  { %1959 = vmatpush.bf16.msrb.mxu3 %v3277_v10  ;;  %v3304_v10 = vld [vmem:[%s4169_s1 + $0x4c8] sm:$0xff] }
  0x69   :  { %1931 = vmatpush.bf16.msrb.mxu1 %v3261_v11  ;;  %v3288_v11 = vld [vmem:[%s4169_s1 + $0x448] sm:$0xff] }
  0x6a   :  { %1918 = vmatpush.bf16.msrb.mxu0 %v3252_v12  ;;  %v3279_v12 = vld [vmem:[%s4169_s1 + $0x400] sm:$0xff] }
  0x6b   :  { %1946 = vmatpush.bf16.msrb.mxu2 %v3268_v13  ;;  %v3295_v13 = vld [vmem:[%s4169_s1 + $0x480] sm:$0xff] }
  0x6c   :  { %1960 = vmatpush.bf16.msrb.mxu3 %v3276_v14  ;;  %v3303_v14 = vld [vmem:[%s4169_s1 + $0x4c0] sm:$0xff] }
  0x6d   :  { %1932 = vmatpush.bf16.msrb.mxu1 %v3260_v15  ;;  %v3318_v15 = vld [vmem:[%s4169_s1 + $0x538] sm:$0xff] }
  0x6e   :  { %1919 = vmatpush.bf16.msrb.mxu0 %v3251_v16  ;;  %v3334_v16 = vld [vmem:[%s4169_s1 + $0x5b8] sm:$0xff] }
  0x6f   :  { %1947 = vmatpush.bf16.msrb.mxu2 %v3267_v17  ;;  %v2275_v17 = vld [vmem:[%s4170_s0 + $0x40] sm:$0xf] }
  0x70   :  { %1961 = vmatpush.bf16.msrb.mxu3 %v3275_v18  ;;  %v3146_v18 = vld [vmem:[%s4170_s0 + $0xa0] sm:$0xf0] }
  0x71   :  { %1933 = vmatpush.bf16.msrb.mxu1 %v3259_v19  ;;  %v2283_v19 = vld [vmem:[%s4170_s0 + $0x48] sm:$0xf] }
  0x72   :  { %1920 = vmatpush.bf16.msrb.mxu0 %v3250_v20  ;;  %v3147_v20 = vld [vmem:[%s4170_s0 + $0xa8] sm:$0xf0] }
  0x73   :  { %1948 = vmatpush.bf16.msrb.mxu2 %v3266_v21  ;;  %v3342_v21 = vld [vmem:[%s4169_s1 + $0x5f8] sm:$0xff] }
  0x74   :  { %1962 = vmatpush.bf16.msrb.mxu3 %v3274_v22  ;;  %v3135_v22 = vld [vmem:[%s4170_s0 + $0x4c] sm:$0xf] }
  0x75   :  { %1934 = vmatpush.bf16.msrb.mxu1 %v3258_v23  ;;  %v2285_v23 = vld [vmem:[%s4170_s0 + $0xac] sm:$0xf0] }
  0x76   :  { %1921 = vmatpush.bf16.msrb.mxu0 %v3249_v24  ;;  %v3287_v24 = vld [vmem:[%s4169_s1 + $0x440] sm:$0xff] }
  0x77   :  { %1949 = vmatpush.bf16.msrb.mxu2 %v3265_v25  ;;  %v3134_v25 = vld [vmem:[%s4170_s0 + $0x44] sm:$0xf] }
  0x78   :  { %1963 = vmatpush.bf16.msrb.mxu3 %v3273_v26  ;;  %v2277_v26 = vld [vmem:[%s4170_s0 + $0xa4] sm:$0xf0] }
  0x79   :  { %1935 = vmatpush.bf16.msrb.mxu1 %v3257_v27  ;;  %v2276_v27 = vor.u32 %v3146_v18, %v2275_v17 }
  0x7a   :  { %1922 = vmatpush.bf16.msrb.mxu0 %v3248_v28  ;;  %v2284_v28 = vor.u32 %v3147_v20, %v2283_v19 }
  0x7b   :  { %1950 = vmatpush.bf16.msrb.mxu2 %v3264_v29  ;;  %v3326_v29 = vld [vmem:[%s4169_s1 + $0x578] sm:$0xff] }
  0x7c   :  { %1964 = vmatpush.bf16.msrb.mxu3 %v3272_v30  ;;  %v2288_v30 = vor.u32 %v3135_v22, %v2285_v23 }
  0x7d   :  { %1936 = vmatpush.bf16.msrb.mxu1 %v3256_v31  ;;  %v2280_v31 = vor.u32 %v3134_v25, %v2277_v26 }
  0x7e   :  { %1923 = vmatpush.bf16.msrb.mxu0 %v3247_v32  ;;  %v3317_v32 = vld [vmem:[%s4169_s1 + $0x530] sm:$0xff] }
  0x7f   :  { %1951 = vmatpush.bf16.msrb.mxu2 %v3263_v33  ;;  %v3333_v33 = vld [vmem:[%s4169_s1 + $0x5b0] sm:$0xff] }
  0x80   :  { %1965 = vmatpush.bf16.msrb.mxu3 %v3271_v34  ;;  %v3341_v34 = vld [vmem:[%s4169_s1 + $0x5f0] sm:$0xff] }
  0x81   :  { %1937 = vmatpush.bf16.msrb.mxu1 %v3255_v44  ;;  %1924 = vmatmul.bf16.vlgmr.msrb.gmra.mxu0 %v2260_v47  ;;  %v3314_v44 = vld [vmem:[%s4169_s1 + $0x518] sm:$0xff] }
  0x82   :  { %1972 = vmatpush.bf16.msra.mxu0 %v3286_v35  ;;  %1952 = vmatmul.bf16.vlgmr.msrb.gmra.mxu2 %v2268_v48  ;;  %v3325_v35 = vld [vmem:[%s4169_s1 + $0x570] sm:$0xff]  ;;  %v3322_v47 = vld [vmem:[%s4169_s1 + $0x558] sm:$0xff] }
  0x83   :  { %2000 = vmatpush.bf16.msra.mxu2 %v3302_v36  ;;  %1966 = vmatmul.bf16.vlgmr.msrb.gmra.mxu3 %v2272_v50  ;;  %v3316_v36 = vld [vmem:[%s4169_s1 + $0x528] sm:$0xff]  ;;  %v3313_v48 = vld [vmem:[%s4169_s1 + $0x510] sm:$0xff] }
  0x84   :  { %2014 = vmatpush.bf16.msra.mxu3 %v3310_v41  ;;  %1938 = vmatmul.bf16.vlgmr.msrb.gmra.mxu1 %v2264_v51  ;;  %v3331_v41 = vld [vmem:[%s4169_s1 + $0x5a0] sm:$0xff]  ;;  %v3337_v50 = vld [vmem:[%s4169_s1 + $0x5d0] sm:$0xff] }
  0x85   :  { %1986 = vmatpush.bf16.msra.mxu1 %v3294_v49  ;;  %v3329_v49 = vld [vmem:[%s4169_s1 + $0x590] sm:$0xff] }
  0x86   :  { %1973 = vmatpush.bf16.msra.mxu0 %v3285_v52  ;;  %v3321_v51 = vld [vmem:[%s4169_s1 + $0x550] sm:$0xff]  ;;  %v3312_v52 = vld [vmem:[%s4169_s1 + $0x508] sm:$0xff] }
  0x87   :  { %2001 = vmatpush.bf16.msra.mxu2 %v3301_v53  ;;  %v3328_v53 = vld [vmem:[%s4169_s1 + $0x588] sm:$0xff] }
  0x88   :  { %2015 = vmatpush.bf16.msra.mxu3 %v3309_v54  ;;  %v3336_v54 = vld [vmem:[%s4169_s1 + $0x5c8] sm:$0xff] }
  0x89   :  { %1987 = vmatpush.bf16.msra.mxu1 %v3293_v55  ;;  %v3320_v55 = vld [vmem:[%s4169_s1 + $0x548] sm:$0xff] }
  0x8a   :  { %1974 = vmatpush.bf16.msra.mxu0 %v3284_v56  ;;  %v3311_v56 = vld [vmem:[%s4169_s1 + $0x500] sm:$0xff] }
  0x8b   :  { %2002 = vmatpush.bf16.msra.mxu2 %v3300_v57  ;;  %v3327_v57 = vld [vmem:[%s4169_s1 + $0x580] sm:$0xff] }
  0x8c   :  { %2016 = vmatpush.bf16.msra.mxu3 %v3308_v58  ;;  %v3335_v58 = vld [vmem:[%s4169_s1 + $0x5c0] sm:$0xff] }
  0x8d   :  { %1988 = vmatpush.bf16.msra.mxu1 %v3292_v59  ;;  %v2291_v59 = vld [vmem:[%s4170_s0 + $0x50] sm:$0xf] }
  0x8e   :  { %1975 = vmatpush.bf16.msra.mxu0 %v3283_v60  ;;  %v3148_v60 = vld [vmem:[%s4170_s0 + $0xb0] sm:$0xf0] }
  0x8f   :  { %2003 = vmatpush.bf16.msra.mxu2 %v3299_v61  ;;  %v2299_v61 = vld [vmem:[%s4170_s0 + $0x58] sm:$0xf] }
  0x90   :  { %2017 = vmatpush.bf16.msra.mxu3 %v3307_v62  ;;  %v3149_v62 = vld [vmem:[%s4170_s0 + $0xb8] sm:$0xf0] }
  0x91   :  { %1989 = vmatpush.bf16.msra.mxu1 %v3291_v63  ;;  %v3137_v63 = vld [vmem:[%s4170_s0 + $0x5c] sm:$0xf] }
  0x92   :  { %1976 = vmatpush.bf16.msra.mxu0 %v3282_v0  ;;  %v2301_v0 = vld [vmem:[%s4170_s0 + $0xbc] sm:$0xf0] }
  0x93   :  { %2004 = vmatpush.bf16.msra.mxu2 %v3298_v1  ;;  %v3346_v1 = vld [vmem:[%s4169_s1 + $0x618] sm:$0xff] }
  0x94   :  { %2018 = vmatpush.bf16.msra.mxu3 %v3306_v2  ;;  %v3319_v2 = vld [vmem:[%s4169_s1 + $0x540] sm:$0xff] }
  0x95   :  { %1990 = vmatpush.bf16.msra.mxu1 %v3290_v3  ;;  %v2292_v3 = vor.u32 %v3148_v60, %v2291_v59 }
  0x96   :  { %1977 = vmatpush.bf16.msra.mxu0 %v3281_v4  ;;  %v3136_v4 = vld [vmem:[%s4170_s0 + $0x54] sm:$0xf] }
  0x97   :  { %2005 = vmatpush.bf16.msra.mxu2 %v3297_v5  ;;  %v2293_v5 = vld [vmem:[%s4170_s0 + $0xb4] sm:$0xf0] }
  0x98   :  { %2019 = vmatpush.bf16.msra.mxu3 %v3305_v6  ;;  %v2300_v6 = vor.u32 %v3149_v62, %v2299_v61 }
  0x99   :  { %1991 = vmatpush.bf16.msra.mxu1 %v3289_v7  ;;  %v2304_v7 = vor.u32 %v3137_v63, %v2301_v0  ;;  %v3352_v63 = vld [vmem:[%s4173_s3 + $0x28] sm:$0xff] }
  0x9a   :  { %1978 = vmatpush.bf16.msra.mxu0 %v3280_v8  ;;  %v2296_v8 = vor.u32 %v3136_v4, %v2293_v5  ;;  %v3351_v4 = vld [vmem:[%s4173_s3 + $0x20] sm:$0xff] }
  0x9b   :  { %2006 = vmatpush.bf16.msra.mxu2 %v3296_v9  ;;  %v3345_v9 = vld [vmem:[%s4169_s1 + $0x610] sm:$0xff] }
  0x9c   :  { %2020 = vmatpush.bf16.msra.mxu3 %v3304_v10  ;;  %v3344_v10 = vld [vmem:[%s4169_s1 + $0x608] sm:$0xff] }
  0x9d   :  { %1992 = vmatpush.bf16.msra.mxu1 %v3288_v11  ;;  %v3343_v11 = vld [vmem:[%s4169_s1 + $0x600] sm:$0xff] }
  0x9e   :  { %1979 = vmatpush.bf16.msra.mxu0 %v3279_v12  ;;  %v2307_v12 = vld [vmem:[%s4170_s0 + $0x60] sm:$0xf] }
  0x9f   :  { %2007 = vmatpush.bf16.msra.mxu2 %v3295_v13  ;;  %v3150_v13 = vld [vmem:[%s4170_s0 + $0xc0] sm:$0xf0] }
  0xa0   :  { %2021 = vmatpush.bf16.msra.mxu3 %v3303_v14  ;;  %v2308_v14 = vor.u32 %v3150_v13, %v2307_v12 }
  0xa1   :  { %1993 = vmatpush.bf16.msra.mxu1 %v3287_v24  ;;  %1980 = vmatmul.bf16.vlgmr.msra.gmra.mxu0 %v2276_v27 }
  0xa2   :  { %2028 = vmatpush.bf16.msrb.mxu0 %v3318_v15  ;;  %2008 = vmatmul.bf16.vlgmr.msra.gmra.mxu2 %v2284_v28  ;;  %v1757_v15 = vpop.f32.mrf.mxu0  ;;  %v3355_v28 = vld [vmem:[%s4171_s2] ss:$0 sm:$0xff] }
  0xa3   :  { %2056 = vmatpush.bf16.msrb.mxu2 %v3334_v16  ;;  %2022 = vmatmul.bf16.vlgmr.msra.gmra.mxu3 %v2288_v30  ;;  %v1771_v16 = vpop.f32.mrf.mxu1  ;;  %v1758_v30 = vadd.f32 %v3355_v28, %v1757_v15 }
  0xa4   :  { %2070 = vmatpush.bf16.msrb.mxu3 %v3342_v21  ;;  %1994 = vmatmul.bf16.vlgmr.msra.gmra.mxu1 %v2280_v31 }
  0xa5   :  { %2042 = vmatpush.bf16.msrb.mxu1 %v3326_v29  ;;  %v1785_v17 = vpop.f32.mrf.mxu2 }
  0xa6   :  { %2029 = vmatpush.bf16.msrb.mxu0 %v3317_v32  ;;  %v1799_v19 = vpop.f32.mrf.mxu3 }
  0xa7   :  { %2057 = vmatpush.bf16.msrb.mxu2 %v3333_v33  ;;  %v1772_v33 = vadd.f32 %v1771_v16, %v1758_v30  ;;  %v3349_v16 = vld [vmem:[%s4173_s3 + $0x10] sm:$0xff] }
  0xa8   :  { %2071 = vmatpush.bf16.msrb.mxu3 %v3341_v34 }
  0xa9   :  { %2043 = vmatpush.bf16.msrb.mxu1 %v3325_v35 }
  0xaa   :  { %2030 = vmatpush.bf16.msrb.mxu0 %v3316_v36  ;;  %v1759_v18 = vpop.f32.mrf.mxu0 }
  0xab   :  { %2058 = vmatpush.bf16.msrb.mxu2 %v3332_v37  ;;  %v1773_v20 = vpop.f32.mrf.mxu1  ;;  %v1760_v36 = vadd.f32 %v3355_v28, %v1759_v18  ;;  %v1786_v37 = vadd.f32 %v1785_v17, %v1772_v33 }
  0xac   :  { %2072 = vmatpush.bf16.msrb.mxu3 %v3340_v38 }
  0xad   :  { %2044 = vmatpush.bf16.msrb.mxu1 %v3324_v39  ;;  %v1787_v21 = vpop.f32.mrf.mxu2  ;;  %v1774_v39 = vadd.f32 %v1773_v20, %v1760_v36  ;;  %v3348_v20 = vld [vmem:[%s4173_s3 + $0x8] sm:$0xff] }
  0xae   :  { %2031 = vmatpush.bf16.msrb.mxu0 %v3315_v40  ;;  %v1801_v23 = vpop.f32.mrf.mxu3 }
  0xaf   :  { %2059 = vmatpush.bf16.msrb.mxu2 %v3331_v41  ;;  %v1800_v41 = vadd.f32 %v1799_v19, %v1786_v37 }
  0xb0   :  { %2073 = vmatpush.bf16.msrb.mxu3 %v3339_v42 }
  0xb1   :  { %2045 = vmatpush.bf16.msrb.mxu1 %v3323_v43  ;;  %v1788_v43 = vadd.f32 %v1787_v21, %v1774_v39 }
  0xb2   :  { %2032 = vmatpush.bf16.msrb.mxu0 %v3314_v44 }
  0xb3   :  { %2060 = vmatpush.bf16.msrb.mxu2 %v3330_v45 }
  0xb4   :  { %2074 = vmatpush.bf16.msrb.mxu3 %v3338_v46  ;;  %v1802_v46 = vadd.f32 %v1801_v23, %v1788_v43 }
  0xb5   :  { %2046 = vmatpush.bf16.msrb.mxu1 %v3322_v47 }
  0xb6   :  { %2033 = vmatpush.bf16.msrb.mxu0 %v3313_v48 }
  0xb7   :  { %2061 = vmatpush.bf16.msrb.mxu2 %v3329_v49 }
  0xb8   :  { %2075 = vmatpush.bf16.msrb.mxu3 %v3337_v50 }
  0xb9   :  { %2047 = vmatpush.bf16.msrb.mxu1 %v3321_v51  ;;  %v3354_v51 = vld [vmem:[%s4173_s3 + $0x38] sm:$0xff] }
  0xba   :  { %2034 = vmatpush.bf16.msrb.mxu0 %v3312_v52 }
  0xbb   :  { %2062 = vmatpush.bf16.msrb.mxu2 %v3328_v53 }
  0xbc   :  { %2076 = vmatpush.bf16.msrb.mxu3 %v3336_v54 }
  0xbd   :  { %2048 = vmatpush.bf16.msrb.mxu1 %v3320_v55 }
  0xbe   :  { %2035 = vmatpush.bf16.msrb.mxu0 %v3311_v56  ;;  %v1813_v22 = vpop.f32.mrf.mxu0 }
  0xbf   :  { %2063 = vmatpush.bf16.msrb.mxu2 %v3327_v57  ;;  %v1814_v45 = vadd.f32 %v1813_v22, %v1800_v41 }
  0xc0   :  { %2077 = vmatpush.bf16.msrb.mxu3 %v3335_v58  ;;  %v3353_v58 = vld [vmem:[%s4173_s3 + $0x30] sm:$0xff] }
  0xc1   :  { %2049 = vmatpush.bf16.msrb.mxu1 %v3319_v2  ;;  %2036 = vmatmul.bf16.vlgmr.msrb.gmra.mxu0 %v2292_v3  ;;  %v1827_v24 = vpop.f32.mrf.mxu1 }
  0xc2   :  { %2088 = vmatpush.bf16.msra.mxu0 %v3346_v1  ;;  %2064 = vmatmul.bf16.vlgmr.msrb.gmra.mxu2 %v2300_v6  ;;  %v1828_v49 = vadd.f32 %v1827_v24, %v1814_v45 }
  0xc3   :  { %2078 = vmatmul.bf16.vlgmr.msrb.gmra.mxu3 %v2304_v7 }
  0xc4   :  { %2050 = vmatmul.bf16.vlgmr.msrb.gmra.mxu1 %v2296_v8 }
  0xc5   :  { %v1841_v25 = vpop.f32.mrf.mxu2  ;;  %2169 = vmatpush.bf16.msra.mxu1 %v3354_v51 }
  0xc6   :  { %2089 = vmatpush.bf16.msra.mxu0 %v3345_v9  ;;  %v1815_v26 = vpop.f32.mrf.mxu0  ;;  %v1855_v27 = vpop.f32.mrf.mxu3  ;;  %v1842_v54 = vadd.f32 %v1841_v25, %v1828_v49 }
  0xc7   :  { %v1816_v50 = vadd.f32 %v1815_v26, %v1802_v46  ;;  %v3347_v26 = vld [vmem:[%s4173_s3] sm:$0xff] }
  0xc8   :  { %v1856_v59 = vadd.f32 %v1855_v27, %v1842_v54 }
  0xc9   :  { %v1829_v29 = vpop.f32.mrf.mxu1  ;;  %2170 = vmatpush.bf16.msra.mxu1 %v3353_v58 }
  0xca   :  { %2090 = vmatpush.bf16.msra.mxu0 %v3344_v10  ;;  %v1830_v55 = vadd.f32 %v1829_v29, %v1816_v50  ;;  %v3350_v10 = vld [vmem:[%s4173_s3 + $0x18] sm:$0xff] }
  0xcd   :  { %v1843_v31 = vpop.f32.mrf.mxu2  ;;  %2171 = vmatpush.bf16.msra.mxu1 %v3352_v63  ;;  %v3356_v63 = vld [vmem:[%s4172_s4] ss:$0 sm:$0xff] }
  0xce   :  { %2091 = vmatpush.bf16.msra.mxu0 %v3343_v11  ;;  %v1857_v34 = vpop.f32.mrf.mxu3  ;;  %v1844_v56 = vadd.f32 %v1843_v31, %v1830_v55 }
  0xd0   :  { %v1858_v61 = vadd.f32 %v1857_v34, %v1844_v56 }
  0xd1   :  { %3093 = vmatmul.msk.bf16.vlgmr.msra.gmra.mxu0 %vm1744_vm0, %v2308_v14  ;;  %2172 = vmatpush.bf16.msra.mxu1 %v3351_v4 }
  0xd5   :  { %2173 = vmatpush.bf16.msra.mxu1 %v3350_v10 }
  0xd9   :  { %2174 = vmatpush.bf16.msra.mxu1 %v3349_v16 }
  0xdd   :  { %2175 = vmatpush.bf16.msra.mxu1 %v3348_v20 }
  0xde   :  { %v1869_v32 = vpop.f32.mrf.mxu0 }
  0xdf   :  { %v1870_v62 = vadd.f32 %v1869_v32, %v1856_v59 }
  0xe1   :  { %v1883_v35 = vpop.f32.mrf.mxu1  ;;  %2176 = vmatpush.bf16.msra.mxu1 %v3347_v26 }
  0xe2   :  { %v1884_v3 = vadd.f32 %v1883_v35, %v1870_v62 }
  0xe5   :  { %v1897_v38 = vpop.f32.mrf.mxu2 }
  0xe6   :  { %v1871_v40 = vpop.f32.mrf.mxu0  ;;  %v1911_v42 = vpop.f32.mrf.mxu3  ;;  %v1898_v5 = vadd.f32 %v1897_v38, %v1884_v3 }
  0xe7   :  { %v1872_v1 = vadd.f32 %v1871_v40, %v1858_v61 }
  0xe8   :  { %v1912_v11 = vadd.f32 %v1911_v42, %v1898_v5 }
  0xe9   :  { %v1885_v44 = vpop.f32.mrf.mxu1 }
  0xea   :  { %v1886_v6 = vadd.f32 %v1885_v44, %v1872_v1 }
  0xed   :  { %v1899_v47 = vpop.f32.mrf.mxu2 }
  0xee   :  { %v1913_v52 = vpop.f32.mrf.mxu3  ;;  %v1900_v9 = vadd.f32 %v1899_v47, %v1886_v6 }
  0xf0   :  { %v1914_v14 = vadd.f32 %v1913_v52, %v1900_v9 }
  0xfe   :  { %v1925_v48 = vpop.f32.mrf.mxu0 }
  0xff   :  { %v1926_v15 = vadd.f32 %v1925_v48, %v1912_v11 }
 0x101   :  { %v1939_v53 = vpop.f32.mrf.mxu1 }
 0x102   :  { %v1940_v19 = vadd.f32 %v1939_v53, %v1926_v15 }
 0x105   :  { %v1953_v57 = vpop.f32.mrf.mxu2 }
 0x106   :  { %v1927_v60 = vpop.f32.mrf.mxu0  ;;  %v1967_v0 = vpop.f32.mrf.mxu3  ;;  %v1954_v22 = vadd.f32 %v1953_v57, %v1940_v19 }
 0x107   :  { %v1928_v17 = vadd.f32 %v1927_v60, %v1914_v14 }
 0x108   :  { %v1968_v28 = vadd.f32 %v1967_v0, %v1954_v22 }
 0x109   :  { %v1941_v2 = vpop.f32.mrf.mxu1 }
 0x10a   :  { %v1942_v23 = vadd.f32 %v1941_v2, %v1928_v17 }
 0x10d   :  { %v1955_v7 = vpop.f32.mrf.mxu2 }
 0x10e   :  { %v1969_v12 = vpop.f32.mrf.mxu3  ;;  %v1956_v25 = vadd.f32 %v1955_v7, %v1942_v23 }
 0x110   :  { %v1970_v29 = vadd.f32 %v1969_v12, %v1956_v25 }
 0x11e   :  { %v1981_v8 = vpop.f32.mrf.mxu0 }
 0x11f   :  { %v1982_v30 = vadd.f32 %v1981_v8, %v1968_v28 }
 0x121   :  { %v1995_v13 = vpop.f32.mrf.mxu1 }
 0x122   :  { %v1996_v34 = vadd.f32 %v1995_v13, %v1982_v30 }
 0x125   :  { %v2009_v18 = vpop.f32.mrf.mxu2 }
 0x126   :  { %v1983_v21 = vpop.f32.mrf.mxu0  ;;  %v2023_v24 = vpop.f32.mrf.mxu3  ;;  %v2010_v37 = vadd.f32 %v2009_v18, %v1996_v34 }
 0x127   :  { %v1984_v33 = vadd.f32 %v1983_v21, %v1970_v29 }
 0x128   :  { %v2024_v42 = vadd.f32 %v2023_v24, %v2010_v37 }
 0x129   :  { %v1997_v27 = vpop.f32.mrf.mxu1 }
 0x12a   :  { %v1998_v38 = vadd.f32 %v1997_v27, %v1984_v33 }
 0x12d   :  { %v2011_v31 = vpop.f32.mrf.mxu2 }
 0x12e   :  { %v2025_v35 = vpop.f32.mrf.mxu3  ;;  %v2012_v39 = vadd.f32 %v2011_v31, %v1998_v38 }
 0x130   :  { %v2026_v43 = vadd.f32 %v2025_v35, %v2012_v39 }
 0x13e   :  { %v2037_v32 = vpop.f32.mrf.mxu0 }
 0x13f   :  { %v2038_v44 = vadd.f32 %v2037_v32, %v2024_v42 }
 0x141   :  { %v2051_v36 = vpop.f32.mrf.mxu1 }
 0x142   :  { %v2052_v48 = vadd.f32 %v2051_v36, %v2038_v44 }
 0x145   :  { %v2065_v40 = vpop.f32.mrf.mxu2 }
 0x146   :  { %v2039_v41 = vpop.f32.mrf.mxu0  ;;  %v2079_v45 = vpop.f32.mrf.mxu3  ;;  %v2066_v51 = vadd.f32 %v2065_v40, %v2052_v48 }
 0x147   :  { %v2040_v46 = vadd.f32 %v2039_v41, %v2026_v43 }
 0x148   :  { %v2080_v54 = vadd.f32 %v2079_v45, %v2066_v51 }
 0x149   :  { %v2053_v47 = vpop.f32.mrf.mxu1 }
 0x14a   :  { %v2054_v52 = vadd.f32 %v2053_v47, %v2040_v46 }
 0x14d   :  { %v2067_v49 = vpop.f32.mrf.mxu2 }
 0x14e   :  { %v2093_v50 = vpop.f32.mrf.mxu0  ;;  %v2068_v53 = vadd.f32 %v2067_v49, %v2054_v52  ;;  %v2081_v55 = vpop.f32.mrf.mxu3 }
 0x14f   :  { %v2094_v57 = vadd.f32 %v2093_v50, %v2080_v54 }
 0x150   :  { %v2082_v56 = vadd.f32 %v2081_v55, %v2068_v53 }
 0x151   :  { %v2098_v60 = vmax.f32 %v2094_v57, 0.0 }
 0x156   :  { %v2095_v58 = vpop.f32.mrf.mxu0 }
 0x157   :  { %v2096_v59 = vadd.f32 %v2095_v58, %v2082_v56 }
 0x159   :  { %v2099_v61 = vmax.f32 %v2096_v59, 0.0 }
 0x15b   :  { %v2100_v62 = vpack.c.bf16 %v2099_v61, %v2098_v60 }
 0x15d   :  { %2177 = vmatmul.bf16.vlgmr.msra.gmra.mxu1 %v2100_v62 }
 0x1da   :  { %v2178_v0 = vpop.f32.mrf.mxu1 }
 0x1db   :  { %v2179_v1 = vadd.f32 %v3356_v63, %v2178_v0 }
 0x1dd   :  { %2183 = vmax.xlane.f32.xlu0 %v2179_v1 }
 0x1e2   :  { %v2180_v2 = vpop.f32.mrf.mxu1 }
 0x1e3   :  { %v2181_v3 = vadd.f32 %v3356_v63, %v2180_v2 }
 0x1e5   :  { %2185 = vmax.xlane.f32.xlu0 %v2181_v3 }
 0x250   :  { %v2184_v4 = vpop.xlane.xlu0 %2183 }
 0x251   :  { %v2187_v5 = vsub.f32 %v2179_v1, %v2184_v4 }
 0x253   :  { %v2189_v6 = vmul.f32 1.442695, %v2187_v5 }
 0x255   :  { %3357 = vpow2.f32 %v2189_v6 }
 0x258   :  { %v2186_v7 = vpop.xlane.xlu0 %2185 }
 0x259   :  { %v2188_v8 = vsub.f32 %v2181_v3, %v2186_v7 }
 0x25b   :  { %v3358_v9 = vpop.eup %3357  ;;  %v2191_v10 = vmul.f32 1.442695, %v2188_v8 }
 0x25c   :  { %2193 = vadd.xlane.f32.xlu1 %v3358_v9 }
 0x25d   :  { %3359 = vpow2.f32 %v2191_v10 }
 0x263   :  { %v3360_v11 = vpop.eup %3359 }
 0x264   :  { %2195 = vadd.xlane.f32.xlu1 %v3360_v11 }
 0x2cf   :  { %v2194_v12 = vpop.xlane.xlu1 %2193 }
 0x2d0   :  { %3361 = vlog2.f32 %v2194_v12 }
 0x2d6   :  { %v3362_v13 = vpop.eup %3361 }
 0x2d7   :  { %v2198_v14 = vmul.f32 0.6931472, %v3362_v13  ;;  %v2196_v15 = vpop.xlane.xlu1 %2195 }
 0x2d8   :  { %3363 = vlog2.f32 %v2196_v15 }
 0x2d9   :  { %v2201_v16 = vsub.f32 %v2187_v5, %v2198_v14 }
 0x2db   :  { %2203 = vst [vmem:[%s4174_s5] sm:$0xff] %v2201_v16 }
 0x2de   :  { %v3364_v17 = vpop.eup %3363 }
 0x2df   :  { %v2200_v18 = vmul.f32 0.6931472, %v3364_v17 }
 0x2e1   :  { %v2202_v19 = vsub.f32 %v2188_v8, %v2200_v18 }
 0x2e3   :  { %2204 = vst [vmem:[%s4174_s5 + $0x8] sm:$0xff] %v2202_v19 }

</bundles_post_ra>
